<compile_context>
chip_gen: v7x
topology: tpu7x:2x2x1
jax: 0.10.0
libtpu: 0.0.40
codegen_flags: <defaults>
</compile_context>

<pallas_src>
import jax
import jax.numpy as jnp
from jax.experimental import pallas as pl
from jax.experimental.pallas import tpu as pltpu

EPS = 1e-5          # nn.BatchNorm2d default eps
NUM_PHASES = 4      # r1/q stats -> r2 stats -> b1 stats -> output

# rows of the packed (16, 128) bias / BN-affine table
(ROW_B_R1, ROW_B_KV, ROW_B_Q, ROW_B_R1C2, ROW_B_QC2, ROW_B_R2, ROW_B_R2C2,
 ROW_B_OUT, ROW_G_R1, ROW_BT_R1, ROW_G_Q, ROW_BT_Q, ROW_G_R2, ROW_BT_R2,
 ROW_G_B1, ROW_BT_B1) = range(16)
NUM_ROWS = 16


# ---------------------------------------------------------------------------
# kernel factory (static channel sizes + total row count closed over)
# ---------------------------------------------------------------------------
def _make_kernel(C1, C2, OC, n_rows_total):
    C12 = C1 + C2
    inv_n = 1.0 / float(n_rows_total)

    def kernel(x12_ref,
               w_r1_ref, w_kv_ref, w_q_ref, w_r1c2_ref, w_qc2_ref,
               w_r2_ref, w_r2c2_ref, w_out_ref, tab_ref,
               o_ref,
               acc_r1, acc_q, acc_r2, acc_b1):
        ph = pl.program_id(0)      # phase (outer, sequential)
        tile = pl.program_id(1)    # row tile (inner, sequential: BN coupling)

        def brow(i, width):        # packed bias / BN-affine row -> (1, width)
            return tab_ref[i:i + 1, :width]

        def dot(a, w_ref):         # bf16 x bf16 -> f32 accumulate on the MXU
            return jnp.dot(a.astype(jnp.bfloat16), w_ref[...],
                           preferred_element_type=jnp.float32)

        def accumulate(acc_ref, a):        # one-pass stats: [sum; sum(x^2)]
            @pl.when(tile == 0)
            def _():
                acc_ref[...] = jnp.zeros_like(acc_ref)
            s = jnp.sum(a, axis=0, keepdims=True)
            ss = jnp.sum(a * a, axis=0, keepdims=True)
            acc_ref[...] += jnp.concatenate([s, ss], axis=0)

        def bn_relu(a, acc_ref, g_row, b_row, width):
            mean = acc_ref[0:1, :] * inv_n
            var = acc_ref[1:2, :] * inv_n - mean * mean      # biased variance
            rstd = jax.lax.rsqrt(var + EPS)
            return jnp.maximum((a - mean) * rstd * brow(g_row, width)
                               + brow(b_row, width), 0.0)

        x12 = x12_ref[...]                  # bf16 (TP, C1+C2)
        x1 = x12[:, :C1]
        x2 = x12[:, C1:C12]

        # ---- level 1: fused [res1.res | res1.c1] and [query.res | query.c1]
        y_r1 = dot(x12, w_r1_ref) + brow(ROW_B_R1, 96)       # (TP, 96)
        r1_res, a_r1 = y_r1[:, :32], y_r1[:, 32:96]
        y_q = dot(x2, w_q_ref) + brow(ROW_B_Q, 48)           # (TP, 48)
        q_res, a_q = y_q[:, :32], y_q[:, 32:48]

        @pl.when(ph == 0)
        def _phase0():
            accumulate(acc_r1, a_r1)
            accumulate(acc_q, a_q)

        @pl.when(ph >= 1)
        def _later_phases():
            # ---- level 2: res / query / attention / res2.c1 pre-BN --------
            t_r1 = bn_relu(a_r1, acc_r1, ROW_G_R1, ROW_BT_R1, 64)
            res = dot(t_r1, w_r1c2_ref) + brow(ROW_B_R1C2, 32) + r1_res

            t_q = bn_relu(a_q, acc_q, ROW_G_Q, ROW_BT_Q, 16)
            query = dot(t_q, w_qc2_ref) + brow(ROW_B_QC2, 32) + q_res

            y_kv = dot(x1, w_kv_ref) + brow(ROW_B_KV, 64)    # [key | value]
            key, value = y_kv[:, :32], y_kv[:, 32:64]

            s = key * query                                  # channel softmax
            e = jnp.exp(s - jnp.max(s, axis=-1, keepdims=True))
            att = e * pl.reciprocal(jnp.sum(e, axis=-1, keepdims=True),
                                    approx=True)
            att_score = att * value

            e12 = jnp.concatenate([att_score, res], axis=-1)  # (TP, 64)
            y_r2 = dot(e12, w_r2_ref) + brow(ROW_B_R2, 48)    # [res | c1]
            r2_res, a_r2 = y_r2[:, :16], y_r2[:, 16:48]

            @pl.when(ph == 1)
            def _():
                accumulate(acc_r2, a_r2)

            @pl.when(ph >= 2)
            def _():
                # ---- level 3: embedding -------------------------------------
                t_r2 = bn_relu(a_r2, acc_r2, ROW_G_R2, ROW_BT_R2, 32)
                emb = dot(t_r2, w_r2c2_ref) + brow(ROW_B_R2C2, 16) + r2_res

                @pl.when(ph == 2)
                def _():
                    accumulate(acc_b1, emb)

                @pl.when(ph == 3)
                def _():
                    # ---- level 4: final BN+ReLU and 1x1 projection ----------
                    h = bn_relu(emb, acc_b1, ROW_G_B1, ROW_BT_B1, 16)
                    o_ref[...] = dot(h, w_out_ref) + brow(ROW_B_OUT, OC)

    return kernel


# ---------------------------------------------------------------------------
# parameters (deterministic synthetic init; Conv2d 1x1 weights stored (Cin,Cout))
# ---------------------------------------------------------------------------
def init_params(key, C1, C2, OC):
    ks = iter(jax.random.split(key, 32))

    def w(shape, scale=0.1):
        return jax.random.normal(next(ks), shape, jnp.float32) * scale

    def b(c):
        return jax.random.normal(next(ks), (1, c), jnp.float32) * 0.01

    p = {}
    p["key_w"], p["key_b"] = w((C1, 32)), b(32)
    p["val_w"], p["val_b"] = w((C1, 32)), b(32)
    # query = res_block(in_c2, 16, 32)
    p["q_c1_w"], p["q_c1_b"] = w((C2, 16)), b(16)
    p["q_bn_g"], p["q_bn_b"] = jnp.ones((1, 16), jnp.float32), jnp.zeros((1, 16), jnp.float32)
    p["q_res_w"], p["q_res_b"] = w((C2, 32)), b(32)
    p["q_c2_w"], p["q_c2_b"] = w((16, 32)), b(32)
    # res1 = res_block(in_c1 + in_c2, 64, 32)
    p["r1_c1_w"], p["r1_c1_b"] = w((C1 + C2, 64)), b(64)
    p["r1_bn_g"], p["r1_bn_b"] = jnp.ones((1, 64), jnp.float32), jnp.zeros((1, 64), jnp.float32)
    p["r1_res_w"], p["r1_res_b"] = w((C1 + C2, 32)), b(32)
    p["r1_c2_w"], p["r1_c2_b"] = w((64, 32)), b(32)
    # res2 = res_block(64, 32, 16)
    p["r2_c1_w"], p["r2_c1_b"] = w((64, 32)), b(32)
    p["r2_bn_g"], p["r2_bn_b"] = jnp.ones((1, 32), jnp.float32), jnp.zeros((1, 32), jnp.float32)
    p["r2_res_w"], p["r2_res_b"] = w((64, 16)), b(16)
    p["r2_c2_w"], p["r2_c2_b"] = w((32, 16)), b(16)
    # b1 + final 1x1
    p["b1_g"], p["b1_b"] = jnp.ones((1, 16), jnp.float32), jnp.zeros((1, 16), jnp.float32)
    p["out_w"], p["out_b"] = w((16, OC)), b(OC)
    return p


def prepare_params(p):
    """One-time weight fusion (output-dim concat), bf16 cast, bias packing."""
    bf16 = jnp.bfloat16
    prepared = {
        "w_r1":   jnp.concatenate([p["r1_res_w"], p["r1_c1_w"]], axis=1).astype(bf16),
        "w_kv":   jnp.concatenate([p["key_w"],    p["val_w"]],   axis=1).astype(bf16),
        "w_q":    jnp.concatenate([p["q_res_w"],  p["q_c1_w"]],  axis=1).astype(bf16),
        "w_r1c2": p["r1_c2_w"].astype(bf16),
        "w_qc2":  p["q_c2_w"].astype(bf16),
        "w_r2":   jnp.concatenate([p["r2_res_w"], p["r2_c1_w"]], axis=1).astype(bf16),
        "w_r2c2": p["r2_c2_w"].astype(bf16),
        "w_out":  p["out_w"].astype(bf16),
    }
    rows = {
        ROW_B_R1:   jnp.concatenate([p["r1_res_b"], p["r1_c1_b"]], axis=1),
        ROW_B_KV:   jnp.concatenate([p["key_b"],    p["val_b"]],   axis=1),
        ROW_B_Q:    jnp.concatenate([p["q_res_b"],  p["q_c1_b"]],  axis=1),
        ROW_B_R1C2: p["r1_c2_b"],
        ROW_B_QC2:  p["q_c2_b"],
        ROW_B_R2:   jnp.concatenate([p["r2_res_b"], p["r2_c1_b"]], axis=1),
        ROW_B_R2C2: p["r2_c2_b"],
        ROW_B_OUT:  p["out_b"],
        ROW_G_R1:   p["r1_bn_g"], ROW_BT_R1: p["r1_bn_b"],
        ROW_G_Q:    p["q_bn_g"],  ROW_BT_Q:  p["q_bn_b"],
        ROW_G_R2:   p["r2_bn_g"], ROW_BT_R2: p["r2_bn_b"],
        ROW_G_B1:   p["b1_g"],    ROW_BT_B1: p["b1_b"],
    }
    table = jnp.zeros((NUM_ROWS, 128), jnp.float32)
    for i, v in rows.items():
        table = table.at[i, : v.shape[-1]].set(v[0].astype(jnp.float32))
    prepared["table"] = table
    return prepared


def _pick_tile_rows(P, requested):
    if (requested is not None and 0 < requested <= P
            and P % requested == 0 and requested % 8 == 0):
        return requested
    for cand in (1024, 512, 256, 128, 64, 32, 16, 8):
        if cand <= P and P % cand == 0:
            return cand
    return P


# ---------------------------------------------------------------------------
# wrapper (layout glue in plain JAX, all compute in the kernel)
# ---------------------------------------------------------------------------
def att_res_decoder_pallas(x1_nchw, x2_nchw, prepared, *, tile_rows=512):
    N, C1, H, W = x1_nchw.shape
    C2 = x2_nchw.shape[1]
    C12 = C1 + C2
    OC = prepared["w_out"].shape[1]
    P = N * H * W

    TP = _pick_tile_rows(P, tile_rows)
    n_tiles = P // TP

    # NCHW -> (P, C) tokens, channel-concat once, bf16 matmul operands.
    x1 = jnp.transpose(x1_nchw, (0, 2, 3, 1)).reshape(P, C1)
    x2 = jnp.transpose(x2_nchw, (0, 2, 3, 1)).reshape(P, C2)
    x12 = jnp.concatenate([x1, x2], axis=1).astype(jnp.bfloat16)

    kernel = _make_kernel(C1, C2, OC, P)

    weight_names = ("w_r1", "w_kv", "w_q", "w_r1c2", "w_qc2",
                    "w_r2", "w_r2c2", "w_out")
    weights = [prepared[k] for k in weight_names]
    table = prepared["table"]

    in_specs = ([pl.BlockSpec((TP, C12), lambda ph, t: (t, 0))]
                + [pl.BlockSpec(wt.shape, lambda ph, t: (0, 0)) for wt in weights]
                + [pl.BlockSpec(table.shape, lambda ph, t: (0, 0))])

    out_flat = pl.pallas_call(
        kernel,
        out_shape=jax.ShapeDtypeStruct((P, OC), jnp.float32),
        grid=(NUM_PHASES, n_tiles),
        in_specs=in_specs,
        out_specs=pl.BlockSpec((TP, OC), lambda ph, t: (t, 0)),
        scratch_shapes=[
            pltpu.VMEM((2, 64), jnp.float32),   # res1 BN [sum; sumsq]
            pltpu.VMEM((2, 16), jnp.float32),   # query BN
            pltpu.VMEM((2, 32), jnp.float32),   # res2 BN
            pltpu.VMEM((2, 16), jnp.float32),   # b1 BN
        ],
        compiler_params=pltpu.CompilerParams(
            # Training-mode BN couples all rows: the row-tile axis must stay
            # sequential so the cross-tile stat accumulators are valid.
            # TODO(synk): with BN folded to inference affine form this becomes
            # a single phase with ("parallel",) row sharding (megacore).
            dimension_semantics=("arbitrary", "arbitrary"),
            vmem_limit_bytes=32 * 1024 * 1024,
        ),
    )(x12, *weights, table)

    return jnp.transpose(out_flat.reshape(N, H, W, OC), (0, 3, 1, 2))


# ---------------------------------------------------------------------------
# pure-JAX reference (mirrors the PyTorch forward, with explicit concats)
# ---------------------------------------------------------------------------
def reference(x1_nchw, x2_nchw, p):
    N, C1, H, W = x1_nchw.shape
    C2 = x2_nchw.shape[1]
    OC = p["out_w"].shape[1]
    P = N * H * W
    x1 = jnp.transpose(x1_nchw, (0, 2, 3, 1)).reshape(P, C1)
    x2 = jnp.transpose(x2_nchw, (0, 2, 3, 1)).reshape(P, C2)

    def conv(x, w, b):
        return x @ w + b

    def bn_relu(x, g, b):
        mean = x.mean(0, keepdims=True)
        var = ((x - mean) ** 2).mean(0, keepdims=True)
        return jnp.maximum((x - mean) / jnp.sqrt(var + EPS) * g + b, 0.0)

    def res_block(x, c1w, c1b, g, beta, rw, rb, c2w, c2b):
        r = conv(x, rw, rb)
        t = bn_relu(conv(x, c1w, c1b), g, beta)
        return conv(t, c2w, c2b) + r

    inputs = jnp.concatenate([x1, x2], axis=1)
    res = res_block(inputs, p["r1_c1_w"], p["r1_c1_b"], p["r1_bn_g"], p["r1_bn_b"],
                    p["r1_res_w"], p["r1_res_b"], p["r1_c2_w"], p["r1_c2_b"])
    key = conv(x1, p["key_w"], p["key_b"])
    value = conv(x1, p["val_w"], p["val_b"])
    query = res_block(x2, p["q_c1_w"], p["q_c1_b"], p["q_bn_g"], p["q_bn_b"],
                      p["q_res_w"], p["q_res_b"], p["q_c2_w"], p["q_c2_b"])
    att = jax.nn.softmax(key * query, axis=1)
    att_score = att * value
    emb = jnp.concatenate([att_score, res], axis=1)
    x = res_block(emb, p["r2_c1_w"], p["r2_c1_b"], p["r2_bn_g"], p["r2_bn_b"],
                  p["r2_res_w"], p["r2_res_b"], p["r2_c2_w"], p["r2_c2_b"])
    x = bn_relu(x, p["b1_g"], p["b1_b"])
    out = conv(x, p["out_w"], p["out_b"])
    return jnp.transpose(out.reshape(N, H, W, OC), (0, 3, 1, 2))


if __name__ == "__main__":
    master = jax.random.PRNGKey(0)
    k1, k2, kp = jax.random.split(master, 3)

    # module constraints: in_c1 > 32, in_c2 < 16, out_c < 32
    N, H, W = 2, 16, 16
    C1, C2, OC = 40, 8, 4

    x1 = jax.random.normal(k1, (N, C1, H, W), jnp.float32)
    x2 = jax.random.normal(k2, (N, C2, H, W), jnp.float32)
    params = init_params(kp, C1, C2, OC)
    prepared = prepare_params(params)

    # tile_rows=128 -> 4 row tiles at P=512, exercising the cross-tile BN-stat
    # phases; production default is 512+ rows per the HBM-roofline guidance.
    out = att_res_decoder_pallas(x1, x2, prepared, tile_rows=128)
    out = jax.block_until_ready(out)

    # Reference with the same bf16-rounded matmul operands (biases/BN in f32),
    # so the comparison isolates kernel-structure errors from bf16 rounding.
    x1r = x1.astype(jnp.bfloat16).astype(jnp.float32)
    x2r = x2.astype(jnp.bfloat16).astype(jnp.float32)
    p_round = {k: (v.astype(jnp.bfloat16).astype(jnp.float32)
                   if k.endswith("_w") else v) for k, v in params.items()}
    ref = reference(x1r, x2r, p_round)

    assert out.shape == (N, OC, H, W), out.shape
    assert bool(jnp.all(jnp.isfinite(out)))
    assert bool(jnp.allclose(out, ref, atol=2e-2, rtol=2e-2)), \
        "kernel vs reference mismatch"

    print("KERNEL_OK")
</pallas_src>

<mosaic_0001>
module attributes {stable_mosaic.version = 11 : i64} {
  func.func @kernel(%arg0: i32, %arg1: i32, %arg2: memref<128x48xbf16, #tpu.memory_space<vmem>>, %arg3: memref<48x96xbf16, #tpu.memory_space<vmem>>, %arg4: memref<40x64xbf16, #tpu.memory_space<vmem>>, %arg5: memref<8x48xbf16, #tpu.memory_space<vmem>>, %arg6: memref<64x32xbf16, #tpu.memory_space<vmem>>, %arg7: memref<16x32xbf16, #tpu.memory_space<vmem>>, %arg8: memref<64x48xbf16, #tpu.memory_space<vmem>>, %arg9: memref<32x16xbf16, #tpu.memory_space<vmem>>, %arg10: memref<16x4xbf16, #tpu.memory_space<vmem>>, %arg11: memref<16x128xf32, #tpu.memory_space<vmem>>, %arg12: memref<128x4xf32, #tpu.memory_space<vmem>>, %arg13: memref<2x64xf32, #tpu.memory_space<vmem>>, %arg14: memref<2x16xf32, #tpu.memory_space<vmem>>, %arg15: memref<2x32xf32, #tpu.memory_space<vmem>>, %arg16: memref<2x16xf32, #tpu.memory_space<vmem>>) attributes {dimension_semantics = [#tpu.dimension_semantics<arbitrary>, #tpu.dimension_semantics<arbitrary>], iteration_bounds = array<i64: 4, 4>, scalar_prefetch = 0 : i64, scratch_operands = 4 : i64, tpu.core_type = #tpu.core_type<tc>, window_params = [{transform_indices = @transform_0, window_bounds = array<i64: 128, 48>}, {pipeline_mode = #tpu.pipeline_mode<synchronous>, transform_indices = @transform_1, window_bounds = array<i64: 48, 96>}, {pipeline_mode = #tpu.pipeline_mode<synchronous>, transform_indices = @transform_2, window_bounds = array<i64: 40, 64>}, {pipeline_mode = #tpu.pipeline_mode<synchronous>, transform_indices = @transform_3, window_bounds = array<i64: 8, 48>}, {pipeline_mode = #tpu.pipeline_mode<synchronous>, transform_indices = @transform_4, window_bounds = array<i64: 64, 32>}, {pipeline_mode = #tpu.pipeline_mode<synchronous>, transform_indices = @transform_5, window_bounds = array<i64: 16, 32>}, {pipeline_mode = #tpu.pipeline_mode<synchronous>, transform_indices = @transform_6, window_bounds = array<i64: 64, 48>}, {pipeline_mode = #tpu.pipeline_mode<synchronous>, transform_indices = @transform_7, window_bounds = array<i64: 32, 16>}, {pipeline_mode = #tpu.pipeline_mode<synchronous>, transform_indices = @transform_8, window_bounds = array<i64: 16, 4>}, {pipeline_mode = #tpu.pipeline_mode<synchronous>, transform_indices = @transform_9, window_bounds = array<i64: 16, 128>}, {transform_indices = @transform_10, window_bounds = array<i64: 128, 4>}]} {
    %c0 = arith.constant 0 : index
    %c0_0 = arith.constant 0 : index
    %0 = vector.load %arg2[%c0, %c0_0] : memref<128x48xbf16, #tpu.memory_space<vmem>>, vector<128x48xbf16>
    %1 = vector.extract_strided_slice %0 {offsets = [0, 0], sizes = [128, 40], strides = [1, 1]} : vector<128x48xbf16> to vector<128x40xbf16>
    %2 = vector.extract_strided_slice %0 {offsets = [0, 40], sizes = [128, 8], strides = [1, 1]} : vector<128x48xbf16> to vector<128x8xbf16>
    %c0_1 = arith.constant 0 : index
    %c0_2 = arith.constant 0 : index
    %3 = vector.load %arg3[%c0_1, %c0_2] : memref<48x96xbf16, #tpu.memory_space<vmem>>, vector<48x96xbf16>
    %cst = arith.constant dense<0.000000e+00> : vector<128x96xf32>
    %4 = tpu.matmul %0, %3, %cst {dimension_numbers = #tpu.dot_dimension_numbers<[1], [0], [0], [1], [0, 0, 1, 1], [], []>} : vector<128x48xbf16>, vector<48x96xbf16>, vector<128x96xf32> -> vector<128x96xf32>
    %c0_3 = arith.constant 0 : index
    %c0_4 = arith.constant 0 : index
    %5 = vector.load %arg11[%c0_3, %c0_4] : memref<16x128xf32, #tpu.memory_space<vmem>>, vector<1x96xf32>
    %6 = vector.broadcast %5 : vector<1x96xf32> to vector<128x96xf32>
    %7 = arith.addf %4, %6 : vector<128x96xf32>
    %8 = vector.extract_strided_slice %7 {offsets = [0, 0], sizes = [128, 32], strides = [1, 1]} : vector<128x96xf32> to vector<128x32xf32>
    %9 = vector.extract_strided_slice %7 {offsets = [0, 32], sizes = [128, 64], strides = [1, 1]} : vector<128x96xf32> to vector<128x64xf32>
    %c0_5 = arith.constant 0 : index
    %c0_6 = arith.constant 0 : index
    %10 = vector.load %arg5[%c0_5, %c0_6] : memref<8x48xbf16, #tpu.memory_space<vmem>>, vector<8x48xbf16>
    %cst_7 = arith.constant dense<0.000000e+00> : vector<128x48xf32>
    %11 = tpu.matmul %2, %10, %cst_7 {dimension_numbers = #tpu.dot_dimension_numbers<[1], [0], [0], [1], [0, 0, 1, 1], [], []>} : vector<128x8xbf16>, vector<8x48xbf16>, vector<128x48xf32> -> vector<128x48xf32>
    %c2 = arith.constant 2 : index
    %c0_8 = arith.constant 0 : index
    %12 = vector.load %arg11[%c2, %c0_8] : memref<16x128xf32, #tpu.memory_space<vmem>>, vector<1x48xf32>
    %13 = vector.broadcast %12 : vector<1x48xf32> to vector<128x48xf32>
    %14 = arith.addf %11, %13 : vector<128x48xf32>
    %15 = vector.extract_strided_slice %14 {offsets = [0, 0], sizes = [128, 32], strides = [1, 1]} : vector<128x48xf32> to vector<128x32xf32>
    %16 = vector.extract_strided_slice %14 {offsets = [0, 32], sizes = [128, 16], strides = [1, 1]} : vector<128x48xf32> to vector<128x16xf32>
    %c0_i32 = arith.constant 0 : i32
    %17 = arith.cmpi eq, %arg0, %c0_i32 : i32
    %18 = arith.extui %17 : i1 to i32
    %c0_i32_9 = arith.constant 0 : i32
    %19 = arith.cmpi ne, %18, %c0_i32_9 : i32
    scf.if %19 {
      %c0_i32_11 = arith.constant 0 : i32
      %23 = arith.cmpi eq, %arg1, %c0_i32_11 : i32
      %24 = arith.extui %23 : i1 to i32
      %c0_i32_12 = arith.constant 0 : i32
      %25 = arith.cmpi ne, %24, %c0_i32_12 : i32
      scf.if %25 {
        %cst_27 = arith.constant 0.000000e+00 : f32
        %47 = vector.broadcast %cst_27 : f32 to vector<2x64xf32>
        %c0_28 = arith.constant 0 : index
        %c0_29 = arith.constant 0 : index
        %48 = vector.load %arg13[%c0_28, %c0_29] : memref<2x64xf32, #tpu.memory_space<vmem>>, vector<2x64xf32>
        tpu.vector_store %arg13[%c0_28, %c0_29], %47 {strides = array<i32>} : memref<2x64xf32, #tpu.memory_space<vmem>>, vector<2x64xf32>,
      } else {
      }
      %cst_13 = arith.constant dense<0.000000e+00> : vector<64xf32>
      %26 = vector.multi_reduction <add>, %9, %cst_13 [0] : vector<128x64xf32> to vector<64xf32>
      %27 = vector.shape_cast %26 : vector<64xf32> to vector<1x64xf32>
      %28 = arith.mulf %9, %9 : vector<128x64xf32>
      %cst_14 = arith.constant dense<0.000000e+00> : vector<64xf32>
      %29 = vector.multi_reduction <add>, %28, %cst_14 [0] : vector<128x64xf32> to vector<64xf32>
      %30 = vector.shape_cast %29 : vector<64xf32> to vector<1x64xf32>
      %c0_15 = arith.constant 0 : index
      %c0_16 = arith.constant 0 : index
      %31 = vector.load %arg13[%c0_15, %c0_16] : memref<2x64xf32, #tpu.memory_space<vmem>>, vector<2x64xf32>
      %32 = tpu.concatenate %27, %30 in 0 : vector<1x64xf32>, vector<1x64xf32> -> vector<2x64xf32>
      %33 = arith.addf %31, %32 : vector<2x64xf32>
      %c0_17 = arith.constant 0 : index
      %c0_18 = arith.constant 0 : index
      %34 = vector.load %arg13[%c0_17, %c0_18] : memref<2x64xf32, #tpu.memory_space<vmem>>, vector<2x64xf32>
      tpu.vector_store %arg13[%c0_17, %c0_18], %33 {strides = array<i32>} : memref<2x64xf32, #tpu.memory_space<vmem>>, vector<2x64xf32>,
      %c0_i32_19 = arith.constant 0 : i32
      %35 = arith.cmpi eq, %arg1, %c0_i32_19 : i32
      %36 = arith.extui %35 : i1 to i32
      %c0_i32_20 = arith.constant 0 : i32
      %37 = arith.cmpi ne, %36, %c0_i32_20 : i32
      scf.if %37 {
        %cst_27 = arith.constant 0.000000e+00 : f32
        %47 = vector.broadcast %cst_27 : f32 to vector<2x16xf32>
        %c0_28 = arith.constant 0 : index
        %c0_29 = arith.constant 0 : index
        %48 = vector.load %arg14[%c0_28, %c0_29] : memref<2x16xf32, #tpu.memory_space<vmem>>, vector<2x16xf32>
        tpu.vector_store %arg14[%c0_28, %c0_29], %47 {strides = array<i32>} : memref<2x16xf32, #tpu.memory_space<vmem>>, vector<2x16xf32>,
      } else {
      }
      %cst_21 = arith.constant dense<0.000000e+00> : vector<16xf32>
      %38 = vector.multi_reduction <add>, %16, %cst_21 [0] : vector<128x16xf32> to vector<16xf32>
      %39 = vector.shape_cast %38 : vector<16xf32> to vector<1x16xf32>
      %40 = arith.mulf %16, %16 : vector<128x16xf32>
      %cst_22 = arith.constant dense<0.000000e+00> : vector<16xf32>
      %41 = vector.multi_reduction <add>, %40, %cst_22 [0] : vector<128x16xf32> to vector<16xf32>
      %42 = vector.shape_cast %41 : vector<16xf32> to vector<1x16xf32>
      %c0_23 = arith.constant 0 : index
      %c0_24 = arith.constant 0 : index
      %43 = vector.load %arg14[%c0_23, %c0_24] : memref<2x16xf32, #tpu.memory_space<vmem>>, vector<2x16xf32>
      %44 = tpu.concatenate %39, %42 in 0 : vector<1x16xf32>, vector<1x16xf32> -> vector<2x16xf32>
      %45 = arith.addf %43, %44 : vector<2x16xf32>
      %c0_25 = arith.constant 0 : index
      %c0_26 = arith.constant 0 : index
      %46 = vector.load %arg14[%c0_25, %c0_26] : memref<2x16xf32, #tpu.memory_space<vmem>>, vector<2x16xf32>
      tpu.vector_store %arg14[%c0_25, %c0_26], %45 {strides = array<i32>} : memref<2x16xf32, #tpu.memory_space<vmem>>, vector<2x16xf32>,
    } else {
    }
    %c1_i32 = arith.constant 1 : i32
    %20 = arith.cmpi sge, %arg0, %c1_i32 : i32
    %21 = arith.extui %20 : i1 to i32
    %c0_i32_10 = arith.constant 0 : i32
    %22 = arith.cmpi ne, %21, %c0_i32_10 : i32
    scf.if %22 {
      %c0_11 = arith.constant 0 : index
      %c0_12 = arith.constant 0 : index
      %23 = vector.load %arg13[%c0_11, %c0_12] : memref<2x64xf32, #tpu.memory_space<vmem>>, vector<1x64xf32>
      %cst_13 = arith.constant 0.001953125 : f32
      %24 = vector.broadcast %cst_13 : f32 to vector<1x64xf32>
      %25 = arith.mulf %23, %24 : vector<1x64xf32>
      %c1 = arith.constant 1 : index
      %c0_14 = arith.constant 0 : index
      %26 = vector.load %arg13[%c1, %c0_14] : memref<2x64xf32, #tpu.memory_space<vmem>>, vector<1x64xf32>
      %cst_15 = arith.constant 0.001953125 : f32
      %27 = vector.broadcast %cst_15 : f32 to vector<1x64xf32>
      %28 = arith.mulf %26, %27 : vector<1x64xf32>
      %29 = arith.mulf %25, %25 : vector<1x64xf32>
      %30 = arith.subf %28, %29 : vector<1x64xf32>
      %cst_16 = arith.constant 9.99999974E-6 : f32
      %31 = vector.broadcast %cst_16 : f32 to vector<1x64xf32>
      %32 = arith.addf %30, %31 : vector<1x64xf32>
      %33 = math.rsqrt %32 : vector<1x64xf32>
      %34 = vector.broadcast %25 : vector<1x64xf32> to vector<128x64xf32>
      %35 = arith.subf %9, %34 : vector<128x64xf32>
      %36 = vector.broadcast %33 : vector<1x64xf32> to vector<128x64xf32>
      %37 = arith.mulf %35, %36 : vector<128x64xf32>
      %c8 = arith.constant 8 : index
      %c0_17 = arith.constant 0 : index
      %38 = vector.load %arg11[%c8, %c0_17] : memref<16x128xf32, #tpu.memory_space<vmem>>, vector<1x64xf32>
      %39 = vector.broadcast %38 : vector<1x64xf32> to vector<128x64xf32>
      %40 = arith.mulf %37, %39 : vector<128x64xf32>
      %c9 = arith.constant 9 : index
      %c0_18 = arith.constant 0 : index
      %41 = vector.load %arg11[%c9, %c0_18] : memref<16x128xf32, #tpu.memory_space<vmem>>, vector<1x64xf32>
      %42 = vector.broadcast %41 : vector<1x64xf32> to vector<128x64xf32>
      %43 = arith.addf %40, %42 : vector<128x64xf32>
      %cst_19 = arith.constant 0.000000e+00 : f32
      %44 = vector.broadcast %cst_19 : f32 to vector<128x64xf32>
      %45 = arith.maximumf %43, %44 : vector<128x64xf32>
      %46 = arith.truncf %45 : vector<128x64xf32> to vector<128x64xbf16>
      %c0_20 = arith.constant 0 : index
      %c0_21 = arith.constant 0 : index
      %47 = vector.load %arg6[%c0_20, %c0_21] : memref<64x32xbf16, #tpu.memory_space<vmem>>, vector<64x32xbf16>
      %cst_22 = arith.constant dense<0.000000e+00> : vector<128x32xf32>
      %48 = tpu.matmul %46, %47, %cst_22 {dimension_numbers = #tpu.dot_dimension_numbers<[1], [0], [0], [1], [0, 0, 1, 1], [], []>} : vector<128x64xbf16>, vector<64x32xbf16>, vector<128x32xf32> -> vector<128x32xf32>
      %c3 = arith.constant 3 : index
      %c0_23 = arith.constant 0 : index
      %49 = vector.load %arg11[%c3, %c0_23] : memref<16x128xf32, #tpu.memory_space<vmem>>, vector<1x32xf32>
      %50 = vector.broadcast %49 : vector<1x32xf32> to vector<128x32xf32>
      %51 = arith.addf %48, %50 : vector<128x32xf32>
      %52 = arith.addf %51, %8 : vector<128x32xf32>
      %c0_24 = arith.constant 0 : index
      %c0_25 = arith.constant 0 : index
      %53 = vector.load %arg14[%c0_24, %c0_25] : memref<2x16xf32, #tpu.memory_space<vmem>>, vector<1x16xf32>
      %cst_26 = arith.constant 0.001953125 : f32
      %54 = vector.broadcast %cst_26 : f32 to vector<1x16xf32>
      %55 = arith.mulf %53, %54 : vector<1x16xf32>
      %c1_27 = arith.constant 1 : index
      %c0_28 = arith.constant 0 : index
      %56 = vector.load %arg14[%c1_27, %c0_28] : memref<2x16xf32, #tpu.memory_space<vmem>>, vector<1x16xf32>
      %cst_29 = arith.constant 0.001953125 : f32
      %57 = vector.broadcast %cst_29 : f32 to vector<1x16xf32>
      %58 = arith.mulf %56, %57 : vector<1x16xf32>
      %59 = arith.mulf %55, %55 : vector<1x16xf32>
      %60 = arith.subf %58, %59 : vector<1x16xf32>
      %cst_30 = arith.constant 9.99999974E-6 : f32
      %61 = vector.broadcast %cst_30 : f32 to vector<1x16xf32>
      %62 = arith.addf %60, %61 : vector<1x16xf32>
      %63 = math.rsqrt %62 : vector<1x16xf32>
      %64 = vector.broadcast %55 : vector<1x16xf32> to vector<128x16xf32>
      %65 = arith.subf %16, %64 : vector<128x16xf32>
      %66 = vector.broadcast %63 : vector<1x16xf32> to vector<128x16xf32>
      %67 = arith.mulf %65, %66 : vector<128x16xf32>
      %c10 = arith.constant 10 : index
      %c0_31 = arith.constant 0 : index
      %68 = vector.load %arg11[%c10, %c0_31] : memref<16x128xf32, #tpu.memory_space<vmem>>, vector<1x16xf32>
      %69 = vector.broadcast %68 : vector<1x16xf32> to vector<128x16xf32>
      %70 = arith.mulf %67, %69 : vector<128x16xf32>
      %c11 = arith.constant 11 : index
      %c0_32 = arith.constant 0 : index
      %71 = vector.load %arg11[%c11, %c0_32] : memref<16x128xf32, #tpu.memory_space<vmem>>, vector<1x16xf32>
      %72 = vector.broadcast %71 : vector<1x16xf32> to vector<128x16xf32>
      %73 = arith.addf %70, %72 : vector<128x16xf32>
      %cst_33 = arith.constant 0.000000e+00 : f32
      %74 = vector.broadcast %cst_33 : f32 to vector<128x16xf32>
      %75 = arith.maximumf %73, %74 : vector<128x16xf32>
      %76 = arith.truncf %75 : vector<128x16xf32> to vector<128x16xbf16>
      %c0_34 = arith.constant 0 : index
      %c0_35 = arith.constant 0 : index
      %77 = vector.load %arg7[%c0_34, %c0_35] : memref<16x32xbf16, #tpu.memory_space<vmem>>, vector<16x32xbf16>
      %cst_36 = arith.constant dense<0.000000e+00> : vector<128x32xf32>
      %78 = tpu.matmul %76, %77, %cst_36 {dimension_numbers = #tpu.dot_dimension_numbers<[1], [0], [0], [1], [0, 0, 1, 1], [], []>} : vector<128x16xbf16>, vector<16x32xbf16>, vector<128x32xf32> -> vector<128x32xf32>
      %c4 = arith.constant 4 : index
      %c0_37 = arith.constant 0 : index
      %79 = vector.load %arg11[%c4, %c0_37] : memref<16x128xf32, #tpu.memory_space<vmem>>, vector<1x32xf32>
      %80 = vector.broadcast %79 : vector<1x32xf32> to vector<128x32xf32>
      %81 = arith.addf %78, %80 : vector<128x32xf32>
      %82 = arith.addf %81, %15 : vector<128x32xf32>
      %c0_38 = arith.constant 0 : index
      %c0_39 = arith.constant 0 : index
      %83 = vector.load %arg4[%c0_38, %c0_39] : memref<40x64xbf16, #tpu.memory_space<vmem>>, vector<40x64xbf16>
      %cst_40 = arith.constant dense<0.000000e+00> : vector<128x64xf32>
      %84 = tpu.matmul %1, %83, %cst_40 {dimension_numbers = #tpu.dot_dimension_numbers<[1], [0], [0], [1], [0, 0, 1, 1], [], []>} : vector<128x40xbf16>, vector<40x64xbf16>, vector<128x64xf32> -> vector<128x64xf32>
      %c1_41 = arith.constant 1 : index
      %c0_42 = arith.constant 0 : index
      %85 = vector.load %arg11[%c1_41, %c0_42] : memref<16x128xf32, #tpu.memory_space<vmem>>, vector<1x64xf32>
      %86 = vector.broadcast %85 : vector<1x64xf32> to vector<128x64xf32>
      %87 = arith.addf %84, %86 : vector<128x64xf32>
      %88 = vector.extract_strided_slice %87 {offsets = [0, 0], sizes = [128, 32], strides = [1, 1]} : vector<128x64xf32> to vector<128x32xf32>
      %89 = vector.extract_strided_slice %87 {offsets = [0, 32], sizes = [128, 32], strides = [1, 1]} : vector<128x64xf32> to vector<128x32xf32>
      %90 = arith.mulf %88, %82 : vector<128x32xf32>
      %cst_43 = arith.constant dense<0xFF800000> : vector<128xf32>
      %91 = vector.multi_reduction <maximumf>, %90, %cst_43 [1] : vector<128x32xf32> to vector<128xf32>
      %92 = vector.shape_cast %91 : vector<128xf32> to vector<128x1xf32>
      %93 = vector.broadcast %92 : vector<128x1xf32> to vector<128x32xf32>
      %94 = arith.subf %90, %93 : vector<128x32xf32>
      %95 = math.exp %94 : vector<128x32xf32>
      %cst_44 = arith.constant dense<0.000000e+00> : vector<128xf32>
      %96 = vector.multi_reduction <add>, %95, %cst_44 [1] : vector<128x32xf32> to vector<128xf32>
      %97 = vector.shape_cast %96 : vector<128xf32> to vector<128x1xf32>
      %98 = tpu.reciprocal %97 {approx = true} : vector<128x1xf32> -> vector<128x1xf32>
      %99 = vector.broadcast %98 : vector<128x1xf32> to vector<128x32xf32>
      %100 = arith.mulf %95, %99 : vector<128x32xf32>
      %101 = arith.mulf %100, %89 : vector<128x32xf32>
      %102 = tpu.concatenate %101, %52 in 1 : vector<128x32xf32>, vector<128x32xf32> -> vector<128x64xf32>
      %103 = arith.truncf %102 : vector<128x64xf32> to vector<128x64xbf16>
      %c0_45 = arith.constant 0 : index
      %c0_46 = arith.constant 0 : index
      %104 = vector.load %arg8[%c0_45, %c0_46] : memref<64x48xbf16, #tpu.memory_space<vmem>>, vector<64x48xbf16>
      %cst_47 = arith.constant dense<0.000000e+00> : vector<128x48xf32>
      %105 = tpu.matmul %103, %104, %cst_47 {dimension_numbers = #tpu.dot_dimension_numbers<[1], [0], [0], [1], [0, 0, 1, 1], [], []>} : vector<128x64xbf16>, vector<64x48xbf16>, vector<128x48xf32> -> vector<128x48xf32>
      %c5 = arith.constant 5 : index
      %c0_48 = arith.constant 0 : index
      %106 = vector.load %arg11[%c5, %c0_48] : memref<16x128xf32, #tpu.memory_space<vmem>>, vector<1x48xf32>
      %107 = vector.broadcast %106 : vector<1x48xf32> to vector<128x48xf32>
      %108 = arith.addf %105, %107 : vector<128x48xf32>
      %109 = vector.extract_strided_slice %108 {offsets = [0, 0], sizes = [128, 16], strides = [1, 1]} : vector<128x48xf32> to vector<128x16xf32>
      %110 = vector.extract_strided_slice %108 {offsets = [0, 16], sizes = [128, 32], strides = [1, 1]} : vector<128x48xf32> to vector<128x32xf32>
      %c1_i32_49 = arith.constant 1 : i32
      %111 = arith.cmpi eq, %arg0, %c1_i32_49 : i32
      %112 = arith.extui %111 : i1 to i32
      %c0_i32_50 = arith.constant 0 : i32
      %113 = arith.cmpi ne, %112, %c0_i32_50 : i32
      scf.if %113 {
        %c0_i32_52 = arith.constant 0 : i32
        %117 = arith.cmpi eq, %arg1, %c0_i32_52 : i32
        %118 = arith.extui %117 : i1 to i32
        %c0_i32_53 = arith.constant 0 : i32
        %119 = arith.cmpi ne, %118, %c0_i32_53 : i32
        scf.if %119 {
          %cst_60 = arith.constant 0.000000e+00 : f32
          %129 = vector.broadcast %cst_60 : f32 to vector<2x32xf32>
          %c0_61 = arith.constant 0 : index
          %c0_62 = arith.constant 0 : index
          %130 = vector.load %arg15[%c0_61, %c0_62] : memref<2x32xf32, #tpu.memory_space<vmem>>, vector<2x32xf32>
          tpu.vector_store %arg15[%c0_61, %c0_62], %129 {strides = array<i32>} : memref<2x32xf32, #tpu.memory_space<vmem>>, vector<2x32xf32>,
        } else {
        }
        %cst_54 = arith.constant dense<0.000000e+00> : vector<32xf32>
        %120 = vector.multi_reduction <add>, %110, %cst_54 [0] : vector<128x32xf32> to vector<32xf32>
        %121 = vector.shape_cast %120 : vector<32xf32> to vector<1x32xf32>
        %122 = arith.mulf %110, %110 : vector<128x32xf32>
        %cst_55 = arith.constant dense<0.000000e+00> : vector<32xf32>
        %123 = vector.multi_reduction <add>, %122, %cst_55 [0] : vector<128x32xf32> to vector<32xf32>
        %124 = vector.shape_cast %123 : vector<32xf32> to vector<1x32xf32>
        %c0_56 = arith.constant 0 : index
        %c0_57 = arith.constant 0 : index
        %125 = vector.load %arg15[%c0_56, %c0_57] : memref<2x32xf32, #tpu.memory_space<vmem>>, vector<2x32xf32>
        %126 = tpu.concatenate %121, %124 in 0 : vector<1x32xf32>, vector<1x32xf32> -> vector<2x32xf32>
        %127 = arith.addf %125, %126 : vector<2x32xf32>
        %c0_58 = arith.constant 0 : index
        %c0_59 = arith.constant 0 : index
        %128 = vector.load %arg15[%c0_58, %c0_59] : memref<2x32xf32, #tpu.memory_space<vmem>>, vector<2x32xf32>
        tpu.vector_store %arg15[%c0_58, %c0_59], %127 {strides = array<i32>} : memref<2x32xf32, #tpu.memory_space<vmem>>, vector<2x32xf32>,
      } else {
      }
      %c2_i32 = arith.constant 2 : i32
      %114 = arith.cmpi sge, %arg0, %c2_i32 : i32
      %115 = arith.extui %114 : i1 to i32
      %c0_i32_51 = arith.constant 0 : i32
      %116 = arith.cmpi ne, %115, %c0_i32_51 : i32
      scf.if %116 {
        %c0_52 = arith.constant 0 : index
        %c0_53 = arith.constant 0 : index
        %117 = vector.load %arg15[%c0_52, %c0_53] : memref<2x32xf32, #tpu.memory_space<vmem>>, vector<1x32xf32>
        %cst_54 = arith.constant 0.001953125 : f32
        %118 = vector.broadcast %cst_54 : f32 to vector<1x32xf32>
        %119 = arith.mulf %117, %118 : vector<1x32xf32>
        %c1_55 = arith.constant 1 : index
        %c0_56 = arith.constant 0 : index
        %120 = vector.load %arg15[%c1_55, %c0_56] : memref<2x32xf32, #tpu.memory_space<vmem>>, vector<1x32xf32>
        %cst_57 = arith.constant 0.001953125 : f32
        %121 = vector.broadcast %cst_57 : f32 to vector<1x32xf32>
        %122 = arith.mulf %120, %121 : vector<1x32xf32>
        %123 = arith.mulf %119, %119 : vector<1x32xf32>
        %124 = arith.subf %122, %123 : vector<1x32xf32>
        %cst_58 = arith.constant 9.99999974E-6 : f32
        %125 = vector.broadcast %cst_58 : f32 to vector<1x32xf32>
        %126 = arith.addf %124, %125 : vector<1x32xf32>
        %127 = math.rsqrt %126 : vector<1x32xf32>
        %128 = vector.broadcast %119 : vector<1x32xf32> to vector<128x32xf32>
        %129 = arith.subf %110, %128 : vector<128x32xf32>
        %130 = vector.broadcast %127 : vector<1x32xf32> to vector<128x32xf32>
        %131 = arith.mulf %129, %130 : vector<128x32xf32>
        %c12 = arith.constant 12 : index
        %c0_59 = arith.constant 0 : index
        %132 = vector.load %arg11[%c12, %c0_59] : memref<16x128xf32, #tpu.memory_space<vmem>>, vector<1x32xf32>
        %133 = vector.broadcast %132 : vector<1x32xf32> to vector<128x32xf32>
        %134 = arith.mulf %131, %133 : vector<128x32xf32>
        %c13 = arith.constant 13 : index
        %c0_60 = arith.constant 0 : index
        %135 = vector.load %arg11[%c13, %c0_60] : memref<16x128xf32, #tpu.memory_space<vmem>>, vector<1x32xf32>
        %136 = vector.broadcast %135 : vector<1x32xf32> to vector<128x32xf32>
        %137 = arith.addf %134, %136 : vector<128x32xf32>
        %cst_61 = arith.constant 0.000000e+00 : f32
        %138 = vector.broadcast %cst_61 : f32 to vector<128x32xf32>
        %139 = arith.maximumf %137, %138 : vector<128x32xf32>
        %140 = arith.truncf %139 : vector<128x32xf32> to vector<128x32xbf16>
        %c0_62 = arith.constant 0 : index
        %c0_63 = arith.constant 0 : index
        %141 = vector.load %arg9[%c0_62, %c0_63] : memref<32x16xbf16, #tpu.memory_space<vmem>>, vector<32x16xbf16>
        %cst_64 = arith.constant dense<0.000000e+00> : vector<128x16xf32>
        %142 = tpu.matmul %140, %141, %cst_64 {dimension_numbers = #tpu.dot_dimension_numbers<[1], [0], [0], [1], [0, 0, 1, 1], [], []>} : vector<128x32xbf16>, vector<32x16xbf16>, vector<128x16xf32> -> vector<128x16xf32>
        %c6 = arith.constant 6 : index
        %c0_65 = arith.constant 0 : index
        %143 = vector.load %arg11[%c6, %c0_65] : memref<16x128xf32, #tpu.memory_space<vmem>>, vector<1x16xf32>
        %144 = vector.broadcast %143 : vector<1x16xf32> to vector<128x16xf32>
        %145 = arith.addf %142, %144 : vector<128x16xf32>
        %146 = arith.addf %145, %109 : vector<128x16xf32>
        %c2_i32_66 = arith.constant 2 : i32
        %147 = arith.cmpi eq, %arg0, %c2_i32_66 : i32
        %148 = arith.extui %147 : i1 to i32
        %c0_i32_67 = arith.constant 0 : i32
        %149 = arith.cmpi ne, %148, %c0_i32_67 : i32
        scf.if %149 {
          %c0_i32_69 = arith.constant 0 : i32
          %153 = arith.cmpi eq, %arg1, %c0_i32_69 : i32
          %154 = arith.extui %153 : i1 to i32
          %c0_i32_70 = arith.constant 0 : i32
          %155 = arith.cmpi ne, %154, %c0_i32_70 : i32
          scf.if %155 {
            %cst_77 = arith.constant 0.000000e+00 : f32
            %165 = vector.broadcast %cst_77 : f32 to vector<2x16xf32>
            %c0_78 = arith.constant 0 : index
            %c0_79 = arith.constant 0 : index
            %166 = vector.load %arg16[%c0_78, %c0_79] : memref<2x16xf32, #tpu.memory_space<vmem>>, vector<2x16xf32>
            tpu.vector_store %arg16[%c0_78, %c0_79], %165 {strides = array<i32>} : memref<2x16xf32, #tpu.memory_space<vmem>>, vector<2x16xf32>,
          } else {
          }
          %cst_71 = arith.constant dense<0.000000e+00> : vector<16xf32>
          %156 = vector.multi_reduction <add>, %146, %cst_71 [0] : vector<128x16xf32> to vector<16xf32>
          %157 = vector.shape_cast %156 : vector<16xf32> to vector<1x16xf32>
          %158 = arith.mulf %146, %146 : vector<128x16xf32>
          %cst_72 = arith.constant dense<0.000000e+00> : vector<16xf32>
          %159 = vector.multi_reduction <add>, %158, %cst_72 [0] : vector<128x16xf32> to vector<16xf32>
          %160 = vector.shape_cast %159 : vector<16xf32> to vector<1x16xf32>
          %c0_73 = arith.constant 0 : index
          %c0_74 = arith.constant 0 : index
          %161 = vector.load %arg16[%c0_73, %c0_74] : memref<2x16xf32, #tpu.memory_space<vmem>>, vector<2x16xf32>
          %162 = tpu.concatenate %157, %160 in 0 : vector<1x16xf32>, vector<1x16xf32> -> vector<2x16xf32>
          %163 = arith.addf %161, %162 : vector<2x16xf32>
          %c0_75 = arith.constant 0 : index
          %c0_76 = arith.constant 0 : index
          %164 = vector.load %arg16[%c0_75, %c0_76] : memref<2x16xf32, #tpu.memory_space<vmem>>, vector<2x16xf32>
          tpu.vector_store %arg16[%c0_75, %c0_76], %163 {strides = array<i32>} : memref<2x16xf32, #tpu.memory_space<vmem>>, vector<2x16xf32>,
        } else {
        }
        %c3_i32 = arith.constant 3 : i32
        %150 = arith.cmpi eq, %arg0, %c3_i32 : i32
        %151 = arith.extui %150 : i1 to i32
        %c0_i32_68 = arith.constant 0 : i32
        %152 = arith.cmpi ne, %151, %c0_i32_68 : i32
        scf.if %152 {
          %c0_69 = arith.constant 0 : index
          %c0_70 = arith.constant 0 : index
          %153 = vector.load %arg16[%c0_69, %c0_70] : memref<2x16xf32, #tpu.memory_space<vmem>>, vector<1x16xf32>
          %cst_71 = arith.constant 0.001953125 : f32
          %154 = vector.broadcast %cst_71 : f32 to vector<1x16xf32>
          %155 = arith.mulf %153, %154 : vector<1x16xf32>
          %c1_72 = arith.constant 1 : index
          %c0_73 = arith.constant 0 : index
          %156 = vector.load %arg16[%c1_72, %c0_73] : memref<2x16xf32, #tpu.memory_space<vmem>>, vector<1x16xf32>
          %cst_74 = arith.constant 0.001953125 : f32
          %157 = vector.broadcast %cst_74 : f32 to vector<1x16xf32>
          %158 = arith.mulf %156, %157 : vector<1x16xf32>
          %159 = arith.mulf %155, %155 : vector<1x16xf32>
          %160 = arith.subf %158, %159 : vector<1x16xf32>
          %cst_75 = arith.constant 9.99999974E-6 : f32
          %161 = vector.broadcast %cst_75 : f32 to vector<1x16xf32>
          %162 = arith.addf %160, %161 : vector<1x16xf32>
          %163 = math.rsqrt %162 : vector<1x16xf32>
          %164 = vector.broadcast %155 : vector<1x16xf32> to vector<128x16xf32>
          %165 = arith.subf %146, %164 : vector<128x16xf32>
          %166 = vector.broadcast %163 : vector<1x16xf32> to vector<128x16xf32>
          %167 = arith.mulf %165, %166 : vector<128x16xf32>
          %c14 = arith.constant 14 : index
          %c0_76 = arith.constant 0 : index
          %168 = vector.load %arg11[%c14, %c0_76] : memref<16x128xf32, #tpu.memory_space<vmem>>, vector<1x16xf32>
          %169 = vector.broadcast %168 : vector<1x16xf32> to vector<128x16xf32>
          %170 = arith.mulf %167, %169 : vector<128x16xf32>
          %c15 = arith.constant 15 : index
          %c0_77 = arith.constant 0 : index
          %171 = vector.load %arg11[%c15, %c0_77] : memref<16x128xf32, #tpu.memory_space<vmem>>, vector<1x16xf32>
          %172 = vector.broadcast %171 : vector<1x16xf32> to vector<128x16xf32>
          %173 = arith.addf %170, %172 : vector<128x16xf32>
          %cst_78 = arith.constant 0.000000e+00 : f32
          %174 = vector.broadcast %cst_78 : f32 to vector<128x16xf32>
          %175 = arith.maximumf %173, %174 : vector<128x16xf32>
          %176 = arith.truncf %175 : vector<128x16xf32> to vector<128x16xbf16>
          %c0_79 = arith.constant 0 : index
          %c0_80 = arith.constant 0 : index
          %177 = vector.load %arg10[%c0_79, %c0_80] : memref<16x4xbf16, #tpu.memory_space<vmem>>, vector<16x4xbf16>
          %cst_81 = arith.constant dense<0.000000e+00> : vector<128x4xf32>
          %178 = tpu.matmul %176, %177, %cst_81 {dimension_numbers = #tpu.dot_dimension_numbers<[1], [0], [0], [1], [0, 0, 1, 1], [], []>} : vector<128x16xbf16>, vector<16x4xbf16>, vector<128x4xf32> -> vector<128x4xf32>
          %c7 = arith.constant 7 : index
          %c0_82 = arith.constant 0 : index
          %179 = vector.load %arg11[%c7, %c0_82] : memref<16x128xf32, #tpu.memory_space<vmem>>, vector<1x4xf32>
          %180 = vector.broadcast %179 : vector<1x4xf32> to vector<128x4xf32>
          %181 = arith.addf %178, %180 : vector<128x4xf32>
          %c0_83 = arith.constant 0 : index
          %c0_84 = arith.constant 0 : index
          %182 = vector.load %arg12[%c0_83, %c0_84] : memref<128x4xf32, #tpu.memory_space<vmem>>, vector<128x4xf32>
          tpu.vector_store %arg12[%c0_83, %c0_84], %181 {strides = array<i32>} : memref<128x4xf32, #tpu.memory_space<vmem>>, vector<128x4xf32>,
        } else {
        }
      } else {
      }
    } else {
    }
    return
  }
  func.func @transform_0(%arg0: i32, %arg1: i32) -> (i32, i32) {
    %c0_i32 = arith.constant 0 : i32
    %c0_i32_0 = arith.constant 0 : i32
    return %arg1, %c0_i32 : i32, i32
  }
  func.func @transform_1(%arg0: i32, %arg1: i32) -> (i32, i32) {
    %c0_i32 = arith.constant 0 : i32
    %c0_i32_0 = arith.constant 0 : i32
    %c0_i32_1 = arith.constant 0 : i32
    return %c0_i32, %c0_i32_0 : i32, i32
  }
  func.func @transform_2(%arg0: i32, %arg1: i32) -> (i32, i32) {
    %c0_i32 = arith.constant 0 : i32
    %c0_i32_0 = arith.constant 0 : i32
    %c0_i32_1 = arith.constant 0 : i32
    return %c0_i32, %c0_i32_0 : i32, i32
  }
  func.func @transform_3(%arg0: i32, %arg1: i32) -> (i32, i32) {
    %c0_i32 = arith.constant 0 : i32
    %c0_i32_0 = arith.constant 0 : i32
    %c0_i32_1 = arith.constant 0 : i32
    return %c0_i32, %c0_i32_0 : i32, i32
  }
  func.func @transform_4(%arg0: i32, %arg1: i32) -> (i32, i32) {
    %c0_i32 = arith.constant 0 : i32
    %c0_i32_0 = arith.constant 0 : i32
    %c0_i32_1 = arith.constant 0 : i32
    return %c0_i32, %c0_i32_0 : i32, i32
  }
  func.func @transform_5(%arg0: i32, %arg1: i32) -> (i32, i32) {
    %c0_i32 = arith.constant 0 : i32
    %c0_i32_0 = arith.constant 0 : i32
    %c0_i32_1 = arith.constant 0 : i32
    return %c0_i32, %c0_i32_0 : i32, i32
  }
  func.func @transform_6(%arg0: i32, %arg1: i32) -> (i32, i32) {
    %c0_i32 = arith.constant 0 : i32
    %c0_i32_0 = arith.constant 0 : i32
    %c0_i32_1 = arith.constant 0 : i32
    return %c0_i32, %c0_i32_0 : i32, i32
  }
  func.func @transform_7(%arg0: i32, %arg1: i32) -> (i32, i32) {
    %c0_i32 = arith.constant 0 : i32
    %c0_i32_0 = arith.constant 0 : i32
    %c0_i32_1 = arith.constant 0 : i32
    return %c0_i32, %c0_i32_0 : i32, i32
  }
  func.func @transform_8(%arg0: i32, %arg1: i32) -> (i32, i32) {
    %c0_i32 = arith.constant 0 : i32
    %c0_i32_0 = arith.constant 0 : i32
    %c0_i32_1 = arith.constant 0 : i32
    return %c0_i32, %c0_i32_0 : i32, i32
  }
  func.func @transform_9(%arg0: i32, %arg1: i32) -> (i32, i32) {
    %c0_i32 = arith.constant 0 : i32
    %c0_i32_0 = arith.constant 0 : i32
    %c0_i32_1 = arith.constant 0 : i32
    return %c0_i32, %c0_i32_0 : i32, i32
  }
  func.func @transform_10(%arg0: i32, %arg1: i32) -> (i32, i32) {
    %c0_i32 = arith.constant 0 : i32
    %c0_i32_0 = arith.constant 0 : i32
    return %arg1, %c0_i32 : i32, i32
  }
}

</mosaic_0001>

<bundles_post_ra>
// kernel: tpu_custom_call.1
= control target key start
LH: loop header
LB: loop body
LE: loop exit
PB: predicated region body
PF: predicated region fallthrough
CT: control target
= control target key end

     0   :  { %s3795_s13 = smov 0   ;;  %s3797_s14 = smov 0   ;;  %s5396_s0 = inlined_call_operand.vmem [shape: bf16[512,48], index: 0, kind: input, shape index: {}]   ;;  %s5397_s1 = inlined_call_operand.vmem [shape: bf16[48,96], index: 1, kind: input, shape index: {}]   ;;  %s5398_s2 = inlined_call_operand.vmem [shape: bf16[40,64], index: 2, kind: input, shape index: {}]   ;;  %s5399_s3 = inlined_call_operand.vmem [shape: bf16[8,48], index: 3, kind: input, shape index: {}]   ;;  %s5400_s4 = inlined_call_operand.vmem [shape: bf16[64,32], index: 4, kind: input, shape index: {}]   ;;  %s5401_s5 = inlined_call_operand.vmem [shape: bf16[16,32], index: 5, kind: input, shape index: {}]   ;;  %s5402_s6 = inlined_call_operand.vmem [shape: bf16[64,48], index: 6, kind: input, shape index: {}]   ;;  %s5403_s7 = inlined_call_operand.vmem [shape: bf16[32,16], index: 7, kind: input, shape index: {}]   ;;  %s5404_s8 = inlined_call_operand.vmem [shape: bf16[16,4], index: 8, kind: input, shape index: {}]   ;;  %s5405_s9 = inlined_call_operand.vmem [shape: f32[16,128], index: 9, kind: input, shape index: {}]   ;;  %s5406_s10 = inlined_call_operand.vmem [shape: f32[512,4], index: 10, kind: output, shape index: {}]  }
   0x1   :  { %s3799_s15 = smov 0   ;;  %s3801_s16 = smov 0  }
   0x2   :  { %s3803_s17 = smov 0  }
   0x3 LB: > { %s29_s18 = sadd.s32 1, %s3719_s15  ;;  %s32_s19 = sadd.s32 1, %s3723_s16  ;;  %s3727_s17 = sphi %s3803_s17, %s20_s17   ;;  %s3723_s16 = sphi %s3801_s16, %s5475_s16   ;;  %s3719_s15 = sphi %s3799_s15, %s5474_s15   ;;  %s3715_s14 = sphi %s3797_s14, %s5473_s14   ;;  %s3711_s13 = sphi %s3795_s13, %s5472_s13  }
   0x4   : > { %p30_p0 = scmp.ge.s32.totalorder %s29_s18, 4  ;;  %p3120_p1 = scmp.ge.s32.totalorder %s3727_s17, 1 }
   0x5   : > { %p325_p2 = scmp.lt.s32.totalorder %s3727_s17, 17 }
   0x6   : > { %s5477_s18 = smov (%p30_p0, %s29_s18), 0  ;;  %s5479_s19 = smov (!%p30_p0, %s32_s19), %s3723_s16 }
   0x7   : > { %p326_p3 = pnand %p3120_p1, %p325_p2  ;;  %p34_p4 = scmp.ge.s32.totalorder %s5479_s19, 4 }
   0x9   : > { %s5481_s19 = smov (%p34_p4, %s5479_s19), 0  ;;  %329 = sbr.rel (%p326_p3) target bundleno = 3165 (0xc5d), region = 60 }
  0x10   : > { %s3121_s20 = sshll.u32 %s3711_s13, 4  ;;  %v3559_v0 = vld [vmem:[%s5397_s1] sm:$0xff]   ;;  %v3560_v1 = vld [vmem:[%s5397_s1 + $0x8] sm:$0xff]   ;;  %vm630_vm0 = vcmask 1043456   ;;  %v3561_v4 = vld [vmem:[%s5397_s1 + $0x10] sm:$0xff]   ;;  %vm461_vm1 = vcmask 392192  }
  0x11   : > { %p364_p5 = scmp.lt.s32.totalorder %s3121_s20, 63  ;;  %3326 = vmatprep.subr.bf16.mxu0 %v3559_v0  ;;  %v583_v2 = vld [vmem:[%s5399_s3] sm:$0xf]  ;;  %vm605_vm2 = vcmask 64512   ;;  %p3154_p6 = scmp.ne.s32.totalorder %s3715_s14, 0 }
  0x12   : > { %3327 = vmatpush3.bf16.msra.mxu0 %v3559_v0  ;;  %3498 = vmatprep.subr.msk.bf16.mxu1 %vm630_vm0, %v583_v2  ;;  %v632_v3 = vsel %vm630_vm0, %v583_v2, 0  ;;  %v3125_v21 = vld [vmem:[%s5405_s9] ss:$0 sm:$0xff]  ;;  %v3145_v54 = vld [vmem:[%s5405_s9 + $0x2] ss:$0 sm:$0xff]  ;;  %p3155_p7 = scmp.ne.s32.totalorder (!%p3154_p6), %s3711_s13, 0 }
  0x13   : > { %s5483_s20 = smov (!%p364_p5, %s3121_s20), 63  ;;  %3328 = vmatprep.subr.bf16.mxu0 %v3560_v1  ;;  %3349 = vmatpush3.bf16.msra.mxu1 %v632_v3 }
  0x14   : > { %s3122_s27 = sshll.u32 %s5483_s20, 2  ;;  %s3124_s28 = sshll.u32 %s5483_s20, 3 }
  0x15   : > { %s367_s21 = scalar_lea.vmem %s5396_s0, %s3122_s27  ;;  %s3850_s24 = scalar_lea.vmem %s5406_s10, %s3124_s28 }
  0x16   : > { %v3852_v5 = vld [vmem:[%s367_s21] sm:$0xff]   ;;  %v3854_v6 = vld [vmem:[%s367_s21 + $0x8] sm:$0xff]   ;;  %3329 = vmatpush3.bf16.msra.mxu0 %v3560_v1  ;;  %s3729_s20 = smov 88   ;;  %v3857_v7 = vld [vmem:[%s367_s21 + $0x10] sm:$0xff]  }
  0x17   : > { %589 = vrot.lane.b32.xlu0 %v3852_v5, %s3729_s20  ;;  %3330 = vmatprep.subr.bf16.mxu0 %v3561_v4  ;;  %v3862_v8 = vld [vmem:[%s367_s21 + $0x18] sm:$0xff]   ;;  %v3865_v9 = vld [vmem:[%s367_s21 + $0x20] sm:$0xff]   ;;  %v3868_v10 = vld [vmem:[%s367_s21 + $0x28] sm:$0xff]  }
  0x18   : > { %3332 = vmatprep.mubr.msk.bf16.mxu0 %vm461_vm1, %v3852_v5  ;;  %593 = vrot.lane.b32.xlu1 %v3857_v7, %s3729_s20  ;;  %v3875_v11 = vld [vmem:[%s367_s21 + $0x30] sm:$0xff]   ;;  %v3878_v12 = vld [vmem:[%s367_s21 + $0x38] sm:$0xff]  }
  0x1a   : > { %3331 = vmatpush3.bf16.msra.mxu0 %v3561_v4 }
  0x1b   : > { %591 = vrot.lane.b32.xlu0 %v3854_v6, %s3729_s20 }
  0x1c   : > { %595 = vrot.lane.b32.xlu1 %v3862_v8, %s3729_s20 }
  0x1d   : > { %3333 = vmatmul.mubr.msk.bf16.vlgmr.msra.gmra.mrb[0].mxu0 %vm461_vm1, %v3854_v6 }
  0x1e   : > { %3336 = vmatprep.mubr.msk.bf16.mxu0 %vm461_vm1, %v3857_v7 }
  0x1f   : > { %597 = vrot.lane.b32.xlu0 %v3865_v9, %s3729_s20 }
  0x20   : > { %599 = vrot.lane.b32.xlu1 %v3868_v10, %s3729_s20 }
  0x23   : > { %601 = vrot.lane.b32.xlu0 %v3875_v11, %s3729_s20 }
  0x24   : > { %603 = vrot.lane.b32.xlu1 %v3878_v12, %s3729_s20 }
  0x25   : > { %3337 = vmatmul.mubr.msk.bf16.gmra.mrb[4].mxu0 %vm461_vm1, %v3862_v8 }
  0x26   : > { %3340 = vmatprep.mubr.msk.bf16.mxu0 %vm461_vm1, %v3865_v9 }
  0x2d   : > { %3341 = vmatmul.mubr.msk.bf16.gmra.mrb[8].mxu0 %vm461_vm1, %v3868_v10 }
  0x2e   : > { %3344 = vmatprep.mubr.msk.bf16.mxu0 %vm461_vm1, %v3875_v11 }
  0x35   : > { %3345 = vmatmul.mubr.msk.bf16.gmra.mrb[12].mxu0 %vm461_vm1, %v3878_v12 }
  0x89   : > { %v590_v13 = vpop.permute.xlu0 %589 }
  0x8a   : > { %3350 = vmatprep.mubr.msk.bf16.mxu1 %vm605_vm2, %v590_v13  ;;  %v594_v14 = vpop.permute.xlu1 %593 }
  0x8d   : > { %v592_v15 = vpop.permute.xlu0 %591 }
  0x8e   : > { %3351 = vmatmul.mubr.msk.bf16.vlgmr.msra.gmra.mrb[0].mxu1 %vm605_vm2, %v592_v15  ;;  %v596_v16 = vpop.permute.xlu1 %595 }
  0x8f   : > { %3354 = vmatprep.mubr.msk.bf16.mxu1 %vm605_vm2, %v594_v14 }
  0x91   : > { %v598_v17 = vpop.permute.xlu0 %597 }
  0x92   : > { %v600_v18 = vpop.permute.xlu1 %599 }
  0x95   : > { %v602_v19 = vpop.permute.xlu0 %601 }
  0x96   : > { %3355 = vmatmul.mubr.msk.bf16.gmra.mrb[4].mxu1 %vm605_vm2, %v596_v16  ;;  %v604_v20 = vpop.permute.xlu1 %603 }
  0x97   : > { %3358 = vmatprep.mubr.msk.bf16.mxu1 %vm605_vm2, %v598_v17 }
  0x9e   : > { %3359 = vmatmul.mubr.msk.bf16.gmra.mrb[8].mxu1 %vm605_vm2, %v600_v18 }
  0x9f   : > { %3362 = vmatprep.mubr.msk.bf16.mxu1 %vm605_vm2, %v602_v19 }
  0xa6   : > { %3363 = vmatmul.mubr.msk.bf16.gmra.mrb[12].mxu1 %vm605_vm2, %v604_v20 }
  0xf0   : > { %v3334_v22 = vpop.f32.mrb[0].mxu0 }
  0xf1   : > { %v3903_v23 = vadd.f32 %v3334_v22, %v3125_v21  ;;  %v520_v24 = vpop.f32.mrb[1].mxu0 }
  0xf2   : > { %v3905_v25 = vadd.f32 %v3125_v21, %v520_v24  ;;  %v3335_v26 = vpop.f32.mrb[2].mxu0 }
  0xf3   : > { %v3907_v27 = vadd.f32 %v3335_v26, %v3125_v21  ;;  %v523_v28 = vpop.f32.mrb[3].mxu0 }
  0xf4   : > { %v3909_v29 = vadd.f32 %v3125_v21, %v523_v28 }
  0xf8   : > { %v3338_v30 = vpop.f32.mrb[4].mxu0 }
  0xf9   : > { %v3911_v31 = vadd.f32 %v3338_v30, %v3125_v21  ;;  %v536_v32 = vpop.f32.mrb[5].mxu0 }
  0xfa   : > { %v3913_v33 = vadd.f32 %v3125_v21, %v536_v32  ;;  %v3339_v34 = vpop.f32.mrb[6].mxu0 }
  0xfb   : > { %v3915_v35 = vadd.f32 %v3339_v34, %v3125_v21  ;;  %v539_v36 = vpop.f32.mrb[7].mxu0 }
  0xfc   : > { %v3917_v37 = vadd.f32 %v3125_v21, %v539_v36 }
 0x100   : > { %v3342_v38 = vpop.f32.mrb[8].mxu0 }
 0x101   : > { %v3919_v39 = vadd.f32 %v3342_v38, %v3125_v21  ;;  %v552_v40 = vpop.f32.mrb[9].mxu0 }
 0x102   : > { %v3921_v41 = vadd.f32 %v3125_v21, %v552_v40  ;;  %v3343_v42 = vpop.f32.mrb[10].mxu0 }
 0x103   : > { %v3923_v43 = vadd.f32 %v3343_v42, %v3125_v21  ;;  %v555_v44 = vpop.f32.mrb[11].mxu0 }
 0x104   : > { %v3925_v45 = vadd.f32 %v3125_v21, %v555_v44 }
 0x108   : > { %v3346_v46 = vpop.f32.mrb[12].mxu0 }
 0x109   : > { %v3927_v47 = vadd.f32 %v3346_v46, %v3125_v21  ;;  %v568_v48 = vpop.f32.mrb[13].mxu0 }
 0x10a   : > { %v3929_v49 = vadd.f32 %v3125_v21, %v568_v48  ;;  %v3347_v50 = vpop.f32.mrb[14].mxu0 }
 0x10b   : > { %v3931_v51 = vadd.f32 %v3347_v50, %v3125_v21  ;;  %v571_v52 = vpop.f32.mrb[15].mxu0 }
 0x10c   : > { %v3933_v53 = vadd.f32 %v3125_v21, %v571_v52 }
 0x161   : > { %v3352_v55 = vpop.f32.mrb[0].mxu1 }
 0x162   : > { %v3938_v56 = vadd.f32 %v3352_v55, %v3145_v54  ;;  %v668_v57 = vpop.f32.mrb[1].mxu1 }
 0x163   : > { %v3940_v58 = vadd.f32 %v3145_v54, %v668_v57  ;;  %v3353_v59 = vpop.f32.mrb[2].mxu1 }
 0x164   : > { %5429 = vst [vmem:[#allocation6_spill] sm:$0xff] %v3938_v56  ;;  %v3942_v60 = vadd.f32 %v3353_v59, %v3145_v54  ;;  %v671_v61 = vpop.f32.mrb[3].mxu1 }
 0x165   : > { %5430 = vst [vmem:[#allocation7_spill] sm:$0xff] %v3940_v58  ;;  %v3944_v62 = vadd.f32 %v3145_v54, %v671_v61 }
 0x166   : > { %5431 = vst [vmem:[#allocation8_spill] sm:$0xff] %v3942_v60 }
 0x167   : > { %5432 = vst [vmem:[#allocation9_spill] sm:$0xff] %v3944_v62 }
 0x169   : > { %v3356_v63 = vpop.f32.mrb[4].mxu1 }
 0x16a   : > { %v3946_v0 = vadd.f32 %v3356_v63, %v3145_v54  ;;  %v684_v1 = vpop.f32.mrb[5].mxu1 }
 0x16b   : > { %v3948_v2 = vadd.f32 %v3145_v54, %v684_v1  ;;  %v3357_v3 = vpop.f32.mrb[6].mxu1 }
 0x16c   : > { %5433 = vst [vmem:[#allocation10_spill] sm:$0xff] %v3946_v0  ;;  %v3950_v4 = vadd.f32 %v3357_v3, %v3145_v54  ;;  %v687_v13 = vpop.f32.mrb[7].mxu1 }
 0x16d   : > { %5434 = vst [vmem:[#allocation11_spill] sm:$0xff] %v3948_v2  ;;  %v3952_v14 = vadd.f32 %v3145_v54, %v687_v13 }
 0x16e   : > { %5435 = vst [vmem:[#allocation12_spill] sm:$0xff] %v3950_v4 }
 0x16f   : > { %5436 = vst [vmem:[#allocation13_spill] sm:$0xff] %v3952_v14 }
 0x171   : > { %v3360_v15 = vpop.f32.mrb[8].mxu1 }
 0x172   : > { %v3954_v16 = vadd.f32 %v3360_v15, %v3145_v54  ;;  %v700_v17 = vpop.f32.mrb[9].mxu1 }
 0x173   : > { %v3956_v18 = vadd.f32 %v3145_v54, %v700_v17  ;;  %v3361_v19 = vpop.f32.mrb[10].mxu1 }
 0x174   : > { %5437 = vst [vmem:[#allocation14_spill] sm:$0xff] %v3954_v16  ;;  %v3958_v20 = vadd.f32 %v3361_v19, %v3145_v54  ;;  %v703_v21 = vpop.f32.mrb[11].mxu1 }
 0x175   : > { %5438 = vst [vmem:[#allocation15_spill] sm:$0xff] %v3956_v18  ;;  %v3960_v22 = vadd.f32 %v3145_v54, %v703_v21 }
 0x176   : > { %5439 = vst [vmem:[#allocation16_spill] sm:$0xff] %v3958_v20 }
 0x177   : > { %5440 = vst [vmem:[#allocation17_spill] sm:$0xff] %v3960_v22 }
 0x179   : > { %v3364_v24 = vpop.f32.mrb[12].mxu1  ;;  %734 = sbr.rel (%p3154_p6) target bundleno = 721 (0x2d1), region = 64 }
 0x17a   : > { %v3962_v26 = vadd.f32 %v3364_v24, %v3145_v54  ;;  %v716_v28 = vpop.f32.mrb[13].mxu1 }
 0x17b   : > { %v3964_v30 = vadd.f32 %v3145_v54, %v716_v28  ;;  %v3365_v32 = vpop.f32.mrb[14].mxu1 }
 0x17c   : > { %5441 = vst [vmem:[#allocation18_spill] sm:$0xff] %v3962_v26  ;;  %v3966_v34 = vadd.f32 %v3365_v32, %v3145_v54  ;;  %v719_v36 = vpop.f32.mrb[15].mxu1 }
 0x17d   : > { %5442 = vst [vmem:[#allocation19_spill] sm:$0xff] %v3964_v30  ;;  %v3968_v38 = vadd.f32 %v3145_v54, %v719_v36 }
 0x17e   : > { %5443 = vst [vmem:[#allocation20_spill] sm:$0xff] %v3966_v34 }
 0x17f   : > { %5444 = vst [vmem:[#allocation21_spill] sm:$0xff] %v3968_v38 }
 0x180   : > { %738 = sbr.rel (%p3155_p7) target bundleno = 391 (0x187), region = 68  ;;  %vm739_vm3 = vcmask (!%p3155_p7), 517120   ;;  %v3730_v40 = vmov (!%p3155_p7), 0.0  }
 0x181   : > { %740 = vst.msk [vmem:[#allocation2] sm:$0x3] (!%p3155_p7), %vm739_vm3, %v3730_v40 }
 0x187 PF: > { %vm741_vm4 = vcmask 785664   ;;  %v779_v55 = vmul.f32 %v3905_v25, %v3905_v25  ;;  %v780_v57 = vmul.f32 %v3909_v29, %v3909_v29  ;;  %v781_v59 = vmul.f32 %v3903_v23, %v3903_v23  ;;  %s3731_s29 = smov 96  }
 0x188   : > { %v742_v42 = vsel %vm741_vm4, %v3905_v25, 0.0  ;;  %v743_v44 = vsel %vm741_vm4, %v3909_v29, 0.0  ;;  %v745_v46 = vsel %vm741_vm4, %v3903_v23, 0.0  ;;  %v747_v50 = vsel %vm741_vm4, %v3907_v27, 0.0 }
 0x189   : > { %v744_v48 = vadd.f32 %v743_v44, %v742_v42  ;;  %v749_v54 = vsel %vm741_vm4, %v3913_v33, 0.0  ;;  %v751_v63 = vsel %vm741_vm4, %v3917_v37, 0.0  ;;  %v782_v1 = vmul.f32 %v3907_v27, %v3907_v27 }
 0x18a   : > { %v753_v13 = vsel %vm741_vm4, %v3911_v31, 0.0  ;;  %v783_v15 = vmul.f32 %v3913_v33, %v3913_v33  ;;  %v795_v17 = vsel %vm741_vm4, %v779_v55, 0.0  ;;  %v796_v19 = vsel %vm741_vm4, %v780_v57, 0.0 }
 0x18b   : > { %v746_v52 = vadd.f32 %v745_v46, %v744_v48  ;;  %v798_v21 = vsel %vm741_vm4, %v781_v59, 0.0  ;;  %v797_v28 = vadd.f32 %v796_v19, %v795_v17  ;;  %v755_v32 = vsel %vm741_vm4, %v3915_v35, 0.0 }
 0x18c   : > { %v784_v36 = vmul.f32 %v3917_v37, %v3917_v37  ;;  %v800_v40 = vsel %vm741_vm4, %v782_v1, 0.0  ;;  %v757_v46 = vsel %vm741_vm4, %v3921_v41, 0.0  ;;  %v785_v48 = vmul.f32 %v3911_v31, %v3911_v31 }
 0x18d   : > { %v748_v61 = vadd.f32 %v747_v50, %v746_v52  ;;  %v799_v44 = vadd.f32 %v798_v21, %v797_v28  ;;  %v802_v50 = vsel %vm741_vm4, %v783_v15, 0.0  ;;  %v759_v55 = vsel %vm741_vm4, %v3925_v45, 0.0 }
 0x18e   : > { %v786_v57 = vmul.f32 %v3915_v35, %v3915_v35  ;;  %v804_v59 = vsel %vm741_vm4, %v784_v36, 0.0  ;;  %v761_v1 = vsel %vm741_vm4, %v3919_v39, 0.0  ;;  %v763_v19 = vsel %vm741_vm4, %v3923_v43, 0.0 }
 0x18f   : > { %v750_v3 = vadd.f32 %v749_v54, %v748_v61  ;;  %v801_v54 = vadd.f32 %v800_v40, %v799_v44  ;;  %v788_v21 = vmul.f32 %v3925_v45, %v3925_v45  ;;  %v765_v36 = vsel %vm741_vm4, %v3929_v49, 0.0 }
 0x190   : > { %v789_v40 = vmul.f32 %v3919_v39, %v3919_v39  ;;  %vm833_vm5 = vcmask 1040384   ;;  %vm840_vm6 = vcmask 517120   ;;  %vm845_vm7 = vcmask (!%p3155_p7), 123904  }
 0x191   : > { %v752_v24 = vadd.f32 %v751_v63, %v750_v3  ;;  %v803_v63 = vadd.f32 %v802_v50, %v801_v54  ;;  %v787_v3 = vmul.f32 %v3921_v41, %v3921_v41  ;;  %v790_v50 = vmul.f32 %v3923_v43, %v3923_v43 }
 0x193   : > { %v754_v42 = vadd.f32 %v753_v13, %v752_v24  ;;  %v806_v13 = vsel %vm741_vm4, %v785_v48, 0.0  ;;  %v805_v17 = vadd.f32 %v804_v59, %v803_v63  ;;  %v808_v24 = vsel %vm741_vm4, %v786_v57, 0.0 }
 0x194   : > { %v767_v48 = vsel %vm741_vm4, %v3933_v53, 0.0  ;;  %v769_v57 = vsel %vm741_vm4, %v3927_v47, 0.0  ;;  %v791_v59 = vmul.f32 %v3929_v49, %v3929_v49 }
 0x195   : > { %v756_v52 = vadd.f32 %v755_v32, %v754_v42  ;;  %v807_v32 = vadd.f32 %v806_v13, %v805_v17  ;;  %v810_v42 = vsel %vm741_vm4, %v787_v3, 0.0  ;;  %v771_v3 = vsel %vm741_vm4, %v3931_v51, 0.0 }
 0x196   : > { %v792_v13 = vmul.f32 %v3933_v53, %v3933_v53 }
 0x197   : > { %v758_v61 = vadd.f32 %v757_v46, %v756_v52  ;;  %v809_v46 = vadd.f32 %v808_v24, %v807_v32  ;;  %v812_v52 = vsel %vm741_vm4, %v788_v21, 0.0  ;;  %v793_v21 = vmul.f32 %v3927_v47, %v3927_v47 }
 0x198   : > { %v818_v24 = vsel %vm741_vm4, %v791_v59, 0.0 }
 0x199   : > { %v760_v15 = vadd.f32 %v759_v55, %v758_v61  ;;  %v811_v55 = vadd.f32 %v810_v42, %v809_v46  ;;  %v814_v61 = vsel %vm741_vm4, %v789_v40, 0.0  ;;  %v820_v40 = vsel %vm741_vm4, %v792_v13, 0.0 }
 0x19a   : > { %v822_v46 = vsel %vm741_vm4, %v793_v21, 0.0  ;;  %v832_v21 = vld [vmem:[#allocation2] sm:$0x3] }
 0x19b   : > { %v762_v28 = vadd.f32 %v761_v1, %v760_v15  ;;  %v813_v1 = vadd.f32 %v812_v52, %v811_v55  ;;  %v816_v15 = vsel %vm741_vm4, %v790_v50, 0.0 }
 0x19d   : > { %v764_v44 = vadd.f32 %v763_v19, %v762_v28  ;;  %v815_v19 = vadd.f32 %v814_v61, %v813_v1 }
 0x19f   : > { %v766_v54 = vadd.f32 %v765_v36, %v764_v44  ;;  %v817_v32 = vadd.f32 %v816_v15, %v815_v19  ;;  %v794_v36 = vmul.f32 %v3931_v51, %v3931_v51 }
 0x1a1   : > { %v768_v63 = vadd.f32 %v767_v48, %v766_v54  ;;  %v819_v44 = vadd.f32 %v818_v24, %v817_v32  ;;  %v824_v52 = vsel %vm741_vm4, %v794_v36, 0.0  ;;  %v3732_v36 = vmov (!%p3155_p7), 0.0  }
 0x1a2   : > { %846 = vst.msk [vmem:[#allocation3] sm:$0x3] (!%p3155_p7), %vm845_vm7, %v3732_v36 }
 0x1a3   : > { %v770_v17 = vadd.f32 %v769_v57, %v768_v63  ;;  %v821_v50 = vadd.f32 %v820_v40, %v819_v44 }
 0x1a5   : > { %v772_v28 = vadd.f32 %v771_v3, %v770_v17  ;;  %v823_v55 = vadd.f32 %v822_v46, %v821_v50 }
 0x1a7   : > { %v773_v42 = vrot.slane %v772_v28, 4  ;;  %v825_v57 = vadd.f32 %v824_v52, %v823_v55 }
 0x1a9   : > { %v774_v48 = vadd.f32 %v773_v42, %v772_v28  ;;  %v826_v59 = vrot.slane %v825_v57, 4 }
 0x1ab   : > { %v775_v54 = vrot.slane %v774_v48, 2  ;;  %v827_v63 = vadd.f32 %v826_v59, %v825_v57 }
 0x1ad   : > { %v776_v61 = vadd.f32 %v775_v54, %v774_v48  ;;  %v828_v3 = vrot.slane %v827_v63, 2 }
 0x1af   : > { %v777_v1 = vrot.slane %v776_v61, 1  ;;  %v829_v15 = vadd.f32 %v828_v3, %v827_v63 }
 0x1b1   : > { %v778_v17 = vadd.f32 %v777_v1, %v776_v61  ;;  %v830_v19 = vrot.slane %v829_v15, 1 }
 0x1b3   : > { %v831_v13 = vadd.f32 %v830_v19, %v829_v15 }
 0x1b5   : > { %v834_v24 = vsel %vm833_vm5, %v778_v17, %v831_v13 }
 0x1b6   : > { %836 = vrot.lane.b32.xlu0 %v834_v24, %s3731_s29 }
 0x225   : > { %844 = sbr.rel (%p3155_p7) target bundleno = 556 (0x22c), region = 72 }
 0x228   : > { %v837_v28 = vpop.permute.xlu0 %836 }
 0x229   : > { %v839_v32 = vadd.f32 %v837_v28, %v832_v21 }
 0x22b   : > { %841 = vst.msk [vmem:[#allocation2] sm:$0x3] %vm840_vm6, %v839_v32 }
 0x22c PF: > { %vm847_vm8 = vcmask 392448   ;;  %v885_v54 = vmul.f32 %v3940_v58, %v3940_v58  ;;  %v886_v55 = vmul.f32 %v3944_v62, %v3944_v62  ;;  %v887_v57 = vmul.f32 %v3938_v56, %v3938_v56 }
 0x22d   : > { %v848_v40 = vsel %vm847_vm8, %v3940_v58, 0.0  ;;  %v849_v42 = vsel %vm847_vm8, %v3944_v62, 0.0  ;;  %v851_v44 = vsel %vm847_vm8, %v3938_v56, 0.0  ;;  %v853_v48 = vsel %vm847_vm8, %v3942_v60, 0.0 }
 0x22e   : > { %v850_v46 = vadd.f32 %v849_v42, %v848_v40  ;;  %v855_v52 = vsel %vm847_vm8, %v3948_v2, 0.0  ;;  %v857_v59 = vsel %vm847_vm8, %v3952_v14, 0.0  ;;  %v888_v63 = vmul.f32 %v3942_v60, %v3942_v60 }
 0x22f   : > { %v859_v3 = vsel %vm847_vm8, %v3946_v0, 0.0  ;;  %v889_v15 = vmul.f32 %v3948_v2, %v3948_v2  ;;  %v901_v17 = vsel %vm847_vm8, %v885_v54, 0.0  ;;  %v902_v19 = vsel %vm847_vm8, %v886_v55, 0.0 }
 0x230   : > { %v852_v50 = vadd.f32 %v851_v44, %v850_v46  ;;  %v904_v13 = vsel %vm847_vm8, %v887_v57, 0.0  ;;  %v903_v21 = vadd.f32 %v902_v19, %v901_v17  ;;  %v861_v28 = vsel %vm847_vm8, %v3950_v4, 0.0 }
 0x231   : > { %v890_v32 = vmul.f32 %v3952_v14, %v3952_v14  ;;  %v906_v36 = vsel %vm847_vm8, %v888_v63, 0.0  ;;  %v863_v44 = vsel %vm847_vm8, %v3956_v18, 0.0  ;;  %v891_v46 = vmul.f32 %v3946_v0, %v3946_v0 }
 0x232   : > { %v854_v61 = vadd.f32 %v853_v48, %v852_v50  ;;  %v905_v42 = vadd.f32 %v904_v13, %v903_v21  ;;  %v908_v48 = vsel %vm847_vm8, %v889_v15, 0.0  ;;  %v865_v54 = vsel %vm847_vm8, %v3960_v22, 0.0 }
 0x233   : > { %v892_v55 = vmul.f32 %v3950_v4, %v3950_v4  ;;  %v910_v57 = vsel %vm847_vm8, %v890_v32, 0.0  ;;  %v867_v63 = vsel %vm847_vm8, %v3954_v16, 0.0  ;;  %v869_v19 = vsel %vm847_vm8, %v3958_v20, 0.0 }
 0x234   : > { %v856_v1 = vadd.f32 %v855_v52, %v854_v61  ;;  %v907_v52 = vadd.f32 %v906_v36, %v905_v42  ;;  %v894_v13 = vmul.f32 %v3960_v22, %v3960_v22  ;;  %v871_v32 = vsel %vm847_vm8, %v3964_v30, 0.0 }
 0x235   : > { %v895_v36 = vmul.f32 %v3954_v16, %v3954_v16  ;;  %vm945_vm9 = vcmask 123904  }
 0x236   : > { %v858_v24 = vadd.f32 %v857_v59, %v856_v1  ;;  %v909_v59 = vadd.f32 %v908_v48, %v907_v52  ;;  %v893_v1 = vmul.f32 %v3956_v18, %v3956_v18  ;;  %v896_v48 = vmul.f32 %v3958_v20, %v3958_v20 }
 0x238   : > { %v860_v40 = vadd.f32 %v859_v3, %v858_v24  ;;  %v912_v3 = vsel %vm847_vm8, %v891_v46, 0.0  ;;  %v911_v17 = vadd.f32 %v910_v57, %v909_v59  ;;  %v914_v24 = vsel %vm847_vm8, %v892_v55, 0.0 }
 0x239   : > { %v873_v46 = vsel %vm847_vm8, %v3968_v38, 0.0  ;;  %v875_v55 = vsel %vm847_vm8, %v3962_v26, 0.0  ;;  %v897_v57 = vmul.f32 %v3964_v30, %v3964_v30 }
 0x23a   : > { %v862_v50 = vadd.f32 %v861_v28, %v860_v40  ;;  %v913_v28 = vadd.f32 %v912_v3, %v911_v17  ;;  %v916_v40 = vsel %vm847_vm8, %v893_v1, 0.0  ;;  %v877_v1 = vsel %vm847_vm8, %v3966_v34, 0.0 }
 0x23b   : > { %v898_v3 = vmul.f32 %v3968_v38, %v3968_v38 }
 0x23c   : > { %v864_v61 = vadd.f32 %v863_v44, %v862_v50  ;;  %v915_v44 = vadd.f32 %v914_v24, %v913_v28  ;;  %v918_v50 = vsel %vm847_vm8, %v894_v13, 0.0  ;;  %v899_v13 = vmul.f32 %v3962_v26, %v3962_v26 }
 0x23d   : > { %v924_v24 = vsel %vm847_vm8, %v897_v57, 0.0 }
 0x23e   : > { %v866_v15 = vadd.f32 %v865_v54, %v864_v61  ;;  %v917_v54 = vadd.f32 %v916_v40, %v915_v44  ;;  %v920_v61 = vsel %vm847_vm8, %v895_v36, 0.0  ;;  %v926_v36 = vsel %vm847_vm8, %v898_v3, 0.0 }
 0x23f   : > { %v928_v44 = vsel %vm847_vm8, %v899_v13, 0.0  ;;  %v938_v13 = vld [vmem:[#allocation3] sm:$0x3] }
 0x240   : > { %v868_v21 = vadd.f32 %v867_v63, %v866_v15  ;;  %v919_v63 = vadd.f32 %v918_v50, %v917_v54  ;;  %v922_v15 = vsel %vm847_vm8, %v896_v48, 0.0 }
 0x242   : > { %v870_v42 = vadd.f32 %v869_v19, %v868_v21  ;;  %v921_v19 = vadd.f32 %v920_v61, %v919_v63 }
 0x244   : > { %v872_v52 = vadd.f32 %v871_v32, %v870_v42  ;;  %v923_v28 = vadd.f32 %v922_v15, %v921_v19  ;;  %v900_v32 = vmul.f32 %v3966_v34, %v3966_v34 }
 0x246   : > { %v874_v59 = vadd.f32 %v873_v46, %v872_v52  ;;  %v925_v42 = vadd.f32 %v924_v24, %v923_v28  ;;  %v930_v50 = vsel %vm847_vm8, %v900_v32, 0.0 }
 0x248   : > { %v876_v17 = vadd.f32 %v875_v55, %v874_v59  ;;  %v927_v48 = vadd.f32 %v926_v36, %v925_v42 }
 0x24a   : > { %v878_v21 = vadd.f32 %v877_v1, %v876_v17  ;;  %v929_v54 = vadd.f32 %v928_v44, %v927_v48 }
 0x24c   : > { %v879_v40 = vrot.slane %v878_v21, 4  ;;  %v931_v55 = vadd.f32 %v930_v50, %v929_v54 }
 0x24e   : > { %v880_v46 = vadd.f32 %v879_v40, %v878_v21  ;;  %v932_v57 = vrot.slane %v931_v55, 4 }
 0x250   : > { %v881_v52 = vrot.slane %v880_v46, 2  ;;  %v933_v59 = vadd.f32 %v932_v57, %v931_v55 }
 0x252   : > { %v882_v61 = vadd.f32 %v881_v52, %v880_v46  ;;  %v934_v1 = vrot.slane %v933_v59, 2 }
 0x254   : > { %v883_v63 = vrot.slane %v882_v61, 1  ;;  %v935_v15 = vadd.f32 %v934_v1, %v933_v59 }
 0x256   : > { %v884_v17 = vadd.f32 %v883_v63, %v882_v61  ;;  %v936_v19 = vrot.slane %v935_v15, 1 }
 0x258   : > { %v937_v3 = vadd.f32 %v936_v19, %v935_v15 }
 0x25a   : > { %v939_v24 = vsel %vm833_vm5, %v884_v17, %v937_v3 }
 0x25b   : > { %941 = vrot.lane.b32.xlu0 %v939_v24, %s3731_s29 }
 0x2cd   : > { %v942_v21 = vpop.permute.xlu0 %941 }
 0x2ce   : > { %v944_v28 = vadd.f32 %v942_v21, %v938_v13 }
 0x2d0   : > { %946 = vst.msk [vmem:[#allocation3] sm:$0x3] %vm945_vm9, %v944_v28 }
 0x2d1 PF: > { %p3157_p8 = scmp.lt.s32.totalorder %s3715_s14, 1 }
 0x2d3   : > { %950 = sbr.rel (%p3157_p8) target bundleno = 3165 (0xc5d), region = 76 }
 0x2da   : > { %v959_v32 = vlaneseq  ;;  %v1280_v36 = vld [vmem:[#allocation3] sm:$0x1]  ;;  %v1282_v40 = vld [vmem:[#allocation3 + $0x1] sm:$0x1]  ;;  %v3173_v46 = vld [vmem:[%s5405_s9 + $0xa] ss:$0 sm:$0xff] }
 0x2db   : > { %v1281_v42 = vmul.f32 0.001953125, %v1280_v36  ;;  %v1283_v44 = vmul.f32 0.001953125, %v1282_v40  ;;  %v3174_v48 = vld [vmem:[%s5405_s9 + $0xb] ss:$0 sm:$0xff]  ;;  %s3733_s22 = smov 32   ;;  %v3602_v1 = vld [vmem:[%s5401_s5] sm:$0xff]  }
 0x2dc   : > { %v960_v50 = vshrl.u32 %v959_v32, 7  ;;  %1342 = vrot.lane.b32.xlu1 %v3173_v46, %s3733_s22  ;;  %3390 = vmatprep.subr.bf16.mxu1 %v3602_v1  ;;  %v951_v15 = vld [vmem:[#allocation2] sm:$0x1]  ;;  %v953_v19 = vld [vmem:[#allocation2 + $0x1] sm:$0x1]  ;;  %s3734_s25 = smov 96  }
 0x2dd   : > { %v1284_v52 = vmul.f32 %v1281_v42, %v1281_v42  ;;  %3391 = vmatpush3.bf16.msra.mxu1 %v3602_v1  ;;  %v4158_v17 = vmul.f32 0.001953125, %v951_v15  ;;  %v954_v3 = vmul.f32 0.001953125, %v953_v19  ;;  %vm1447_vm10 = vcmask 130048   ;;  %p3210_p9 = scmp.ne.s32.totalorder %s3715_s14, 1 }
 0x2de   : > { %v4148_v54 = vsub.s32 0, %v960_v50  ;;  %vm1610_vm11 = vcmask 326656   ;;  %vm1142_vm12 = vcmask 523264   ;;  %vm1743_vm13 = vcmask 261120   ;;  %p3211_p10 = scmp.ne.s32.totalorder (!%p3210_p9), %s3711_s13, 0 }
 0x2df   : > { %v1285_v55 = vsub.f32 %v1283_v44, %v1284_v52  ;;  %v955_v24 = vmul.f32 %v4158_v17, %v4158_v17 }
 0x2e0   : > { %5445 = vst [vmem:[#allocation22_spill] sm:$0xff] %v4148_v54  ;;  %v1291_v61 = vrot.slane %v1281_v42, %v4148_v54  ;;  %1367 = vrot.lane.b32.xlu1 %v3174_v48, %s3733_s22 }
 0x2e1   : > { %v1286_v57 = vadd.f32 1e-05, %v1285_v55  ;;  %v956_v13 = vsub.f32 %v954_v3, %v955_v24 }
 0x2e2   : > { %1293 = vrot.lane.b32.xlu0 %v1291_v61, %s3733_s22 }
 0x2e3   : > { %3614 = vrsqrt.f32 %v1286_v57  ;;  %v957_v21 = vadd.f32 1e-05, %v956_v13 }
 0x2e5   : > { %3616 = vrsqrt.f32 %v957_v21 }
 0x2ed   : > { %v3615_v59 = vpop.eup %3614 }
 0x2ee   : > { %v1315_v63 = vrot.slane %v3615_v59, %v4148_v54 }
 0x2f0   : > { %1317 = vrot.lane.b32.xlu0 %v1315_v63, %s3733_s22 }
 0x34e   : > { %v4164_v32 = vpop.permute.xlu1 %1342 }
 0x354   : > { %v4162_v28 = vpop.permute.xlu0 %1293 }
 0x355   : > { %v1298_v36 = vsub.f32 %v3938_v56, %v4162_v28  ;;  %v1299_v40 = vsub.f32 %v3942_v60, %v4162_v28  ;;  %v1296_v42 = vsub.f32 %v3940_v58, %v4162_v28  ;;  %v1297_v44 = vsub.f32 %v3944_v62, %v4162_v28 }
 0x356   : > { %v1302_v46 = vsub.f32 %v3946_v0, %v4162_v28  ;;  %v1303_v48 = vsub.f32 %v3950_v4, %v4162_v28  ;;  %v1300_v50 = vsub.f32 %v3948_v2, %v4162_v28  ;;  %v1301_v52 = vsub.f32 %v3952_v14, %v4162_v28  ;;  %v4198_v4 = vpop.permute.xlu1 %1367 }
 0x357   : > { %v1306_v55 = vsub.f32 %v3954_v16, %v4162_v28  ;;  %v1307_v61 = vsub.f32 %v3958_v20, %v4162_v28  ;;  %v1304_v57 = vsub.f32 %v3956_v18, %v4162_v28  ;;  %v1305_v59 = vsub.f32 %v3960_v22, %v4162_v28 }
 0x358   : > { %v1310_v1 = vsub.f32 %v3962_v26, %v4162_v28  ;;  %v1311_v15 = vsub.f32 %v3966_v34, %v4162_v28  ;;  %v1308_v19 = vsub.f32 %v3964_v30, %v4162_v28  ;;  %v1309_v3 = vsub.f32 %v3968_v38, %v4162_v28 }
 0x362   : > { %v1318_v63 = vpop.permute.xlu0 %1317 }
 0x363   : > { %v1322_v24 = vmul.f32 %v1318_v63, %v1298_v36  ;;  %v1323_v13 = vmul.f32 %v1318_v63, %v1299_v40  ;;  %v1320_v21 = vmul.f32 %v1318_v63, %v1296_v42  ;;  %v1321_v18 = vmul.f32 %v1318_v63, %v1297_v44 }
 0x364   : > { %v1326_v60 = vmul.f32 %v1318_v63, %v1302_v46  ;;  %v1327_v58 = vmul.f32 %v1318_v63, %v1303_v48  ;;  %v1324_v22 = vmul.f32 %v1318_v63, %v1300_v50  ;;  %v1325_v20 = vmul.f32 %v1318_v63, %v1301_v52  ;;  %v4212_v52 = vpop.eup %3616 }
 0x365   : > { %v1347_v26 = vmul.f32 %v4164_v32, %v1322_v24  ;;  %v1348_v34 = vmul.f32 %v4164_v32, %v1323_v13  ;;  %v1345_v16 = vmul.f32 %v4164_v32, %v1320_v21  ;;  %v1346_v30 = vmul.f32 %v4164_v32, %v1321_v18 }
 0x366   : > { %v1351_v28 = vmul.f32 %v4164_v32, %v1326_v60  ;;  %v1352_v36 = vmul.f32 %v4164_v32, %v1327_v58  ;;  %v1349_v40 = vmul.f32 %v4164_v32, %v1324_v22  ;;  %v1350_v42 = vmul.f32 %v4164_v32, %v1325_v20 }
 0x367   : > { %v1372_v44 = vadd.f32 %v4198_v4, %v1347_v26  ;;  %v1373_v46 = vadd.f32 %v4198_v4, %v1348_v34  ;;  %v1370_v48 = vadd.f32 %v4198_v4, %v1345_v16  ;;  %v1371_v50 = vadd.f32 %v4198_v4, %v1346_v30 }
 0x368   : > { %v1376_v18 = vadd.f32 %v4198_v4, %v1351_v28  ;;  %v1377_v60 = vadd.f32 %v4198_v4, %v1352_v36  ;;  %v1374_v58 = vadd.f32 %v4198_v4, %v1349_v40  ;;  %v1375_v22 = vadd.f32 %v4198_v4, %v1350_v42 }
 0x369   : > { %v1388_v24 = vmax.f32 %v1372_v44, 0.0  ;;  %v1389_v20 = vmax.f32 %v1373_v46, 0.0  ;;  %v1386_v13 = vmax.f32 %v1370_v48, 0.0  ;;  %v1387_v26 = vmax.f32 %v1371_v50, 0.0 }
 0x36a   : > { %v1392_v21 = vmax.f32 %v1376_v18, 0.0  ;;  %v1393_v34 = vmax.f32 %v1377_v60, 0.0  ;;  %v1390_v38 = vmax.f32 %v1374_v58, 0.0  ;;  %v1391_v16 = vmax.f32 %v1375_v22, 0.0 }
 0x36b   : > { %v1403_v14 = vpack.c.bf16 %v1389_v20, %v1388_v24  ;;  %v1402_v30 = vpack.c.bf16 %v1387_v26, %v1386_v13  ;;  %v1330_v2 = vmul.f32 %v1318_v63, %v1306_v55  ;;  %v1331_v0 = vmul.f32 %v1318_v63, %v1307_v61 }
 0x36c   : > { %v1405_v62 = vpack.c.bf16 %v1393_v34, %v1392_v21  ;;  %v1404_v28 = vpack.c.bf16 %v1391_v16, %v1390_v38  ;;  %v1328_v56 = vmul.f32 %v1318_v63, %v1304_v57  ;;  %v1329_v36 = vmul.f32 %v1318_v63, %v1305_v59  ;;  %v3603_v21 = vld [vmem:[%s5398_s2] sm:$0xff]  }
 0x36d   : > { %1427 = vrot.lane.b32.xlu1 %v1403_v14, %s3734_s25  ;;  %1425 = vrot.lane.b32.xlu0 %v1402_v30, %s3734_s25  ;;  %v1355_v40 = vmul.f32 %v4164_v32, %v1330_v2  ;;  %v1356_v42 = vmul.f32 %v4164_v32, %v1331_v0  ;;  %v1334_v44 = vmul.f32 %v1318_v63, %v1310_v1 }
 0x36e   : > { %v1353_v46 = vmul.f32 %v4164_v32, %v1328_v56  ;;  %v1354_v48 = vmul.f32 %v4164_v32, %v1329_v36  ;;  %v1335_v55 = vmul.f32 %v1318_v63, %v1311_v15  ;;  %v1332_v61 = vmul.f32 %v1318_v63, %v1308_v19  ;;  %3408 = vmatprep.subr.bf16.mxu1 %v3603_v21  ;;  %v3158_v36 = vld [vmem:[%s5405_s9 + $0x8] ss:$0 sm:$0xff] }
 0x36f   : > { %v1380_v38 = vadd.f32 %v4198_v4, %v1355_v40  ;;  %v1381_v57 = vadd.f32 %v4198_v4, %v1356_v42  ;;  %v1359_v59 = vmul.f32 %v4164_v32, %v1334_v44  ;;  %v1333_v14 = vmul.f32 %v1318_v63, %v1309_v3  ;;  %v3608_v40 = vld [vmem:[%s5400_s4 + $0x10] sm:$0xff]   ;;  %v3609_v42 = vld [vmem:[%s5400_s4 + $0x18] sm:$0xff]  }
 0x370   : > { %v1378_v50 = vadd.f32 %v4198_v4, %v1353_v46  ;;  %v1379_v2 = vadd.f32 %v4198_v4, %v1354_v48  ;;  %v1360_v0 = vmul.f32 %v4164_v32, %v1335_v55  ;;  %v1357_v1 = vmul.f32 %v4164_v32, %v1332_v61  ;;  %v3604_v48 = vld [vmem:[%s5398_s2 + $0x8] sm:$0xff]  }
 0x371   : > { %1431 = vrot.lane.b32.xlu1 %v1405_v62, %s3734_s25  ;;  %1429 = vrot.lane.b32.xlu0 %v1404_v28, %s3734_s25  ;;  %v1396_v56 = vmax.f32 %v1380_v38, 0.0  ;;  %v1397_v15 = vmax.f32 %v1381_v57, 0.0  ;;  %v1384_v19 = vadd.f32 %v4198_v4, %v1359_v59  ;;  %v1358_v18 = vmul.f32 %v4164_v32, %v1333_v14  ;;  %v3159_v28 = vld [vmem:[%s5405_s9 + $0x9] ss:$0 sm:$0xff]  ;;  %v3605_v38 = vld [vmem:[%s5398_s2 + $0x10] ss:$0 sps:$4 sm:$0xff]  }
 0x372   : > { %v1394_v60 = vmax.f32 %v1378_v50, 0.0  ;;  %v1395_v63 = vmax.f32 %v1379_v2, 0.0  ;;  %v1385_v3 = vadd.f32 %v4198_v4, %v1360_v0  ;;  %v1382_v58 = vadd.f32 %v4198_v4, %v1357_v1 }
 0x373   : > { %v1407_v22 = vpack.c.bf16 %v1397_v15, %v1396_v56  ;;  %v1400_v24 = vmax.f32 %v1384_v19, 0.0  ;;  %v1383_v20 = vadd.f32 %v4198_v4, %v1358_v18  ;;  %v986_v4 = vrot.slane %v4212_v52, %v4148_v54  ;;  %v3607_v52 = vld [vmem:[%s5400_s4 + $0x8] sm:$0xff]  }
 0x374   : > { %v1406_v13 = vpack.c.bf16 %v1395_v63, %v1394_v60  ;;  %v1401_v62 = vmax.f32 %v1385_v3, 0.0  ;;  %v1398_v26 = vmax.f32 %v1382_v58, 0.0  ;;  %v962_v30 = vrot.slane %v4158_v17, %v4148_v54  ;;  %v3606_v17 = vld [vmem:[%s5400_s4] sm:$0xff]  }
 0x375   : > { %1435 = vrot.lane.b32.xlu1 %v1407_v22, %s3734_s25  ;;  %v1399_v32 = vmax.f32 %v1383_v20, 0.0  ;;  %3366 = vmatprep.subr.bf16.mxu0 %v3606_v17  ;;  %v1628_v59 = vsel %vm630_vm0, %v3605_v38, 0 }
 0x376   : > { %1433 = vrot.lane.b32.xlu0 %v1406_v13, %s3734_s25  ;;  %v1409_v34 = vpack.c.bf16 %v1401_v62, %v1400_v24  ;;  %3367 = vmatpush3.bf16.msra.mxu0 %v3606_v17 }
 0x377   : > { %v1408_v16 = vpack.c.bf16 %v1399_v32, %v1398_v26  ;;  %3368 = vmatprep.subr.bf16.mxu0 %v3607_v52 }
 0x379   : > { %1439 = vrot.lane.b32.xlu1 %v1409_v34, %s3734_s25 }
 0x37a   : > { %1437 = vrot.lane.b32.xlu0 %v1408_v16, %s3734_s25  ;;  %3369 = vmatpush3.bf16.msra.mxu0 %v3607_v52 }
 0x37b   : > { %3370 = vmatprep.subr.bf16.mxu0 %v3608_v40 }
 0x37d   : > { %988 = vrot.lane.b32.xlu1 %v986_v4, %s3733_s22 }
 0x37e   : > { %964 = vrot.lane.b32.xlu0 %v962_v30, %s3733_s22  ;;  %3371 = vmatpush3.bf16.msra.mxu0 %v3608_v40 }
 0x37f   : > { %3372 = vmatprep.subr.bf16.mxu0 %v3609_v42 }
 0x381   : > { %1038 = vrot.lane.b32.xlu1 %v3159_v28, %s3733_s22 }
 0x382   : > { %1013 = vrot.lane.b32.xlu0 %v3158_v36, %s3733_s22  ;;  %3373 = vmatpush3.bf16.msra.mxu0 %v3609_v42 }
 0x3df   : > { %v1428_v44 = vpop.permute.xlu1 %1427  ;;  %v1426_v46 = vpop.permute.xlu0 %1425 }
 0x3e0   : > { %3392 = vmatprep.mubr.msk.bf16.mxu1 %vm1447_vm10, %v1426_v46 }
 0x3e1   : > { %3393 = vmatmul.mubr.msk.bf16.vlgmr.msra.gmra.mrb[0].mxu1 %vm1447_vm10, %v1428_v44 }
 0x3e2   : > { %3409 = vmatpush3.bf16.msra.mxu1 %v3603_v21 }
 0x3e3   : > { %v1432_v55 = vpop.permute.xlu1 %1431  ;;  %v1430_v61 = vpop.permute.xlu0 %1429  ;;  %3410 = vmatprep.subr.bf16.mxu1 %v3604_v48 }
 0x3e4   : > { %3396 = vmatprep.mubr.msk.bf16.mxu1 %vm1447_vm10, %v1430_v61 }
 0x3e6   : > { %3411 = vmatpush3.bf16.msra.mxu1 %v3604_v48 }
 0x3e7   : > { %v1436_v57 = vpop.permute.xlu1 %1435  ;;  %3499 = vmatprep.subr.msk.bf16.mxu1 %vm630_vm0, %v3605_v38 }
 0x3e8   : > { %v1434_v14 = vpop.permute.xlu0 %1433 }
 0x3e9   : > { %3397 = vmatmul.mubr.msk.bf16.gmra.mrb[4].mxu1 %vm1447_vm10, %v1432_v55 }
 0x3ea   : > { %3400 = vmatprep.mubr.msk.bf16.mxu1 %vm1447_vm10, %v1434_v14  ;;  %3413 = vmatpush3.bf16.msra.mxu1 %v1628_v59 }
 0x3eb   : > { %v1440_v50 = vpop.permute.xlu1 %1439 }
 0x3ec   : > { %v1438_v2 = vpop.permute.xlu0 %1437 }
 0x3ef   : > { %v4284_v0 = vpop.permute.xlu1 %988 }
 0x3f0   : > { %v4286_v1 = vpop.permute.xlu0 %964 }
 0x3f1   : > { %3401 = vmatmul.mubr.msk.bf16.gmra.mrb[8].mxu1 %vm1447_vm10, %v1436_v57  ;;  %v969_v56 = vsub.f32 %v3903_v23, %v4286_v1  ;;  %v970_v15 = vsub.f32 %v3907_v27, %v4286_v1  ;;  %v967_v19 = vsub.f32 %v3905_v25, %v4286_v1  ;;  %v968_v18 = vsub.f32 %v3909_v29, %v4286_v1 }
 0x3f2   : > { %3404 = vmatprep.mubr.msk.bf16.mxu1 %vm1447_vm10, %v1438_v2  ;;  %v973_v60 = vsub.f32 %v3911_v31, %v4286_v1  ;;  %v974_v63 = vsub.f32 %v3915_v35, %v4286_v1  ;;  %v971_v3 = vsub.f32 %v3913_v33, %v4286_v1  ;;  %v972_v58 = vsub.f32 %v3917_v37, %v4286_v1 }
 0x3f3   : > { %v993_v22 = vmul.f32 %v4284_v0, %v969_v56  ;;  %v994_v24 = vmul.f32 %v4284_v0, %v970_v15  ;;  %v991_v20 = vmul.f32 %v4284_v0, %v967_v19  ;;  %v992_v13 = vmul.f32 %v4284_v0, %v968_v18  ;;  %v4312_v26 = vpop.permute.xlu1 %1038 }
 0x3f4   : > { %v4310_v62 = vpop.permute.xlu0 %1013  ;;  %v997_v21 = vmul.f32 %v4284_v0, %v973_v60  ;;  %v998_v32 = vmul.f32 %v4284_v0, %v974_v63  ;;  %v995_v34 = vmul.f32 %v4284_v0, %v971_v3  ;;  %v996_v16 = vmul.f32 %v4284_v0, %v972_v58 }
 0x3f5   : > { %v1018_v4 = vmul.f32 %v4310_v62, %v993_v22  ;;  %v1019_v30 = vmul.f32 %v4310_v62, %v994_v24  ;;  %v1016_v28 = vmul.f32 %v4310_v62, %v991_v20  ;;  %v1017_v36 = vmul.f32 %v4310_v62, %v992_v13 }
 0x3f6   : > { %v1022_v17 = vmul.f32 %v4310_v62, %v997_v21  ;;  %v1023_v52 = vmul.f32 %v4310_v62, %v998_v32  ;;  %v1020_v40 = vmul.f32 %v4310_v62, %v995_v34  ;;  %v1021_v42 = vmul.f32 %v4310_v62, %v996_v16 }
 0x3f7   : > { %v1043_v44 = vadd.f32 %v4312_v26, %v1018_v4  ;;  %v1044_v46 = vadd.f32 %v4312_v26, %v1019_v30  ;;  %v1041_v48 = vadd.f32 %v4312_v26, %v1016_v28  ;;  %v1042_v55 = vadd.f32 %v4312_v26, %v1017_v36 }
 0x3f8   : > { %v1047_v61 = vadd.f32 %v4312_v26, %v1022_v17  ;;  %v1048_v38 = vadd.f32 %v4312_v26, %v1023_v52  ;;  %v1045_v57 = vadd.f32 %v4312_v26, %v1020_v40  ;;  %v1046_v59 = vadd.f32 %v4312_v26, %v1021_v42 }
 0x3f9   : > { %3405 = vmatmul.mubr.msk.bf16.gmra.mrb[12].mxu1 %vm1447_vm10, %v1440_v50  ;;  %v1059_v14 = vmax.f32 %v1043_v44, 0.0  ;;  %v1060_v2 = vmax.f32 %v1044_v46, 0.0  ;;  %v1057_v56 = vmax.f32 %v1041_v48, 0.0  ;;  %v1058_v15 = vmax.f32 %v1042_v55, 0.0 }
 0x3fa   : > { %3414 = vmatprep.mubr.msk.bf16.mxu1 %vm1610_vm11, %v3852_v5  ;;  %v1063_v19 = vmax.f32 %v1047_v61, 0.0  ;;  %v1064_v18 = vmax.f32 %v1048_v38, 0.0  ;;  %v1061_v60 = vmax.f32 %v1045_v57, 0.0  ;;  %v1062_v63 = vmax.f32 %v1046_v59, 0.0 }
 0x3fb   : > { %v1074_v3 = vpack.c.bf16 %v1060_v2, %v1059_v14  ;;  %v1073_v58 = vpack.c.bf16 %v1058_v15, %v1057_v56  ;;  %v977_v22 = vsub.f32 %v3919_v39, %v4286_v1  ;;  %v978_v24 = vsub.f32 %v3923_v43, %v4286_v1 }
 0x3fc   : > { %v1076_v50 = vpack.c.bf16 %v1064_v18, %v1063_v19  ;;  %v1075_v20 = vpack.c.bf16 %v1062_v63, %v1061_v60  ;;  %v975_v13 = vsub.f32 %v3921_v41, %v4286_v1  ;;  %v976_v5 = vsub.f32 %v3925_v45, %v4286_v1 }
 0x3fd   : > { %1104 = vrot.lane.b32.xlu1 %v1074_v3, %s3734_s25  ;;  %1102 = vrot.lane.b32.xlu0 %v1073_v58, %s3734_s25  ;;  %v1001_v21 = vmul.f32 %v4284_v0, %v977_v22  ;;  %v1002_v32 = vmul.f32 %v4284_v0, %v978_v24  ;;  %v981_v34 = vsub.f32 %v3927_v47, %v4286_v1 }
 0x3fe   : > { %v999_v16 = vmul.f32 %v4284_v0, %v975_v13  ;;  %v1000_v4 = vmul.f32 %v4284_v0, %v976_v5  ;;  %v982_v30 = vsub.f32 %v3931_v51, %v4286_v1  ;;  %v979_v28 = vsub.f32 %v3929_v49, %v4286_v1 }
 0x3ff   : > { %v1026_v36 = vmul.f32 %v4310_v62, %v1001_v21  ;;  %v1027_v17 = vmul.f32 %v4310_v62, %v1002_v32  ;;  %v1005_v52 = vmul.f32 %v4284_v0, %v981_v34  ;;  %v980_v40 = vsub.f32 %v3933_v53, %v4286_v1 }
 0x400   : > { %v1024_v42 = vmul.f32 %v4310_v62, %v999_v16  ;;  %v1025_v44 = vmul.f32 %v4310_v62, %v1000_v4  ;;  %v1006_v46 = vmul.f32 %v4284_v0, %v982_v30  ;;  %v1003_v48 = vmul.f32 %v4284_v0, %v979_v28  ;;  %v4414_v30 = vld [vmem:[%s5405_s9 + $0x4] ss:$0 sm:$0xff] }
 0x401   : > { %1108 = vrot.lane.b32.xlu1 %v1076_v50, %s3734_s25  ;;  %1106 = vrot.lane.b32.xlu0 %v1075_v20, %s3734_s25  ;;  %v1051_v55 = vadd.f32 %v4312_v26, %v1026_v36  ;;  %v1052_v61 = vadd.f32 %v4312_v26, %v1027_v17  ;;  %v1030_v38 = vmul.f32 %v4310_v62, %v1005_v52 }
 0x402   : > { %3415 = vmatmul.mubr.msk.bf16.vlgmr.msra.gmra.mrb[16].mxu1 %vm1610_vm11, %v3854_v6  ;;  %v1049_v1 = vadd.f32 %v4312_v26, %v1024_v42  ;;  %v1050_v57 = vadd.f32 %v4312_v26, %v1025_v44  ;;  %v1031_v59 = vmul.f32 %v4310_v62, %v1006_v46  ;;  %v1004_v14 = vmul.f32 %v4284_v0, %v980_v40 }
 0x403   : > { %v1067_v2 = vmax.f32 %v1051_v55, 0.0  ;;  %v1068_v56 = vmax.f32 %v1052_v61, 0.0  ;;  %3418 = vmatprep.mubr.msk.bf16.mxu1 %vm1610_vm11, %v3857_v7  ;;  %v1055_v15 = vadd.f32 %v4312_v26, %v1030_v38  ;;  %v1028_v19 = vmul.f32 %v4310_v62, %v1003_v48 }
 0x404   : > { %v1065_v18 = vmax.f32 %v1049_v1, 0.0  ;;  %v1066_v60 = vmax.f32 %v1050_v57, 0.0  ;;  %v1056_v6 = vadd.f32 %v4312_v26, %v1031_v59  ;;  %v1029_v63 = vmul.f32 %v4310_v62, %v1004_v14 }
 0x405   : > { %v1078_v3 = vpack.c.bf16 %v1068_v56, %v1067_v2  ;;  %v1071_v58 = vmax.f32 %v1055_v15, 0.0  ;;  %v1053_v22 = vadd.f32 %v4312_v26, %v1028_v19 }
 0x406   : > { %v1077_v0 = vpack.c.bf16 %v1066_v60, %v1065_v18  ;;  %v1072_v24 = vmax.f32 %v1056_v6, 0.0  ;;  %v1054_v50 = vadd.f32 %v4312_v26, %v1029_v63 }
 0x407   : > { %1112 = vrot.lane.b32.xlu1 %v1078_v3, %s3734_s25  ;;  %v1069_v7 = vmax.f32 %v1053_v22, 0.0 }
 0x408   : > { %1110 = vrot.lane.b32.xlu0 %v1077_v0, %s3734_s25  ;;  %v1070_v20 = vmax.f32 %v1054_v50, 0.0  ;;  %v1080_v13 = vpack.c.bf16 %v1072_v24, %v1071_v58  ;;  %v4440_v58 = vld [vmem:[%s5405_s9 + $0x1] ss:$0 sm:$0xff]  ;;  %v5447_v24 = vld [vmem:[#allocation6_spill] sm:$0xff] }
 0x40a   : > { %v1079_v5 = vpack.c.bf16 %v1070_v20, %v1069_v7  ;;  %3419 = vmatmul.mubr.msk.bf16.gmra.mrb[20].mxu1 %vm1610_vm11, %v3862_v8 }
 0x40b   : > { %1116 = vrot.lane.b32.xlu1 %v1080_v13, %s3734_s25  ;;  %3422 = vmatprep.mubr.msk.bf16.mxu1 %vm1610_vm11, %v3865_v9 }
 0x40c   : > { %1114 = vrot.lane.b32.xlu0 %v1079_v5, %s3734_s25 }
 0x412   : > { %3423 = vmatmul.mubr.msk.bf16.gmra.mrb[24].mxu1 %vm1610_vm11, %v3868_v10 }
 0x413   : > { %3426 = vmatprep.mubr.msk.bf16.mxu1 %vm1610_vm11, %v3875_v11 }
 0x41a   : > { %3427 = vmatmul.mubr.msk.bf16.gmra.mrb[28].mxu1 %vm1610_vm11, %v3878_v12 }
 0x46f   : > { %v1105_v62 = vpop.permute.xlu1 %1104  ;;  %v1103_v26 = vpop.permute.xlu0 %1102 }
 0x470   : > { %3374 = vmatprep.mubr.msk.bf16.mxu0 %vm1142_vm12, %v1103_v26  ;;  %v5448_v26 = vld [vmem:[#allocation9_spill] sm:$0xff] }
 0x471   : > { %3375 = vmatmul.mubr.msk.bf16.vlgmr.msra.gmra.mrb[0].mxu0 %vm1142_vm12, %v1105_v62 }
 0x473   : > { %v1107_v8 = vpop.permute.xlu0 %1106  ;;  %v1109_v9 = vpop.permute.xlu1 %1108 }
 0x474   : > { %3378 = vmatprep.mubr.msk.bf16.mxu0 %vm1142_vm12, %v1107_v8 }
 0x479   : > { %3379 = vmatmul.mubr.msk.bf16.gmra.mrb[4].mxu0 %vm1142_vm12, %v1109_v9  ;;  %v1113_v11 = vpop.permute.xlu1 %1112 }
 0x47a   : > { %v1111_v10 = vpop.permute.xlu0 %1110 }
 0x47b   : > { %3382 = vmatprep.mubr.msk.bf16.mxu0 %vm1142_vm12, %v1111_v10 }
 0x47d   : > { %v1117_v12 = vpop.permute.xlu1 %1116 }
 0x47e   : > { %v1115_v21 = vpop.permute.xlu0 %1114 }
 0x481   : > { %3383 = vmatmul.mubr.msk.bf16.gmra.mrb[8].mxu0 %vm1142_vm12, %v1113_v11 }
 0x482   : > { %3386 = vmatprep.mubr.msk.bf16.mxu0 %vm1142_vm12, %v1115_v21  ;;  %v5449_v21 = vld [vmem:[#allocation10_spill] sm:$0xff] }
 0x489   : > { %3387 = vmatmul.mubr.msk.bf16.gmra.mrb[12].mxu0 %vm1142_vm12, %v1117_v12 }
 0x4b4   : > { %v3394_v32 = vpop.f32.mrb[0].mxu1 }
 0x4b5   : > { %v4407_v34 = vpop.f32.mrb[1].mxu1  ;;  %v1515_v3 = vadd.f32 %v3394_v32, %v4414_v30 }
 0x4b6   : > { %v4409_v16 = vpop.f32.mrb[2].mxu1 }
 0x4b7   : > { %v1509_v4 = vpop.f32.mrb[3].mxu1  ;;  %v1571_v50 = vadd.f32 %v1515_v3, %v5447_v24  ;;  %v5453_v24 = vld [vmem:[#allocation16_spill] sm:$0xff] }
 0x4b8   : > { %v1510_v22 = vadd.f32 %v4414_v30, %v1509_v4 }
 0x4ba   : > { %v1570_v8 = vadd.f32 %v1510_v22, %v5448_v26 }
 0x4bc   : > { %v3398_v28 = vpop.f32.mrb[4].mxu1 }
 0x4bd   : > { %v1531_v36 = vadd.f32 %v3398_v28, %v4414_v30  ;;  %v1522_v17 = vpop.f32.mrb[5].mxu1  ;;  %v5450_v28 = vld [vmem:[#allocation11_spill] sm:$0xff] }
 0x4be   : > { %v1523_v52 = vadd.f32 %v4414_v30, %v1522_v17  ;;  %v3399_v40 = vpop.f32.mrb[6].mxu1 }
 0x4bf   : > { %v4419_v42 = vadd.f32 %v3399_v40, %v4414_v30  ;;  %v1525_v44 = vpop.f32.mrb[7].mxu1  ;;  %v1575_v12 = vadd.f32 %v1531_v36, %v5449_v21 }
 0x4c0   : > { %v1526_v46 = vadd.f32 %v4414_v30, %v1525_v44  ;;  %v1573_v17 = vadd.f32 %v1523_v52, %v5450_v28 }
 0x4c4   : > { %v3402_v48 = vpop.f32.mrb[8].mxu1 }
 0x4c5   : > { %v1547_v55 = vadd.f32 %v3402_v48, %v4414_v30  ;;  %v1538_v61 = vpop.f32.mrb[9].mxu1 }
 0x4c6   : > { %v4424_v38 = vadd.f32 %v4414_v30, %v1538_v61  ;;  %v3403_v1 = vpop.f32.mrb[10].mxu1 }
 0x4c7   : > { %v1550_v57 = vadd.f32 %v3403_v1, %v4414_v30  ;;  %v1541_v59 = vpop.f32.mrb[11].mxu1  ;;  %v5451_v1 = vld [vmem:[#allocation13_spill] sm:$0xff] }
 0x4c8   : > { %5446 = vst [vmem:[#allocation23_spill] sm:$0xff] %v4424_v38  ;;  %v1542_v14 = vadd.f32 %v4414_v30, %v1541_v59  ;;  %v1574_v59 = vadd.f32 %v1526_v46, %v5451_v1 }
 0x4cc   : > { %v3406_v2 = vpop.f32.mrb[12].mxu1 }
 0x4cd   : > { %v1563_v56 = vadd.f32 %v3406_v2, %v4414_v30  ;;  %v1554_v15 = vpop.f32.mrb[13].mxu1 }
 0x4ce   : > { %v1555_v19 = vadd.f32 %v4414_v30, %v1554_v15  ;;  %v3407_v18 = vpop.f32.mrb[14].mxu1 }
 0x4cf   : > { %v4431_v60 = vadd.f32 %v3407_v18, %v4414_v30  ;;  %v1557_v6 = vpop.f32.mrb[15].mxu1  ;;  %v5452_v18 = vld [vmem:[#allocation14_spill] sm:$0xff] }
 0x4d0   : > { %v4434_v63 = vadd.f32 %v4414_v30, %v1557_v6  ;;  %v1579_v6 = vadd.f32 %v1547_v55, %v5452_v18 }
 0x4d5   : > { %v3416_v0 = vpop.f32.mrb[16].mxu1 }
 0x4d6   : > { %v4445_v7 = vadd.f32 %v3416_v0, %v4440_v58  ;;  %v4447_v20 = vpop.f32.mrb[17].mxu1 }
 0x4d7   : > { %v4449_v13 = vpop.f32.mrb[18].mxu1 }
 0x4d8   : > { %v1667_v5 = vpop.f32.mrb[19].mxu1  ;;  %v4452_v62 = vmul.f32 %v4445_v7, %v1571_v50  ;;  %v1580_v50 = vadd.f32 %v1550_v57, %v5453_v24  ;;  %v5455_v57 = vld [vmem:[#allocation18_spill] sm:$0xff] }
 0x4d9   : > { %v4456_v9 = vadd.f32 %v4440_v58, %v1667_v5 }
 0x4db   : > { %v4459_v10 = vmul.f32 %v4456_v9, %v1570_v8 }
 0x4dd   : > { %v3420_v11 = vpop.f32.mrb[20].mxu1 }
 0x4de   : > { %v4463_v32 = vadd.f32 %v3420_v11, %v4440_v58  ;;  %v1680_v4 = vpop.f32.mrb[21].mxu1  ;;  %v5454_v11 = vld [vmem:[#allocation17_spill] sm:$0xff] }
 0x4df   : > { %v4467_v40 = vadd.f32 %v4440_v58, %v1680_v4  ;;  %v4469_v44 = vpop.f32.mrb[22].mxu1  ;;  %v1578_v21 = vadd.f32 %v1542_v14, %v5454_v11 }
 0x4e0   : > { %v1683_v48 = vpop.f32.mrb[23].mxu1  ;;  %v4472_v61 = vmul.f32 %v4463_v32, %v1575_v12 }
 0x4e1   : > { %v4476_v2 = vadd.f32 %v4440_v58, %v1683_v48  ;;  %v4479_v36 = vmul.f32 %v4467_v40, %v1573_v17  ;;  %v1583_v17 = vadd.f32 %v1563_v56, %v5455_v57 }
 0x4e3   : > { %v4482_v15 = vmul.f32 %v4476_v2, %v1574_v59  ;;  %v5457_v59 = vld [vmem:[#allocation19_spill] sm:$0xff] }
 0x4e5   : > { %v3424_v52 = vpop.f32.mrb[24].mxu1 }
 0x4e6   : > { %v4486_v3 = vadd.f32 %v3424_v52, %v4440_v58  ;;  %v1696_v22 = vpop.f32.mrb[25].mxu1  ;;  %v1581_v52 = vadd.f32 %v1555_v19, %v5457_v59  ;;  %v3160_v19 = vld [vmem:[%s5405_s9 + $0x3] ss:$0 sm:$0xff] }
 0x4e7   : > { %v4489_v0 = vadd.f32 %v4440_v58, %v1696_v22  ;;  %v3425_v46 = vpop.f32.mrb[26].mxu1 }
 0x4e8   : > { %v4493_v5 = vadd.f32 %v3425_v46, %v4440_v58  ;;  %v1699_v26 = vpop.f32.mrb[27].mxu1  ;;  %v4496_v8 = vmul.f32 %v4486_v3, %v1579_v6 }
 0x4e9   : > { %v4500_v55 = vadd.f32 %v4440_v58, %v1699_v26 }
 0x4ea   : > { %v4503_v12 = vmul.f32 %v4493_v5, %v1580_v50 }
 0x4eb   : > { %v4506_v4 = vmul.f32 %v4500_v55, %v1578_v21 }
 0x4ed   : > { %v3428_v28 = vpop.f32.mrb[28].mxu1 }
 0x4ee   : > { %v4510_v48 = vadd.f32 %v3428_v28, %v4440_v58  ;;  %v1712_v1 = vpop.f32.mrb[29].mxu1 }
 0x4ef   : > { %v4514_v14 = vadd.f32 %v4440_v58, %v1712_v1  ;;  %v3429_v18 = vpop.f32.mrb[30].mxu1 }
 0x4f0   : > { %5456 = vst [vmem:[#allocation24_spill] sm:$0xff] %v4510_v48  ;;  %v4517_v6 = vadd.f32 %v3429_v18, %v4440_v58  ;;  %v1715_v22 = vpop.f32.mrb[31].mxu1  ;;  %v4520_v46 = vmul.f32 %v4510_v48, %v1583_v17 }
 0x4f1   : > { %v4523_v24 = vadd.f32 %v4440_v58, %v1715_v22  ;;  %v4526_v56 = vmul.f32 %v4514_v14, %v1581_v52 }
 0x4f2   : > { %5458 = vst [vmem:[#allocation25_spill] sm:$0xff] %v4520_v46 }
 0x4f3   : > { %5459 = vst [vmem:[#allocation26_spill] sm:$0xff] %v4526_v56 }
 0x544   : > { %v3376_v50 = vpop.f32.mrb[0].mxu0 }
 0x545   : > { %v1210_v26 = vadd.f32 %v3376_v50, %v3160_v19  ;;  %v1201_v11 = vpop.f32.mrb[1].mxu0 }
 0x546   : > { %v1202_v21 = vadd.f32 %v3160_v19, %v1201_v11  ;;  %v3377_v28 = vpop.f32.mrb[2].mxu0 }
 0x547   : > { %v1213_v57 = vadd.f32 %v3377_v28, %v3160_v19  ;;  %v1204_v1 = vpop.f32.mrb[3].mxu0  ;;  %v1266_v17 = vadd.f32 %v1210_v26, %v3903_v23 }
 0x548   : > { %v1205_v59 = vadd.f32 %v3160_v19, %v1204_v1  ;;  %v1264_v22 = vadd.f32 %v1202_v21, %v3905_v25 }
 0x549   : > { %v1267_v18 = vadd.f32 %v1213_v57, %v3907_v27 }
 0x54a   : > { %v1265_v52 = vadd.f32 %v1205_v59, %v3909_v29 }
 0x54b   : > { %v3562_v54 = vpack.i.bf16 %v1267_v18, %v1266_v17 }
 0x54c   : > { %v3567_v56 = vpack.i.bf16 %v1265_v52, %v1264_v22  ;;  %v3380_v46 = vpop.f32.mrb[4].mxu0  ;;  %v1665_v22 = vadd.f32 %v4440_v58, %v4447_v20 }
 0x54d   : > { %v1226_v38 = vadd.f32 %v3380_v46, %v3160_v19  ;;  %3563 = vrot.lane.b32.xlu1 %v3562_v54, %s3733_s22  ;;  %v1217_v50 = vpop.f32.mrb[5].mxu0 }
 0x54e   : > { %v1218_v11 = vadd.f32 %v3160_v19, %v1217_v50  ;;  %3568 = vrot.lane.b32.xlu0 %v3567_v56, %s3733_s22  ;;  %v3381_v28 = vpop.f32.mrb[6].mxu0 }
 0x54f   : > { %v1229_v1 = vadd.f32 %v3381_v28, %v3160_v19  ;;  %v1220_v48 = vpop.f32.mrb[7].mxu0  ;;  %v1270_v27 = vadd.f32 %v1226_v38, %v3911_v31 }
 0x550   : > { %v1221_v23 = vadd.f32 %v3160_v19, %v1220_v48  ;;  %v1268_v29 = vadd.f32 %v1218_v11, %v3913_v33 }
 0x551   : > { %v1271_v25 = vadd.f32 %v1229_v1, %v3915_v35 }
 0x552   : > { %v1269_v26 = vadd.f32 %v1221_v23, %v3917_v37 }
 0x553   : > { %v3572_v21 = vpack.i.bf16 %v1271_v25, %v1270_v27 }
 0x554   : > { %v3577_v46 = vpack.i.bf16 %v1269_v26, %v1268_v29  ;;  %v3384_v57 = vpop.f32.mrb[8].mxu0  ;;  %v5460_v26 = vld [vmem:[#allocation7_spill] sm:$0xff] }
 0x555   : > { %v1242_v54 = vadd.f32 %v3384_v57, %v3160_v19  ;;  %3573 = vrot.lane.b32.xlu1 %v3572_v21, %s3733_s22  ;;  %v1233_v59 = vpop.f32.mrb[9].mxu0 }
 0x556   : > { %v1234_v56 = vadd.f32 %v3160_v19, %v1233_v59  ;;  %3578 = vrot.lane.b32.xlu0 %v3577_v46, %s3733_s22  ;;  %v3385_v17 = vpop.f32.mrb[10].mxu0  ;;  %v1518_v46 = vadd.f32 %v4409_v16, %v4414_v30  ;;  %v5462_v16 = vld [vmem:[#allocation12_spill] sm:$0xff] }
 0x557   : > { %v1245_v48 = vadd.f32 %v3385_v17, %v3160_v19  ;;  %v1236_v18 = vpop.f32.mrb[11].mxu0  ;;  %v4544_v35 = vadd.f32 %v1242_v54, %v3919_v39  ;;  %v5461_v54 = vld [vmem:[#allocation8_spill] sm:$0xff] }
 0x558   : > { %v1237_v31 = vadd.f32 %v3160_v19, %v1236_v18  ;;  %v4552_v37 = vadd.f32 %v1234_v56, %v3921_v41  ;;  %v1572_v59 = vadd.f32 %v1518_v46, %v5461_v54 }
 0x559   : > { %v4547_v33 = vadd.f32 %v1245_v48, %v3923_v43  ;;  %1940 = vrot.lane.b32.xlu1 %v4445_v7, %s3734_s25  ;;  %v1759_v48 = vsel %vm1743_vm13, %v4482_v15, -inf }
 0x55a   : > { %v4555_v38 = vadd.f32 %v1237_v31, %v3925_v45  ;;  %v1676_v45 = vadd.f32 %v4449_v13, %v4440_v58 }
 0x55b   : > { %v3587_v52 = vpack.i.bf16 %v4547_v33, %v4544_v35 }
 0x55c   : > { %v3582_v39 = vpack.i.bf16 %v4555_v38, %v4552_v37  ;;  %v3388_v43 = vpop.f32.mrb[12].mxu0  ;;  %v1730_v56 = vmul.f32 %v1676_v45, %v1572_v59  ;;  %v5468_v59 = vld [vmem:[#allocation25_spill] sm:$0xff] }
 0x55d   : > { %v1258_v50 = vadd.f32 %v3388_v43, %v3160_v19  ;;  %1936 = vrot.lane.b32.xlu1 %v1665_v22, %s3734_s25  ;;  %v1249_v7 = vpop.f32.mrb[13].mxu0 }
 0x55e   : > { %v1250_v11 = vadd.f32 %v3160_v19, %v1249_v7  ;;  %v3389_v41 = vpop.f32.mrb[14].mxu0 }
 0x55f   : > { %v1261_v28 = vadd.f32 %v3389_v41, %v3160_v19  ;;  %v1252_v1 = vpop.f32.mrb[15].mxu0  ;;  %v4567_v20 = vadd.f32 %v1258_v50, %v3927_v47  ;;  %v1750_v47 = vsel %vm1743_vm13, %v4452_v62, -inf }
 0x560   : > { %v1253_v23 = vadd.f32 %v3160_v19, %v1252_v1  ;;  %v4574_v25 = vadd.f32 %v1250_v11, %v3929_v49  ;;  %v1692_v49 = vadd.f32 %v4469_v44, %v4440_v58  ;;  %v1753_v58 = vsel %vm1743_vm13, %v1730_v56, -inf }
 0x561   : > { %v4570_v27 = vadd.f32 %v1261_v28, %v3931_v51  ;;  %1942 = vrot.lane.b32.xlu1 %v1676_v45, %s3734_s25  ;;  %v1747_v51 = vsel %vm1743_vm13, %v4459_v10, -inf }
 0x562   : > { %v4577_v29 = vadd.f32 %v1253_v23, %v3933_v53  ;;  %v1507_v53 = vadd.f32 %v4414_v30, %v4407_v34  ;;  %v1762_v34 = vsel %vm1743_vm13, %v4472_v61, -inf  ;;  %v1576_v30 = vadd.f32 %v4419_v42, %v5462_v16 }
 0x563   : > { %v3597_v13 = vpack.i.bf16 %v4570_v27, %v4567_v20  ;;  %v1774_v42 = vsel %vm1743_vm13, %v4496_v8, -inf }
 0x564   : > { %v3592_v19 = vpack.i.bf16 %v4577_v29, %v4574_v25  ;;  %v1569_v21 = vadd.f32 %v1507_v53, %v5460_v26  ;;  %v4613_v44 = vmul.f32 %v1692_v49, %v1576_v30 }
 0x566   : > { %v4597_v57 = vmul.f32 %v1665_v22, %v1569_v21  ;;  %v1765_v17 = vsel %vm1743_vm13, %v4613_v44, -inf }
 0x575   : > { %1751 = vmax.xlane.f32.xlu0 %v1750_v47  ;;  %v5465_v47 = vld [vmem:[#allocation24_spill] sm:$0xff] }
 0x585   : > { %1748 = vmax.xlane.f32.xlu1 %v1747_v51  ;;  %v5466_v51 = vld [vmem:[#allocation15_spill] sm:$0xff] }
 0x58b   : > { %1938 = vrot.lane.b32.xlu0 %v4456_v9, %s3734_s25  ;;  %v1744_v9 = vsel %vm1743_vm13, %v4597_v57, -inf }
 0x596   : > { %1950 = vrot.lane.b32.xlu1 %v1692_v49, %s3734_s25  ;;  %v5467_v49 = vld [vmem:[#allocation23_spill] sm:$0xff] }
 0x597   : > { %v1577_v53 = vadd.f32 %v5467_v49, %v5466_v51 }
 0x599   : > { %v4676_v38 = vmul.f32 %v4489_v0, %v1577_v53 }
 0x5aa   : > { %1745 = vmax.xlane.f32.xlu0 %v1744_v9  ;;  %v1786_v9 = vsel %vm1743_vm13, %v5468_v59, -inf }
 0x5ae   : > { %1754 = vmax.xlane.f32.xlu0 %v1753_v58 }
 0x5ba   : > { %1763 = vmax.xlane.f32.xlu1 %v1762_v34  ;;  %v5469_v34 = vld [vmem:[#allocation26_spill] sm:$0xff] }
 0x5bb   : > { %v1780_v16 = vsel %vm1743_vm13, %v5469_v34, -inf }
 0x5bf   : > { %v4651_v11 = vpop.permute.xlu1 %3563 }
 0x5c0   : > { %v4649_v7 = vpop.permute.xlu0 %3568 }
 0x5c4   : > { %1948 = vrot.lane.b32.xlu0 %v4463_v32, %s3734_s25  ;;  %v1756_v32 = vsel %vm1743_vm13, %v4479_v36, -inf }
 0x5c8   : > { %1944 = vrot.lane.b32.xlu0 %v4467_v40, %s3734_s25  ;;  %v1777_v40 = vsel %vm1743_vm13, %v4503_v12, -inf  ;;  %v4653_v41 = vpop.permute.xlu0 %3578 }
 0x5cb   : > { %1946 = vrot.lane.b32.xlu1 %v4476_v2, %s3734_s25  ;;  %v5463_v2 = vld [vmem:[#allocation20_spill] sm:$0xff] }
 0x5cc   : > { %v1584_v18 = vadd.f32 %v4431_v60, %v5463_v2 }
 0x5ce   : > { %v4636_v31 = vmul.f32 %v4517_v6, %v1584_v18 }
 0x5d0   : > { %v1789_v43 = vsel %vm1743_vm13, %v4636_v31, -inf }
 0x5e7   : > { %1766 = vmax.xlane.f32.xlu0 %v1765_v17 }
 0x5eb   : > { %1760 = vmax.xlane.f32.xlu0 %v1759_v48 }
 0x5ef   : > { %1757 = vmax.xlane.f32.xlu1 %v1756_v32 }
 0x600   : > { %1958 = vrot.lane.b32.xlu1 %v4493_v5, %s3734_s25  ;;  %v1771_v5 = vsel %vm1743_vm13, %v4506_v4, -inf }
 0x601   : > { %1956 = vrot.lane.b32.xlu0 %v4486_v3, %s3734_s25  ;;  %v5464_v3 = vld [vmem:[#allocation21_spill] sm:$0xff] }
 0x602   : > { %v1582_v22 = vadd.f32 %v4434_v63, %v5464_v3  ;;  %v4655_v63 = vpop.permute.xlu1 %3573  ;;  %v1752_v45 = vpop.xlane.xlu0 %1751 }
 0x604   : > { %v4643_v50 = vmul.f32 %v4523_v24, %v1582_v22 }
 0x605   : > { %1952 = vrot.lane.b32.xlu0 %v4489_v0, %s3734_s25 }
 0x606   : > { %v1783_v60 = vsel %vm1743_vm13, %v4643_v50, -inf  ;;  %v4661_v28 = vpop.permute.xlu1 %1940  ;;  %v4663_v1 = vpop.permute.xlu0 %1938 }
 0x624   : > { %1775 = vmax.xlane.f32.xlu1 %v1774_v42  ;;  %1778 = vmax.xlane.f32.xlu0 %v1777_v40 }
 0x628   : > { %1772 = vmax.xlane.f32.xlu0 %v1771_v5 }
 0x62c   : > { %1790 = vmax.xlane.f32.xlu0 %v1789_v43 }
 0x630   : > { %1784 = vmax.xlane.f32.xlu0 %v1783_v60 }
 0x635   : > { %1954 = vrot.lane.b32.xlu1 %v4500_v55, %s3734_s25  ;;  %v4667_v55 = vpop.permute.xlu1 %1936 }
 0x637   : > { %v1746_v23 = vpop.xlane.xlu0 %1745 }
 0x638   : > { %v1792_v22 = vsub.f32 %v4597_v57, %v1746_v23 }
 0x639   : > { %v4673_v26 = vpop.permute.xlu1 %1942 }
 0x63a   : > { %v1808_v60 = vmul.f32 1.442695, %v1792_v22 }
 0x63b   : > { %v1755_v37 = vpop.xlane.xlu0 %1754 }
 0x63d   : > { %v1749_v21 = vpop.xlane.xlu1 %1748 }
 0x63e   : > { %v1793_v46 = vsub.f32 %v4459_v10, %v1749_v21 }
 0x640   : > { %v1810_v58 = vmul.f32 1.442695, %v1793_v46 }
 0x641   : > { %v4709_v35 = vpop.permute.xlu1 %1950 }
 0x646   : > { %3583 = vrot.lane.b32.xlu0 %v3582_v39, %s3733_s22  ;;  %v1795_v39 = vsub.f32 %v1730_v56, %v1755_v37  ;;  %v4687_v56 = vpop.permute.xlu0 %1948 }
 0x648   : > { %v1814_v54 = vmul.f32 1.442695, %v1795_v39 }
 0x64a   : > { %1960 = vrot.lane.b32.xlu0 %v4514_v14, %s3734_s25  ;;  %v1768_v14 = vsel %vm1743_vm13, %v4676_v38, -inf  ;;  %3618 = vpow2.f32 %v1814_v54  ;;  %v4693_v17 = vpop.permute.xlu0 %1944 }
 0x64b   : > { %3620 = vpow2.f32 %v1810_v58 }
 0x64e   : > { %1964 = vrot.lane.b32.xlu0 %v5465_v47, %s3734_s25 }
 0x654   : > { %v4685_v0 = vpop.eup %3618 }
 0x655   : > { %v1849_v30 = vsel %vm1743_vm13, %v4685_v0, 0.0  ;;  %v4691_v10 = vpop.eup %3620 }
 0x656   : > { %v1843_v48 = vsel %vm1743_vm13, %v4691_v10, 0.0 }
 0x659   : > { %1769 = vmax.xlane.f32.xlu1 %v1768_v14 }
 0x65d   : > { %1787 = vmax.xlane.f32.xlu1 %v1786_v9 }
 0x661   : > { %1781 = vmax.xlane.f32.xlu1 %v1780_v16 }
 0x66d   : > { %1850 = vadd.xlane.f32.xlu0 %v1849_v30 }
 0x671   : > { %1844 = vadd.xlane.f32.xlu0 %v1843_v48 }
 0x672   : > { %3588 = vrot.lane.b32.xlu1 %v3587_v52, %s3733_s22 }
 0x674   : > { %v1767_v32 = vpop.xlane.xlu0 %1766 }
 0x675   : > { %v1799_v42 = vsub.f32 %v4613_v44, %v1767_v32  ;;  %v1794_v44 = vsub.f32 %v4452_v62, %v1752_v45 }
 0x676   : > { %1962 = vrot.lane.b32.xlu1 %v4523_v24, %s3734_s25  ;;  %v1764_v24 = vpop.xlane.xlu1 %1763 }
 0x677   : > { %v1822_v40 = vmul.f32 1.442695, %v1799_v42  ;;  %v1798_v47 = vsub.f32 %v4472_v61, %v1764_v24 }
 0x678   : > { %v1761_v2 = vpop.xlane.xlu0 %1760 }
 0x679   : > { %3622 = vpow2.f32 %v1822_v40  ;;  %v1797_v18 = vsub.f32 %v4482_v15, %v1761_v2  ;;  %v1820_v49 = vmul.f32 1.442695, %v1798_v47 }
 0x67a   : > { %1966 = vrot.lane.b32.xlu1 %v4517_v6, %s3734_s25  ;;  %v1812_v6 = vmul.f32 1.442695, %v1794_v44  ;;  %v4719_v43 = vpop.permute.xlu1 %1946 }
 0x67b   : > { %v1818_v5 = vmul.f32 1.442695, %v1797_v18 }
 0x67c   : > { %v4737_v21 = vpop.permute.xlu0 %1956 }
 0x67d   : > { %3624 = vpow2.f32 %v1818_v5 }
 0x67e   : > { %3626 = vpow2.f32 %v1812_v6  ;;  %v1758_v51 = vpop.xlane.xlu1 %1757 }
 0x67f   : > { %3628 = vpow2.f32 %v1808_v60  ;;  %v1796_v53 = vsub.f32 %v4479_v36, %v1758_v51  ;;  %v3613_v60 = vld [vmem:[%s5402_s6 + $0x18] sm:$0xff]  }
 0x680   : > { %3630 = vpow2.f32 %v1820_v49  ;;  %v4743_v54 = vpop.permute.xlu0 %1952 }
 0x681   : > { %v1816_v62 = vmul.f32 1.442695, %v1796_v53 }
 0x682   : > { %v4741_v46 = vpop.permute.xlu1 %1958 }
 0x683   : > { %v4707_v3 = vpop.eup %3622  ;;  %3632 = vpow2.f32 %v1816_v62 }
 0x684   : > { %v1861_v33 = vsel %vm1743_vm13, %v4707_v3, 0.0 }
 0x685   : > { %1862 = vadd.xlane.f32.xlu0 %v1861_v33  ;;  %v3610_v33 = vld [vmem:[%s5402_s6] sm:$0xff]  }
 0x686   : > { %3430 = vmatprep.subr.bf16.mxu0 %v3610_v33 }
 0x687   : > { %v4713_v52 = vpop.eup %3624  ;;  %3431 = vmatpush3.bf16.msra.mxu0 %v3610_v33 }
 0x688   : > { %v1855_v15 = vsel %vm1743_vm13, %v4713_v52, 0.0  ;;  %v4723_v45 = vpop.eup %3626 }
 0x689   : > { %1856 = vadd.xlane.f32.xlu0 %v1855_v15  ;;  %v1846_v37 = vsel %vm1743_vm13, %v4723_v45, 0.0  ;;  %v4727_v57 = vpop.eup %3628 }
 0x68a   : > { %v1840_v23 = vsel %vm1743_vm13, %v4727_v57, 0.0  ;;  %v4731_v61 = vpop.eup %3630 }
 0x68b   : > { %v1858_v36 = vsel %vm1743_vm13, %v4731_v61, 0.0 }
 0x68d   : > { %v4735_v39 = vpop.eup %3632 }
 0x68e   : > { %v1852_v14 = vsel %vm1743_vm13, %v4735_v39, 0.0 }
 0x69e   : > { %1847 = vadd.xlane.f32.xlu1 %v1846_v37 }
 0x6a2   : > { %1841 = vadd.xlane.f32.xlu1 %v1840_v23 }
 0x6a6   : > { %1859 = vadd.xlane.f32.xlu1 %v1858_v36 }
 0x6aa   : > { %1853 = vadd.xlane.f32.xlu1 %v1852_v14 }
 0x6b1   : > { %v1776_v9 = vpop.xlane.xlu1 %1775  ;;  %v1779_v58 = vpop.xlane.xlu0 %1778 }
 0x6b2   : > { %v1802_v16 = vsub.f32 %v4496_v8, %v1776_v9  ;;  %v1803_v30 = vsub.f32 %v4503_v12, %v1779_v58 }
 0x6b4   : > { %v1828_v48 = vmul.f32 1.442695, %v1802_v16  ;;  %v1830_v32 = vmul.f32 1.442695, %v1803_v30 }
 0x6b5   : > { %v1773_v42 = vpop.xlane.xlu0 %1772  ;;  %v4782_v23 = vpop.permute.xlu1 %1954 }
 0x6b6   : > { %3634 = vpow2.f32 %v1828_v48  ;;  %v1801_v40 = vsub.f32 %v4506_v4, %v1773_v42  ;;  %v3611_v4 = vld [vmem:[%s5402_s6 + $0x8] sm:$0xff]  }
 0x6b7   : > { %3636 = vpow2.f32 %v1830_v32  ;;  %3432 = vmatprep.subr.bf16.mxu0 %v3611_v4 }
 0x6b8   : > { %v1826_v2 = vmul.f32 1.442695, %v1801_v40  ;;  %3433 = vmatpush3.bf16.msra.mxu0 %v3611_v4 }
 0x6b9   : > { %v1791_v18 = vpop.xlane.xlu0 %1790 }
 0x6ba   : > { %3638 = vpow2.f32 %v1826_v2  ;;  %v1807_v5 = vsub.f32 %v4636_v31, %v1791_v18 }
 0x6bc   : > { %v1838_v24 = vmul.f32 1.442695, %v1807_v5 }
 0x6bd   : > { %v1785_v8 = vpop.xlane.xlu0 %1784 }
 0x6be   : > { %3640 = vpow2.f32 %v1838_v24  ;;  %v1805_v12 = vsub.f32 %v4643_v50, %v1785_v8  ;;  %v3612_v50 = vld [vmem:[%s5402_s6 + $0x10] sm:$0xff]  }
 0x6bf   : > { %3434 = vmatprep.subr.bf16.mxu0 %v3612_v50 }
 0x6c0   : > { %v4756_v44 = vpop.eup %3634  ;;  %v1834_v15 = vmul.f32 1.442695, %v1805_v12  ;;  %3435 = vmatpush3.bf16.msra.mxu0 %v3612_v50 }
 0x6c1   : > { %v4758_v6 = vpop.eup %3636  ;;  %v1870_v31 = vsel %vm1743_vm13, %v4756_v44, 0.0  ;;  %3436 = vmatprep.subr.bf16.mxu0 %v3613_v60 }
 0x6c2   : > { %3642 = vpow2.f32 %v1834_v15  ;;  %1871 = vadd.xlane.f32.xlu1 %v1870_v31  ;;  %v1873_v22 = vsel %vm1743_vm13, %v4758_v6, 0.0 }
 0x6c3   : > { %1874 = vadd.xlane.f32.xlu0 %v1873_v22 }
 0x6c4   : > { %v4770_v47 = vpop.eup %3638  ;;  %3437 = vmatpush3.bf16.msra.mxu0 %v3613_v60 }
 0x6c5   : > { %v1867_v51 = vsel %vm1743_vm13, %v4770_v47, 0.0 }
 0x6c7   : > { %1868 = vadd.xlane.f32.xlu0 %v1867_v51 }
 0x6c8   : > { %v4774_v49 = vpop.eup %3640 }
 0x6c9   : > { %v1885_v53 = vsel %vm1743_vm13, %v4774_v49, 0.0 }
 0x6cb   : > { %1886 = vadd.xlane.f32.xlu0 %v1885_v53 }
 0x6cc   : > { %v4778_v62 = vpop.eup %3642 }
 0x6cd   : > { %v1879_v37 = vsel %vm1743_vm13, %v4778_v62, 0.0 }
 0x6cf   : > { %1880 = vadd.xlane.f32.xlu0 %v1879_v37 }
 0x6e5   : > { %3593 = vrot.lane.b32.xlu0 %v3592_v19, %s3733_s22 }
 0x6e6   : > { %v1770_v36 = vpop.xlane.xlu1 %1769 }
 0x6e7   : > { %v1800_v14 = vsub.f32 %v4676_v38, %v1770_v36 }
 0x6e9   : > { %v1824_v9 = vmul.f32 1.442695, %v1800_v14 }
 0x6ea   : > { %v1788_v58 = vpop.xlane.xlu1 %1787 }
 0x6eb   : > { %3644 = vpow2.f32 %v1824_v9  ;;  %v1806_v16 = vsub.f32 %v5468_v59, %v1788_v58 }
 0x6ed   : > { %v1836_v30 = vmul.f32 1.442695, %v1806_v16 }
 0x6ee   : > { %v1782_v48 = vpop.xlane.xlu1 %1781 }
 0x6ef   : > { %3646 = vpow2.f32 %v1836_v30  ;;  %v1804_v32 = vsub.f32 %v5469_v34, %v1782_v48  ;;  %v4803_v34 = vpop.permute.xlu0 %3583  ;;  %v3565_v30 = vunpack.i.l.bf16 %v4651_v11 }
 0x6f1   : > { %v1832_v42 = vmul.f32 1.442695, %v1804_v32 }
 0x6f2   : > { %v4813_v5 = vpop.permute.xlu1 %3588 }
 0x6f3   : > { %3648 = vpow2.f32 %v1832_v42  ;;  %v4809_v2 = vpop.permute.xlu0 %1960 }
 0x6f5   : > { %v4791_v40 = vpop.eup %3644 }
 0x6f6   : > { %v1864_v25 = vsel %vm1743_vm13, %v4791_v40, 0.0  ;;  %v4815_v24 = vpop.permute.xlu1 %1962 }
 0x6f7   : > { %1865 = vadd.xlane.f32.xlu1 %v1864_v25  ;;  %v4811_v18 = vpop.permute.xlu0 %1964  ;;  %v3566_v25 = vunpack.i.h.bf16 %v4651_v11 }
 0x6f9   : > { %v4795_v29 = vpop.eup %3646 }
 0x6fa   : > { %v1882_v19 = vsel %vm1743_vm13, %v4795_v29, 0.0  ;;  %v4817_v12 = vpop.permute.xlu1 %1966 }
 0x6fb   : > { %1883 = vadd.xlane.f32.xlu1 %v1882_v19  ;;  %v1851_v33 = vpop.xlane.xlu0 %1850 }
 0x6fd   : > { %v4799_v38 = vpop.eup %3648 }
 0x6fe   : > { %v1876_v59 = vsel %vm1743_vm13, %v4799_v38, 0.0 }
 0x6ff   : > { %1877 = vadd.xlane.f32.xlu1 %v1876_v59  ;;  %v1845_v8 = vpop.xlane.xlu0 %1844 }
 0x700   : > { %3650 = vrcp.f32 %v1845_v8 }
 0x701   : > { %3652 = vrcp.f32 %v1851_v33 }
 0x710   : > { %3598 = vrot.lane.b32.xlu1 %v3597_v13, %s3733_s22  ;;  %v3651_v13 = vpop.eup %3650 }
 0x711   : > { %v3653_v22 = vpop.eup %3652  ;;  %v1905_v60 = vmul.f32 %v3651_v13, %v4691_v10  ;;  %v3571_v10 = vunpack.i.h.bf16 %v4649_v7 }
 0x712   : > { %v1863_v4 = vpop.xlane.xlu0 %1862  ;;  %v1907_v37 = vmul.f32 %v3653_v22, %v4685_v0 }
 0x713   : > { %v1985_v58 = vmul.f32 %v4663_v1, %v1905_v60 }
 0x714   : > { %v1987_v48 = vmul.f32 %v4673_v26, %v1907_v37 }
 0x715   : > { %v2065_v26 = vsel %vm1743_vm13, %v1985_v58, %v3571_v10 }
 0x716   : > { %v1857_v31 = vpop.xlane.xlu0 %1856  ;;  %v2067_v59 = vsel %vm1743_vm13, %v1987_v48, %v3566_v25  ;;  %v3591_v25 = vunpack.i.h.bf16 %v4813_v5 }
 0x72b   : > { %v1848_v15 = vpop.xlane.xlu1 %1847 }
 0x72c   : > { %3654 = vrcp.f32 %v1848_v15 }
 0x72f   : > { %v1842_v20 = vpop.xlane.xlu1 %1841 }
 0x730   : > { %3656 = vrcp.f32 %v1842_v20 }
 0x731   : > { %3658 = vrcp.f32 %v1857_v31  ;;  %v3581_v31 = vunpack.i.h.bf16 %v4653_v41 }
 0x732   : > { %3660 = vrcp.f32 %v1863_v4 }
 0x733   : > { %v1860_v27 = vpop.xlane.xlu1 %1859 }
 0x734   : > { %3662 = vrcp.f32 %v1860_v27  ;;  %v3576_v27 = vunpack.i.h.bf16 %v4655_v63 }
 0x736   : > { %v3655_v50 = vpop.eup %3654 }
 0x737   : > { %v1906_v51 = vmul.f32 %v3655_v50, %v4723_v45  ;;  %v1854_v53 = vpop.xlane.xlu1 %1853  ;;  %v3570_v45 = vunpack.i.l.bf16 %v4649_v7 }
 0x738   : > { %3664 = vrcp.f32 %v1854_v53 }
 0x739   : > { %v1986_v14 = vmul.f32 %v4661_v28, %v1906_v51 }
 0x73a   : > { %v3657_v36 = vpop.eup %3656 }
 0x73b   : > { %v1904_v9 = vmul.f32 %v3657_v36, %v4727_v57  ;;  %v3659_v16 = vpop.eup %3658  ;;  %v2066_v28 = vsel %vm1743_vm13, %v1986_v14, %v3565_v30 }
 0x73c   : > { %v3661_v32 = vpop.eup %3660  ;;  %v1909_v57 = vmul.f32 %v3659_v16, %v4713_v52  ;;  %v2081_v8 = vpack.c.bf16 %v2067_v59, %v2066_v28 }
 0x73d   : > { %v1984_v0 = vmul.f32 %v4667_v55, %v1904_v9  ;;  %v1911_v33 = vmul.f32 %v3661_v32, %v4707_v3  ;;  %v3580_v3 = vunpack.i.l.bf16 %v4653_v41 }
 0x73e   : > { %v3663_v42 = vpop.eup %3662  ;;  %v1989_v52 = vmul.f32 %v4719_v43, %v1909_v57 }
 0x73f   : > { %v1910_v1 = vmul.f32 %v3663_v42, %v4731_v61  ;;  %v2064_v19 = vsel %vm1743_vm13, %v1984_v0, %v3570_v45  ;;  %v3575_v61 = vunpack.i.l.bf16 %v4655_v63  ;;  %v1991_v15 = vmul.f32 %v4709_v35, %v1911_v33 }
 0x740   : > { %v2080_v7 = vpack.c.bf16 %v2065_v26, %v2064_v19  ;;  %v2069_v13 = vsel %vm1743_vm13, %v1989_v52, %v3581_v31 }
 0x741   : > { %v1990_v11 = vmul.f32 %v4687_v56, %v1910_v1  ;;  %v2071_v43 = vsel %vm1743_vm13, %v1991_v15, %v3576_v27 }
 0x742   : > { %v3665_v55 = vpop.eup %3664  ;;  %3438 = vmatprep.mubr.msk.bf16.mxu0 %vm1142_vm12, %v2080_v7 }
 0x743   : > { %v1908_v4 = vmul.f32 %v3665_v55, %v4735_v39  ;;  %3439 = vmatmul.mubr.msk.bf16.vlgmr.msra.gmra.mrb[16].mxu0 %vm1142_vm12, %v2081_v8  ;;  %v2070_v56 = vsel %vm1743_vm13, %v1990_v11, %v3575_v61 }
 0x744   : > { %v2083_v50 = vpack.c.bf16 %v2071_v43, %v2070_v56 }
 0x745   : > { %v1988_v20 = vmul.f32 %v4693_v17, %v1908_v4 }
 0x747   : > { %v2068_v39 = vsel %vm1743_vm13, %v1988_v20, %v3580_v3 }
 0x748   : > { %v2082_v22 = vpack.c.bf16 %v2069_v13, %v2068_v39 }
 0x74a   : > { %3442 = vmatprep.mubr.msk.bf16.mxu0 %vm1142_vm12, %v2082_v22 }
 0x74b   : > { %3443 = vmatmul.mubr.msk.bf16.gmra.mrb[20].mxu0 %vm1142_vm12, %v2083_v50 }
 0x74f   : > { %v1872_v60 = vpop.xlane.xlu1 %1871 }
 0x750   : > { %v1875_v35 = vpop.xlane.xlu0 %1874  ;;  %3666 = vrcp.f32 %v1872_v60 }
 0x751   : > { %3668 = vrcp.f32 %v1875_v35 }
 0x754   : > { %v1869_v41 = vpop.xlane.xlu0 %1868 }
 0x755   : > { %3670 = vrcp.f32 %v1869_v41 }
 0x758   : > { %v1887_v63 = vpop.xlane.xlu0 %1886 }
 0x75a   : > { %v3667_v53 = vpop.eup %3666 }
 0x75b   : > { %v3669_v37 = vpop.eup %3668  ;;  %v1914_v9 = vmul.f32 %v3667_v53, %v4756_v44  ;;  %v3590_v44 = vunpack.i.l.bf16 %v4813_v5 }
 0x75c   : > { %v1881_v17 = vpop.xlane.xlu0 %1880  ;;  %v1915_v58 = vmul.f32 %v3669_v37, %v4758_v6  ;;  %v3586_v6 = vunpack.i.h.bf16 %v4803_v34 }
 0x75d   : > { %v1994_v32 = vmul.f32 %v4737_v21, %v1914_v9 }
 0x75e   : > { %v1995_v10 = vmul.f32 %v4741_v46, %v1915_v58 }
 0x75f   : > { %v3671_v14 = vpop.eup %3670  ;;  %v2074_v21 = vsel %vm1743_vm13, %v1994_v32, %v3590_v44 }
 0x760   : > { %v1913_v16 = vmul.f32 %v3671_v14, %v4770_v47  ;;  %v3585_v47 = vunpack.i.l.bf16 %v4803_v34  ;;  %v2075_v46 = vsel %vm1743_vm13, %v1995_v10, %v3591_v25  ;;  %v3594_v7 = vpop.permute.xlu0 %3593 }
 0x761   : > { %v2085_v33 = vpack.c.bf16 %v2075_v46, %v2074_v21  ;;  %v3596_v4 = vunpack.i.h.bf16 %v3594_v7  ;;  %v3595_v52 = vunpack.i.l.bf16 %v3594_v7 }
 0x762   : > { %v1993_v0 = vmul.f32 %v4782_v23, %v1913_v16 }
 0x764   : > { %v2073_v5 = vsel %vm1743_vm13, %v1993_v0, %v3586_v6 }
 0x784   : > { %v1866_v51 = vpop.xlane.xlu1 %1865 }
 0x785   : > { %3672 = vrcp.f32 %v1866_v51 }
 0x786   : > { %3674 = vrcp.f32 %v1881_v17 }
 0x788   : > { %v1884_v36 = vpop.xlane.xlu1 %1883 }
 0x789   : > { %3676 = vrcp.f32 %v1884_v36 }
 0x78a   : > { %3678 = vrcp.f32 %v1887_v63 }
 0x78c   : > { %v1878_v30 = vpop.xlane.xlu1 %1877 }
 0x78d   : > { %3680 = vrcp.f32 %v1878_v30 }
 0x78f   : > { %v3673_v48 = vpop.eup %3672 }
 0x790   : > { %v1912_v45 = vmul.f32 %v3673_v48, %v4791_v40  ;;  %v3675_v42 = vpop.eup %3674  ;;  %v3599_v59 = vpop.permute.xlu1 %3598 }
 0x791   : > { %v1917_v40 = vmul.f32 %v3675_v42, %v4778_v62  ;;  %v3600_v11 = vunpack.i.l.bf16 %v3599_v59 }
 0x792   : > { %v1992_v28 = vmul.f32 %v4743_v54, %v1912_v45 }
 0x793   : > { %v3677_v57 = vpop.eup %3676  ;;  %v1997_v55 = vmul.f32 %v4815_v24, %v1917_v40 }
 0x794   : > { %v3679_v1 = vpop.eup %3678  ;;  %v1918_v23 = vmul.f32 %v3677_v57, %v4795_v29  ;;  %v2072_v19 = vsel %vm1743_vm13, %v1992_v28, %v3585_v47  ;;  %v3601_v29 = vunpack.i.h.bf16 %v3599_v59 }
 0x795   : > { %v2084_v26 = vpack.c.bf16 %v2073_v5, %v2072_v19  ;;  %v1919_v54 = vmul.f32 %v3679_v1, %v4774_v49 }
 0x796   : > { %v1998_v8 = vmul.f32 %v4811_v18, %v1918_v23  ;;  %v2077_v18 = vsel %vm1743_vm13, %v1997_v55, %v3596_v4 }
 0x797   : > { %v3681_v34 = vpop.eup %3680  ;;  %3446 = vmatprep.mubr.msk.bf16.mxu0 %vm1142_vm12, %v2084_v26  ;;  %v1999_v15 = vmul.f32 %v4817_v12, %v1919_v54 }
 0x798   : > { %v1916_v62 = vmul.f32 %v3681_v34, %v4799_v38  ;;  %3447 = vmatmul.mubr.msk.bf16.gmra.mrb[24].mxu0 %vm1142_vm12, %v2085_v33  ;;  %v2078_v49 = vsel %vm1743_vm13, %v1998_v8, %v3600_v11 }
 0x799   : > { %v2079_v24 = vsel %vm1743_vm13, %v1999_v15, %v3601_v29 }
 0x79a   : > { %v1996_v61 = vmul.f32 %v4809_v2, %v1916_v62  ;;  %v2087_v38 = vpack.c.bf16 %v2079_v24, %v2078_v49  ;;  %v3197_v2 = vld [vmem:[%s5405_s9 + $0x5] ss:$0 sm:$0xff] }
 0x79c   : > { %v2076_v31 = vsel %vm1743_vm13, %v1996_v61, %v3595_v52 }
 0x79d   : > { %v2086_v3 = vpack.c.bf16 %v2077_v18, %v2076_v31 }
 0x79f   : > { %3450 = vmatprep.mubr.msk.bf16.mxu0 %vm1142_vm12, %v2086_v3 }
 0x7a0   : > { %3451 = vmatmul.mubr.msk.bf16.gmra.mrb[28].mxu0 %vm1142_vm12, %v2087_v38 }
 0x816   : > { %v3440_v20 = vpop.f32.mrb[16].mxu0 }
 0x817   : > { %v4890_v12 = vadd.f32 %v3440_v20, %v3197_v2  ;;  %v2183_v27 = vpop.f32.mrb[17].mxu0 }
 0x818   : > { %v4892_v56 = vadd.f32 %v3197_v2, %v2183_v27  ;;  %v3441_v39 = vpop.f32.mrb[18].mxu0 }
 0x819   : > { %v4894_v13 = vadd.f32 %v3441_v39, %v3197_v2  ;;  %v2186_v22 = vpop.f32.mrb[19].mxu0 }
 0x81a   : > { %v4896_v43 = vadd.f32 %v3197_v2, %v2186_v22 }
 0x81e   : > { %v3444_v50 = vpop.f32.mrb[20].mxu0 }
 0x81f   : > { %v4898_v35 = vadd.f32 %v3444_v50, %v3197_v2  ;;  %v2199_v41 = vpop.f32.mrb[21].mxu0 }
 0x820   : > { %v4900_v60 = vadd.f32 %v3197_v2, %v2199_v41  ;;  %v3445_v63 = vpop.f32.mrb[22].mxu0 }
 0x821   : > { %v4902_v17 = vadd.f32 %v3445_v63, %v3197_v2  ;;  %v2202_v51 = vpop.f32.mrb[23].mxu0 }
 0x822   : > { %v4904_v53 = vadd.f32 %v3197_v2, %v2202_v51 }
 0x86b   : > { %v3448_v37 = vpop.f32.mrb[24].mxu0 }
 0x86c   : > { %v4906_v36 = vadd.f32 %v3448_v37, %v3197_v2  ;;  %v2215_v14 = vpop.f32.mrb[25].mxu0 }
 0x86d   : > { %v4908_v9 = vadd.f32 %v3197_v2, %v2215_v14  ;;  %v3449_v58 = vpop.f32.mrb[26].mxu0 }
 0x86e   : > { %v4910_v16 = vadd.f32 %v3449_v58, %v3197_v2  ;;  %v2218_v30 = vpop.f32.mrb[27].mxu0 }
 0x86f   : > { %v4912_v48 = vadd.f32 %v3197_v2, %v2218_v30 }
 0x871   : > { %2249 = sbr.rel (%p3210_p9) target bundleno = 2340 (0x924), region = 80 }
 0x873   : > { %v3452_v32 = vpop.f32.mrb[28].mxu0 }
 0x874   : > { %v4914_v10 = vadd.f32 %v3452_v32, %v3197_v2  ;;  %v2231_v45 = vpop.f32.mrb[29].mxu0 }
 0x875   : > { %v4916_v0 = vadd.f32 %v3197_v2, %v2231_v45  ;;  %v3453_v42 = vpop.f32.mrb[30].mxu0 }
 0x876   : > { %v4918_v25 = vadd.f32 %v3453_v42, %v3197_v2  ;;  %v2234_v44 = vpop.f32.mrb[31].mxu0 }
 0x877   : > { %v4920_v6 = vadd.f32 %v3197_v2, %v2234_v44 }
 0x878   : > { %2253 = sbr.rel (%p3211_p10) target bundleno = 2175 (0x87f), region = 84  ;;  %vm2254_vm14 = vcmask (!%p3211_p10), 254976   ;;  %v3735_v47 = vmov (!%p3211_p10), 0.0  }
 0x879   : > { %2255 = vst.msk [vmem:[#allocation4] sm:$0x3] (!%p3211_p10), %vm2254_vm14, %v3735_v47 }
 0x87f PF: > { %vm2256_vm15 = vcmask 392320   ;;  %v2294_v19 = vmul.f32 %v4892_v56, %v4892_v56  ;;  %v2295_v5 = vmul.f32 %v4896_v43, %v4896_v43  ;;  %v2296_v26 = vmul.f32 %v4890_v12, %v4890_v12  ;;  %s3736_s28 = smov 112  }
 0x880   : > { %v2257_v28 = vsel %vm2256_vm15, %v4892_v56, 0.0  ;;  %v2258_v57 = vsel %vm2256_vm15, %v4896_v43, 0.0  ;;  %v2260_v21 = vsel %vm2256_vm15, %v4890_v12, 0.0  ;;  %v2262_v1 = vsel %vm2256_vm15, %v4894_v13, 0.0 }
 0x881   : > { %v2259_v46 = vadd.f32 %v2258_v57, %v2257_v28  ;;  %v2264_v23 = vsel %vm2256_vm15, %v4900_v60, 0.0  ;;  %v2266_v33 = vsel %vm2256_vm15, %v4904_v53, 0.0  ;;  %v2297_v34 = vmul.f32 %v4894_v13, %v4894_v13 }
 0x882   : > { %v2268_v54 = vsel %vm2256_vm15, %v4898_v35, 0.0  ;;  %v2298_v8 = vmul.f32 %v4900_v60, %v4900_v60  ;;  %v2310_v55 = vsel %vm2256_vm15, %v2294_v19, 0.0  ;;  %v2311_v62 = vsel %vm2256_vm15, %v2295_v5, 0.0 }
 0x883   : > { %v2261_v40 = vadd.f32 %v2260_v21, %v2259_v46  ;;  %v2313_v29 = vsel %vm2256_vm15, %v2296_v26, 0.0  ;;  %v2312_v4 = vadd.f32 %v2311_v62, %v2310_v55  ;;  %v2270_v52 = vsel %vm2256_vm15, %v4902_v17, 0.0 }
 0x884   : > { %v2299_v61 = vmul.f32 %v4904_v53, %v4904_v53  ;;  %v2315_v15 = vsel %vm2256_vm15, %v2297_v34, 0.0  ;;  %v2272_v31 = vsel %vm2256_vm15, %v4908_v9, 0.0  ;;  %v2300_v24 = vmul.f32 %v4898_v35, %v4898_v35 }
 0x885   : > { %v2263_v59 = vadd.f32 %v2262_v1, %v2261_v40  ;;  %v2314_v18 = vadd.f32 %v2313_v29, %v2312_v4  ;;  %v2317_v3 = vsel %vm2256_vm15, %v2298_v8, 0.0  ;;  %v2274_v20 = vsel %vm2256_vm15, %v4912_v48, 0.0 }
 0x886   : > { %v2301_v27 = vmul.f32 %v4902_v17, %v4902_v17  ;;  %v2319_v39 = vsel %vm2256_vm15, %v2299_v61, 0.0  ;;  %v2276_v41 = vsel %vm2256_vm15, %v4906_v36, 0.0  ;;  %v2302_v63 = vmul.f32 %v4908_v9, %v4908_v9 }
 0x887   : > { %v2265_v7 = vadd.f32 %v2264_v23, %v2263_v59  ;;  %v2316_v2 = vadd.f32 %v2315_v15, %v2314_v18  ;;  %v2321_v51 = vsel %vm2256_vm15, %v2300_v24, 0.0  ;;  %v2278_v58 = vsel %vm2256_vm15, %v4910_v16, 0.0 }
 0x888   : > { %v2303_v30 = vmul.f32 %v4912_v48, %v4912_v48  ;;  %v2323_v32 = vsel %vm2256_vm15, %v2301_v27, 0.0  ;;  %v2280_v44 = vsel %vm2256_vm15, %v4916_v0, 0.0  ;;  %v2304_v47 = vmul.f32 %v4906_v36, %v4906_v36 }
 0x889   : > { %v2267_v11 = vadd.f32 %v2266_v33, %v2265_v7  ;;  %v2318_v50 = vadd.f32 %v2317_v3, %v2316_v2  ;;  %v2325_v28 = vsel %vm2256_vm15, %v2302_v63, 0.0  ;;  %v2282_v46 = vsel %vm2256_vm15, %v4920_v6, 0.0 }
 0x88a   : > { %v2305_v1 = vmul.f32 %v4910_v16, %v4910_v16  ;;  %v2327_v40 = vsel %vm2256_vm15, %v2303_v30, 0.0  ;;  %v2284_v5 = vsel %vm2256_vm15, %v4914_v10, 0.0  ;;  %v2306_v26 = vmul.f32 %v4916_v0, %v4916_v0 }
 0x88b   : > { %v2269_v49 = vadd.f32 %v2268_v54, %v2267_v11  ;;  %v2320_v14 = vadd.f32 %v2319_v39, %v2318_v50  ;;  %v2329_v59 = vsel %vm2256_vm15, %v2304_v47, 0.0  ;;  %v2286_v7 = vsel %vm2256_vm15, %v4918_v25, 0.0 }
 0x88c   : > { %v2307_v54 = vmul.f32 %v4920_v6, %v4920_v6  ;;  %v2331_v8 = vsel %vm2256_vm15, %v2305_v1, 0.0  ;;  %v2308_v29 = vmul.f32 %v4914_v10, %v4914_v10  ;;  %v2333_v11 = vsel %vm2256_vm15, %v2306_v26, 0.0 }
 0x88d   : > { %v2271_v38 = vadd.f32 %v2270_v52, %v2269_v49  ;;  %v2322_v42 = vadd.f32 %v2321_v51, %v2320_v14  ;;  %v2309_v61 = vmul.f32 %v4918_v25, %v4918_v25  ;;  %vm2348_vm0 = vcmask 1040384  }
 0x88e   : > { %v2335_v15 = vsel %vm2256_vm15, %v2307_v54, 0.0  ;;  %vm2355_vm1 = vcmask 254976  }
 0x88f   : > { %v2273_v22 = vadd.f32 %v2272_v31, %v2271_v38  ;;  %v2324_v21 = vadd.f32 %v2323_v32, %v2322_v42  ;;  %v2337_v31 = vsel %vm2256_vm15, %v2308_v29, 0.0  ;;  %v2339_v38 = vsel %vm2256_vm15, %v2309_v61, 0.0  ;;  %v2347_v32 = vld [vmem:[#allocation4] sm:$0x3] }
 0x891   : > { %v2275_v37 = vadd.f32 %v2274_v20, %v2273_v22  ;;  %v2326_v19 = vadd.f32 %v2325_v28, %v2324_v21 }
 0x893   : > { %v2277_v45 = vadd.f32 %v2276_v41, %v2275_v37  ;;  %v2328_v34 = vadd.f32 %v2327_v40, %v2326_v19 }
 0x895   : > { %v2279_v57 = vadd.f32 %v2278_v58, %v2277_v45  ;;  %v2330_v62 = vadd.f32 %v2329_v59, %v2328_v34 }
 0x897   : > { %v2281_v23 = vadd.f32 %v2280_v44, %v2279_v57  ;;  %v2332_v52 = vadd.f32 %v2331_v8, %v2330_v62 }
 0x899   : > { %v2283_v33 = vadd.f32 %v2282_v46, %v2281_v23  ;;  %v2334_v18 = vadd.f32 %v2333_v11, %v2332_v52 }
 0x89b   : > { %v2285_v55 = vadd.f32 %v2284_v5, %v2283_v33  ;;  %v2336_v3 = vadd.f32 %v2335_v15, %v2334_v18 }
 0x89d   : > { %v2287_v4 = vadd.f32 %v2286_v7, %v2285_v55  ;;  %v2338_v20 = vadd.f32 %v2337_v31, %v2336_v3 }
 0x89f   : > { %v2288_v49 = vrot.slane %v2287_v4, 4  ;;  %v2340_v27 = vadd.f32 %v2339_v38, %v2338_v20 }
 0x8a1   : > { %v2289_v24 = vadd.f32 %v2288_v49, %v2287_v4  ;;  %v2341_v22 = vrot.slane %v2340_v27, 4 }
 0x8a3   : > { %v2290_v2 = vrot.slane %v2289_v24, 2  ;;  %v2342_v50 = vadd.f32 %v2341_v22, %v2340_v27 }
 0x8a5   : > { %v2291_v39 = vadd.f32 %v2290_v2, %v2289_v24  ;;  %v2343_v63 = vrot.slane %v2342_v50, 2 }
 0x8a7   : > { %v2292_v41 = vrot.slane %v2291_v39, 1  ;;  %v2344_v51 = vadd.f32 %v2343_v63, %v2342_v50 }
 0x8a9   : > { %v2293_v37 = vadd.f32 %v2292_v41, %v2291_v39  ;;  %v2345_v14 = vrot.slane %v2344_v51, 1 }
 0x8ab   : > { %v2346_v58 = vadd.f32 %v2345_v14, %v2344_v51 }
 0x8ad   : > { %v2349_v30 = vsel %vm2348_vm0, %v2293_v37, %v2346_v58 }
 0x8ae   : > { %2351 = vrot.lane.b32.xlu0 %v2349_v30, %s3736_s28 }
 0x920   : > { %v2352_v45 = vpop.permute.xlu0 %2351 }
 0x921   : > { %v2354_v42 = vadd.f32 %v2352_v45, %v2347_v32 }
 0x923   : > { %2356 = vst.msk [vmem:[#allocation4] sm:$0x3] %vm2355_vm1, %v2354_v42 }
 0x924 PF: > { %p3212_p11 = scmp.lt.s32.totalorder %s3715_s14, 2 }
 0x925   : > { %v3213_v21 = vld [vmem:[%s5405_s9 + $0xc] ss:$0 sm:$0xff] (!%p3212_p11)  ;;  %s3737_s30 = smov (!%p3212_p11), 16   ;;  %v3214_v23 = vld [vmem:[%s5405_s9 + $0xd] ss:$0 sm:$0xff] (!%p3212_p11)  ;;  %v3682_v33 = vld [vmem:[%s5403_s7] sm:$0xff] (!%p3212_p11)  }
 0x926   : > { %2360 = sbr.rel (%p3212_p11) target bundleno = 3165 (0xc5d), region = 88  ;;  %2423 = vrot.lane.b32.xlu1 (!%p3212_p11), %v3213_v21, %s3737_s30  ;;  %v5470_v46 = vld [vmem:[#allocation22_spill] sm:$0xff] (!%p3212_p11)  ;;  %3454 = vmatprep.subr.bf16.mxu0 (!%p3212_p11), %v3682_v33  ;;  %s3738_s22 = smov (!%p3212_p11), 112  }
 0x927   : > { %3492 = vmatprep.subr.bf16.mxu1 (!%p3212_p11), %v3682_v33  ;;  %3455 = vmatpush3.bf16.msra.mxu0 (!%p3212_p11), %v3682_v33  ;;  %v3683_v4 = vld [vmem:[%s5403_s7 + $0x8] sm:$0xff] (!%p3212_p11)   ;;  %p3226_p12 = scmp.ne.s32.totalorder (!%p3212_p11), %s3715_s14, 2 }
 0x928   : > { %3494 = vmatpush3.bf16.msra.mxu1 (!%p3212_p11), %v3682_v33  ;;  %3456 = vmatprep.subr.bf16.mxu0 (!%p3212_p11), %v3683_v4 }
 0x929   : > { %3493 = vmatprep.subr.bf16.mxu1 (!%p3212_p11), %v3683_v4 }
 0x92a   : > { %v2361_v44 = vld [vmem:[#allocation4] sm:$0x1] (!%p3212_p11)  ;;  %v2363_v47 = vld [vmem:[#allocation4 + $0x1] sm:$0x1] (!%p3212_p11)  ;;  %2448 = vrot.lane.b32.xlu1 (!%p3212_p11), %v3214_v23, %s3737_s30 }
 0x92b   : > { %v2362_v28 = vmul.f32 (!%p3212_p11), 0.001953125, %v2361_v44  ;;  %v2364_v57 = vmul.f32 (!%p3212_p11), 0.001953125, %v2363_v47  ;;  %3457 = vmatpush3.bf16.msra.mxu0 (!%p3212_p11), %v3683_v4 }
 0x92c   : > { %3495 = vmatpush3.bf16.msra.mxu1 (!%p3212_p11), %v3683_v4 }
 0x92d   : > { %v2372_v1 = vrot.slane %v2362_v28, %v5470_v46  ;;  %v2365_v40 = vmul.f32 %v2362_v28, %v2362_v28  ;;  %p3227_p13 = scmp.ne.s32.totalorder (!%p3226_p12), %s3711_s13, 0 }
 0x92f   : > { %2374 = vrot.lane.b32.xlu0 %v2372_v1, %s3737_s30  ;;  %v2366_v19 = vsub.f32 %v2364_v57, %v2365_v40 }
 0x931   : > { %v2367_v5 = vadd.f32 1e-05, %v2366_v19 }
 0x933   : > { %3684 = vrsqrt.f32 %v2367_v5 }
 0x93d   : > { %v3685_v26 = vpop.eup %3684 }
 0x93e   : > { %v2396_v59 = vrot.slane %v3685_v26, %v5470_v46 }
 0x940   : > { %2398 = vrot.lane.b32.xlu0 %v2396_v59, %s3737_s30 }
 0x998   : > { %v5018_v7 = vpop.permute.xlu1 %2423 }
 0x99c   : > { %v5055_v41 = vpop.permute.xlu1 %2448 }
 0x9a1   : > { %v5016_v34 = vpop.permute.xlu0 %2374 }
 0x9a2   : > { %v2385_v54 = vsub.f32 %v4908_v9, %v5016_v34  ;;  %v2386_v8 = vsub.f32 %v4912_v48, %v5016_v34  ;;  %v2377_v55 = vsub.f32 %v4892_v56, %v5016_v34  ;;  %v2378_v62 = vsub.f32 %v4896_v43, %v5016_v34 }
 0x9a3   : > { %v2387_v29 = vsub.f32 %v4906_v36, %v5016_v34  ;;  %v2388_v11 = vsub.f32 %v4910_v16, %v5016_v34  ;;  %v2379_v52 = vsub.f32 %v4890_v12, %v5016_v34  ;;  %v2380_v61 = vsub.f32 %v4894_v13, %v5016_v34 }
 0x9a4   : > { %v2389_v15 = vsub.f32 %v4916_v0, %v5016_v34  ;;  %v2390_v49 = vsub.f32 %v4920_v6, %v5016_v34  ;;  %v2381_v18 = vsub.f32 %v4900_v60, %v5016_v34  ;;  %v2382_v31 = vsub.f32 %v4904_v53, %v5016_v34 }
 0x9a5   : > { %v2391_v24 = vsub.f32 %v4914_v10, %v5016_v34  ;;  %v2392_v38 = vsub.f32 %v4918_v25, %v5016_v34  ;;  %v2383_v2 = vsub.f32 %v4898_v35, %v5016_v34  ;;  %v2384_v20 = vsub.f32 %v4902_v17, %v5016_v34 }
 0x9b2   : > { %v2399_v3 = vpop.permute.xlu0 %2398 }
 0x9b3   : > { %v2409_v27 = vmul.f32 %v2399_v3, %v2385_v54  ;;  %v2410_v39 = vmul.f32 %v2399_v3, %v2386_v8  ;;  %v2401_v22 = vmul.f32 %v2399_v3, %v2377_v55  ;;  %v2402_v50 = vmul.f32 %v2399_v3, %v2378_v62 }
 0x9b4   : > { %v2411_v63 = vmul.f32 %v2399_v3, %v2387_v29  ;;  %v2412_v51 = vmul.f32 %v2399_v3, %v2388_v11  ;;  %v2403_v37 = vmul.f32 %v2399_v3, %v2379_v52  ;;  %v2404_v14 = vmul.f32 %v2399_v3, %v2380_v61 }
 0x9b5   : > { %v2434_v58 = vmul.f32 %v5018_v7, %v2409_v27  ;;  %v2435_v30 = vmul.f32 %v5018_v7, %v2410_v39  ;;  %v2426_v32 = vmul.f32 %v5018_v7, %v2401_v22  ;;  %v2427_v45 = vmul.f32 %v5018_v7, %v2402_v50 }
 0x9b6   : > { %v2436_v42 = vmul.f32 %v5018_v7, %v2411_v63  ;;  %v2437_v44 = vmul.f32 %v5018_v7, %v2412_v51  ;;  %v2428_v47 = vmul.f32 %v5018_v7, %v2403_v37  ;;  %v2429_v28 = vmul.f32 %v5018_v7, %v2404_v14 }
 0x9b7   : > { %v2459_v57 = vadd.f32 %v5055_v41, %v2434_v58  ;;  %v2460_v21 = vadd.f32 %v5055_v41, %v2435_v30  ;;  %v2451_v46 = vadd.f32 %v5055_v41, %v2426_v32  ;;  %v2452_v1 = vadd.f32 %v5055_v41, %v2427_v45 }
 0x9b8   : > { %v2461_v40 = vadd.f32 %v5055_v41, %v2436_v42  ;;  %v2462_v23 = vadd.f32 %v5055_v41, %v2437_v44  ;;  %v2453_v19 = vadd.f32 %v5055_v41, %v2428_v47  ;;  %v2454_v5 = vadd.f32 %v5055_v41, %v2429_v28 }
 0x9b9   : > { %v2475_v26 = vmax.f32 %v2459_v57, 0.0  ;;  %v2476_v59 = vmax.f32 %v2460_v21, 0.0  ;;  %v2467_v33 = vmax.f32 %v2451_v46, 0.0  ;;  %v2468_v34 = vmax.f32 %v2452_v1, 0.0 }
 0x9ba   : > { %v2477_v54 = vmax.f32 %v2461_v40, 0.0  ;;  %v2478_v8 = vmax.f32 %v2462_v23, 0.0  ;;  %v2469_v55 = vmax.f32 %v2453_v19, 0.0  ;;  %v2470_v62 = vmax.f32 %v2454_v5, 0.0 }
 0x9bb   : > { %v2487_v29 = vpack.c.bf16 %v2476_v59, %v2475_v26  ;;  %v2483_v11 = vpack.c.bf16 %v2468_v34, %v2467_v33  ;;  %v2413_v4 = vmul.f32 %v2399_v3, %v2389_v15  ;;  %v2414_v52 = vmul.f32 %v2399_v3, %v2390_v49 }
 0x9bc   : > { %v2488_v61 = vpack.c.bf16 %v2478_v8, %v2477_v54  ;;  %v2484_v27 = vpack.c.bf16 %v2470_v62, %v2469_v55  ;;  %v2405_v39 = vmul.f32 %v2399_v3, %v2381_v18  ;;  %v2406_v22 = vmul.f32 %v2399_v3, %v2382_v31 }
 0x9bd   : > { %2516 = vrot.lane.b32.xlu1 %v2487_v29, %s3738_s22  ;;  %2508 = vrot.lane.b32.xlu0 %v2483_v11, %s3738_s22  ;;  %v2438_v50 = vmul.f32 %v5018_v7, %v2413_v4  ;;  %v2439_v63 = vmul.f32 %v5018_v7, %v2414_v52  ;;  %v2415_v51 = vmul.f32 %v2399_v3, %v2391_v24  ;;  %v3215_v29 = vld [vmem:[%s5405_s9 + $0x6] ss:$0 sm:$0xff] }
 0x9be   : > { %v2430_v37 = vmul.f32 %v5018_v7, %v2405_v39  ;;  %v2431_v14 = vmul.f32 %v5018_v7, %v2406_v22  ;;  %v2416_v15 = vmul.f32 %v2399_v3, %v2392_v38  ;;  %v2407_v49 = vmul.f32 %v2399_v3, %v2383_v2 }
 0x9bf   : > { %v2463_v58 = vadd.f32 %v5055_v41, %v2438_v50  ;;  %v2464_v18 = vadd.f32 %v5055_v41, %v2439_v63  ;;  %v2440_v31 = vmul.f32 %v5018_v7, %v2415_v51  ;;  %v2408_v30 = vmul.f32 %v2399_v3, %v2384_v20 }
 0x9c0   : > { %v2455_v32 = vadd.f32 %v5055_v41, %v2430_v37  ;;  %v2456_v45 = vadd.f32 %v5055_v41, %v2431_v14  ;;  %v2441_v42 = vmul.f32 %v5018_v7, %v2416_v15  ;;  %v2432_v24 = vmul.f32 %v5018_v7, %v2407_v49 }
 0x9c1   : > { %2518 = vrot.lane.b32.xlu1 %v2488_v61, %s3738_s22  ;;  %2510 = vrot.lane.b32.xlu0 %v2484_v27, %s3738_s22  ;;  %v2479_v38 = vmax.f32 %v2463_v58, 0.0  ;;  %v2480_v2 = vmax.f32 %v2464_v18, 0.0  ;;  %v2465_v44 = vadd.f32 %v5055_v41, %v2440_v31  ;;  %v2433_v47 = vmul.f32 %v5018_v7, %v2408_v30 }
 0x9c2   : > { %v2471_v28 = vmax.f32 %v2455_v32, 0.0  ;;  %v2472_v3 = vmax.f32 %v2456_v45, 0.0  ;;  %v2466_v20 = vadd.f32 %v5055_v41, %v2441_v42  ;;  %v2457_v57 = vadd.f32 %v5055_v41, %v2432_v24 }
 0x9c3   : > { %v2489_v21 = vpack.c.bf16 %v2480_v2, %v2479_v38  ;;  %v2481_v46 = vmax.f32 %v2465_v44, 0.0  ;;  %v2458_v1 = vadd.f32 %v5055_v41, %v2433_v47 }
 0x9c4   : > { %v2485_v40 = vpack.c.bf16 %v2472_v3, %v2471_v28  ;;  %v2482_v23 = vmax.f32 %v2466_v20, 0.0  ;;  %v2473_v19 = vmax.f32 %v2457_v57, 0.0 }
 0x9c5   : > { %2520 = vrot.lane.b32.xlu1 %v2489_v21, %s3738_s22  ;;  %v2474_v5 = vmax.f32 %v2458_v1, 0.0 }
 0x9c6   : > { %2512 = vrot.lane.b32.xlu0 %v2485_v40, %s3738_s22  ;;  %v2490_v26 = vpack.c.bf16 %v2482_v23, %v2481_v46 }
 0x9c7   : > { %v2486_v7 = vpack.c.bf16 %v2474_v5, %v2473_v19 }
 0x9c9   : > { %2522 = vrot.lane.b32.xlu1 %v2490_v26, %s3738_s22 }
 0x9ca   : > { %2514 = vrot.lane.b32.xlu0 %v2486_v7, %s3738_s22 }
 0xa2f   : > { %v2517_v59 = vpop.permute.xlu1 %2516  ;;  %v2509_v33 = vpop.permute.xlu0 %2508 }
 0xa30   : > { %3458 = vmatprep.mubr.msk.bf16.mxu0 %vm1743_vm13, %v2509_v33  ;;  %3466 = vmatprep.mubr.msk.bf16.mxu1 %vm1743_vm13, %v2517_v59 }
 0xa33   : > { %v2519_v41 = vpop.permute.xlu1 %2518  ;;  %v2511_v34 = vpop.permute.xlu0 %2510 }
 0xa34   : > { %3459 = vmatmul.mubr.msk.bf16.vlgmr.msra.gmra.mrb[0].mxu0 %vm1743_vm13, %v2511_v34  ;;  %3467 = vmatmul.mubr.msk.bf16.vlgmr.msra.gmra.mrb[0].mxu1 %vm1743_vm13, %v2519_v41 }
 0xa37   : > { %v2521_v54 = vpop.permute.xlu1 %2520 }
 0xa38   : > { %v2513_v8 = vpop.permute.xlu0 %2512  ;;  %3470 = vmatprep.mubr.msk.bf16.mxu1 %vm1743_vm13, %v2521_v54 }
 0xa39   : > { %3462 = vmatprep.mubr.msk.bf16.mxu0 %vm1743_vm13, %v2513_v8 }
 0xa3b   : > { %v2523_v55 = vpop.permute.xlu1 %2522 }
 0xa3c   : > { %v2515_v62 = vpop.permute.xlu0 %2514  ;;  %3471 = vmatmul.mubr.msk.bf16.gmra.mrb[4].mxu1 %vm1743_vm13, %v2523_v55 }
 0xa3d   : > { %3463 = vmatmul.mubr.msk.bf16.gmra.mrb[4].mxu0 %vm1743_vm13, %v2515_v62 }
 0xb07   : > { %v3460_v11 = vpop.f32.mrb[0].mxu0  ;;  %v3468_v4 = vpop.f32.mrb[0].mxu1 }
 0xb08   : > { %v2603_v52 = vadd.f32 %v3460_v11, %v3215_v29  ;;  %v2635_v61 = vadd.f32 %v3468_v4, %v3215_v29  ;;  %v2594_v27 = vpop.f32.mrb[1].mxu0  ;;  %v2626_v39 = vpop.f32.mrb[1].mxu1 }
 0xb09   : > { %v2595_v22 = vadd.f32 %v3215_v29, %v2594_v27  ;;  %v2627_v50 = vadd.f32 %v3215_v29, %v2626_v39  ;;  %v3461_v63 = vpop.f32.mrb[2].mxu0  ;;  %v3469_v51 = vpop.f32.mrb[2].mxu1 }
 0xb0a   : > { %v5109_v37 = vadd.f32 %v2603_v52, %v4890_v12  ;;  %v5112_v14 = vadd.f32 %v2635_v61, %v4906_v36  ;;  %v2606_v15 = vadd.f32 %v3461_v63, %v3215_v29  ;;  %v2638_v49 = vadd.f32 %v3469_v51, %v3215_v29  ;;  %v2597_v58 = vpop.f32.mrb[3].mxu0  ;;  %v2629_v18 = vpop.f32.mrb[3].mxu1 }
 0xb0b   : > { %v5115_v31 = vadd.f32 %v2595_v22, %v4892_v56  ;;  %v5118_v30 = vadd.f32 %v2627_v50, %v4908_v9  ;;  %v2598_v32 = vadd.f32 %v3215_v29, %v2597_v58  ;;  %v2630_v45 = vadd.f32 %v3215_v29, %v2629_v18 }
 0xb0c   : > { %v5121_v42 = vadd.f32 %v2606_v15, %v4894_v13  ;;  %v5124_v12 = vadd.f32 %v2638_v49, %v4910_v16 }
 0xb0d   : > { %v5127_v36 = vadd.f32 %v2598_v32, %v4896_v43  ;;  %v5130_v24 = vadd.f32 %v2630_v45, %v4912_v48 }
 0xb0f   : > { %v3472_v38 = vpop.f32.mrb[4].mxu1 }
 0xb10   : > { %v3464_v56 = vpop.f32.mrb[4].mxu0  ;;  %v2651_v2 = vadd.f32 %v3472_v38, %v3215_v29  ;;  %v2642_v44 = vpop.f32.mrb[5].mxu1  ;;  %2676 = sbr.rel (%p3226_p12) target bundleno = 2896 (0xb50), region = 92 }
 0xb11   : > { %v2619_v9 = vadd.f32 %v3464_v56, %v3215_v29  ;;  %v2610_v47 = vpop.f32.mrb[5].mxu0  ;;  %v2643_v28 = vadd.f32 %v3215_v29, %v2642_v44  ;;  %v3473_v3 = vpop.f32.mrb[6].mxu1 }
 0xb12   : > { %v5133_v13 = vadd.f32 %v2651_v2, %v4914_v10  ;;  %v2611_v20 = vadd.f32 %v3215_v29, %v2610_v47  ;;  %v3465_v16 = vpop.f32.mrb[6].mxu0  ;;  %v2654_v57 = vadd.f32 %v3473_v3, %v3215_v29  ;;  %v2645_v21 = vpop.f32.mrb[7].mxu1 }
 0xb13   : > { %v5136_v43 = vadd.f32 %v2619_v9, %v4898_v35  ;;  %v5139_v48 = vadd.f32 %v2643_v28, %v4916_v0  ;;  %v2622_v46 = vadd.f32 %v3465_v16, %v3215_v29  ;;  %v2613_v1 = vpop.f32.mrb[7].mxu0  ;;  %v2646_v40 = vadd.f32 %v3215_v29, %v2645_v21 }
 0xb14   : > { %v5142_v23 = vadd.f32 %v2611_v20, %v4900_v60  ;;  %v5145_v19 = vadd.f32 %v2654_v57, %v4918_v25  ;;  %v2614_v10 = vadd.f32 %v3215_v29, %v2613_v1 }
 0xb15   : > { %v5148_v5 = vadd.f32 %v2622_v46, %v4902_v17  ;;  %v5151_v26 = vadd.f32 %v2646_v40, %v4920_v6 }
 0xb16   : > { %v5154_v35 = vadd.f32 %v2614_v10, %v4904_v53 }
 0xb17   : > { %2680 = sbr.rel (%p3227_p13) target bundleno = 2846 (0xb1e), region = 96  ;;  %vm2681_vm2 = vcmask (!%p3227_p13), 123904   ;;  %v3739_v60 = vmov (!%p3227_p13), 0.0  }
 0xb18   : > { %2682 = vst.msk [vmem:[#allocation5] sm:$0x3] (!%p3227_p13), %vm2681_vm2, %v3739_v60 }
 0xb1e PF: > { %v2683_v17 = vsel %vm1447_vm10, %v5115_v31, 0.0  ;;  %v2684_v0 = vsel %vm1447_vm10, %v5127_v36, 0.0  ;;  %v2686_v53 = vsel %vm1447_vm10, %v5109_v37, 0.0  ;;  %v2688_v6 = vsel %vm1447_vm10, %v5121_v42, 0.0 }
 0xb1f   : > { %v2685_v25 = vadd.f32 %v2684_v0, %v2683_v17  ;;  %v2690_v59 = vsel %vm1447_vm10, %v5142_v23, 0.0  ;;  %v2720_v41 = vmul.f32 %v5115_v31, %v5115_v31  ;;  %v2721_v34 = vmul.f32 %v5127_v36, %v5127_v36 }
 0xb20   : > { %v2722_v54 = vmul.f32 %v5109_v37, %v5109_v37  ;;  %v2692_v8 = vsel %vm1447_vm10, %v5154_v35, 0.0  ;;  %v2723_v62 = vmul.f32 %v5121_v42, %v5121_v42  ;;  %v2694_v29 = vsel %vm1447_vm10, %v5136_v43, 0.0 }
 0xb21   : > { %v2687_v7 = vadd.f32 %v2686_v53, %v2685_v25  ;;  %v2724_v11 = vmul.f32 %v5142_v23, %v5142_v23  ;;  %v2736_v52 = vsel %vm1447_vm10, %v2720_v41, 0.0  ;;  %v2737_v61 = vsel %vm1447_vm10, %v2721_v34, 0.0 }
 0xb22   : > { %v2739_v27 = vsel %vm1447_vm10, %v2722_v54, 0.0  ;;  %v2696_v39 = vsel %vm1447_vm10, %v5148_v5, 0.0  ;;  %v2738_v22 = vadd.f32 %v2737_v61, %v2736_v52  ;;  %v2725_v63 = vmul.f32 %v5154_v35, %v5154_v35 }
 0xb23   : > { %v2689_v33 = vadd.f32 %v2688_v6, %v2687_v7  ;;  %v2741_v51 = vsel %vm1447_vm10, %v2723_v62, 0.0  ;;  %v2698_v15 = vsel %vm1447_vm10, %v5118_v30, 0.0  ;;  %v2726_v18 = vmul.f32 %v5136_v43, %v5136_v43 }
 0xb24   : > { %v2740_v49 = vadd.f32 %v2739_v27, %v2738_v22  ;;  %v2743_v32 = vsel %vm1447_vm10, %v2724_v11, 0.0  ;;  %v2700_v45 = vsel %vm1447_vm10, %v5130_v24, 0.0  ;;  %v2727_v2 = vmul.f32 %v5148_v5, %v5148_v5 }
 0xb25   : > { %v2691_v55 = vadd.f32 %v2690_v59, %v2689_v33  ;;  %v2745_v44 = vsel %vm1447_vm10, %v2725_v63, 0.0  ;;  %v2702_v9 = vsel %vm1447_vm10, %v5112_v14, 0.0  ;;  %v2728_v3 = vmul.f32 %v5118_v30, %v5118_v30 }
 0xb26   : > { %v2742_v38 = vadd.f32 %v2741_v51, %v2740_v49  ;;  %v2747_v20 = vsel %vm1447_vm10, %v2726_v18, 0.0  ;;  %v2704_v16 = vsel %vm1447_vm10, %v5124_v12, 0.0  ;;  %v2729_v46 = vmul.f32 %v5130_v24, %v5130_v24 }
 0xb27   : > { %v2693_v4 = vadd.f32 %v2692_v8, %v2691_v55  ;;  %v2749_v1 = vsel %vm1447_vm10, %v2727_v2, 0.0  ;;  %v2706_v40 = vsel %vm1447_vm10, %v5139_v48, 0.0  ;;  %v2730_v17 = vmul.f32 %v5112_v14, %v5112_v14 }
 0xb28   : > { %v2744_v47 = vadd.f32 %v2743_v32, %v2742_v38  ;;  %v2751_v0 = vsel %vm1447_vm10, %v2728_v3, 0.0  ;;  %v2708_v53 = vsel %vm1447_vm10, %v5151_v26, 0.0  ;;  %v2731_v7 = vmul.f32 %v5124_v12, %v5124_v12 }
 0xb29   : > { %v2695_v50 = vadd.f32 %v2694_v29, %v2693_v4  ;;  %v2753_v59 = vsel %vm1447_vm10, %v2729_v46, 0.0  ;;  %v2710_v33 = vsel %vm1447_vm10, %v5133_v13, 0.0  ;;  %v2732_v54 = vmul.f32 %v5139_v48, %v5139_v48 }
 0xb2a   : > { %v2746_v57 = vadd.f32 %v2745_v44, %v2744_v47  ;;  %v2755_v8 = vsel %vm1447_vm10, %v2730_v17, 0.0  ;;  %v2712_v55 = vsel %vm1447_vm10, %v5145_v19, 0.0  ;;  %v2733_v11 = vmul.f32 %v5151_v26, %v5151_v26 }
 0xb2b   : > { %v2697_v58 = vadd.f32 %v2696_v39, %v2695_v50  ;;  %v2757_v4 = vsel %vm1447_vm10, %v2731_v7, 0.0  ;;  %v2734_v27 = vmul.f32 %v5133_v13, %v5133_v13  ;;  %v2759_v39 = vsel %vm1447_vm10, %v2732_v54, 0.0 }
 0xb2c   : > { %v2748_v10 = vadd.f32 %v2747_v20, %v2746_v57  ;;  %v2735_v63 = vmul.f32 %v5145_v19, %v5145_v19  ;;  %v2761_v51 = vsel %vm1447_vm10, %v2733_v11, 0.0  ;;  %vm2774_vm3 = vcmask 1040384  }
 0xb2d   : > { %v2699_v56 = vadd.f32 %v2698_v15, %v2697_v58  ;;  %v2763_v58 = vsel %vm1447_vm10, %v2734_v27, 0.0  ;;  %vm2777_vm4 = vcmask 123904  }
 0xb2e   : > { %v2750_v25 = vadd.f32 %v2749_v1, %v2748_v10  ;;  %v2765_v32 = vsel %vm1447_vm10, %v2735_v63, 0.0 }
 0xb2f   : > { %v2701_v28 = vadd.f32 %v2700_v45, %v2699_v56 }
 0xb30   : > { %v2752_v41 = vadd.f32 %v2751_v0, %v2750_v25 }
 0xb31   : > { %v2703_v21 = vadd.f32 %v2702_v9, %v2701_v28 }
 0xb32   : > { %v2754_v62 = vadd.f32 %v2753_v59, %v2752_v41 }
 0xb33   : > { %v2705_v60 = vadd.f32 %v2704_v16, %v2703_v21  ;;  %v2773_v21 = vld [vmem:[#allocation5] sm:$0x3] }
 0xb34   : > { %v2756_v52 = vadd.f32 %v2755_v8, %v2754_v62 }
 0xb35   : > { %v2707_v6 = vadd.f32 %v2706_v40, %v2705_v60 }
 0xb36   : > { %v2758_v22 = vadd.f32 %v2757_v4, %v2756_v52 }
 0xb37   : > { %v2709_v34 = vadd.f32 %v2708_v53, %v2707_v6 }
 0xb38   : > { %v2760_v15 = vadd.f32 %v2759_v39, %v2758_v22 }
 0xb39   : > { %v2711_v29 = vadd.f32 %v2710_v33, %v2709_v34 }
 0xb3a   : > { %v2762_v18 = vadd.f32 %v2761_v51, %v2760_v15 }
 0xb3b   : > { %v2713_v61 = vadd.f32 %v2712_v55, %v2711_v29 }
 0xb3c   : > { %v2764_v38 = vadd.f32 %v2763_v58, %v2762_v18 }
 0xb3d   : > { %v2714_v50 = vrot.slane %v2713_v61, 4 }
 0xb3e   : > { %v2766_v56 = vadd.f32 %v2765_v32, %v2764_v38 }
 0xb3f   : > { %v2715_v49 = vadd.f32 %v2714_v50, %v2713_v61 }
 0xb40   : > { %v2767_v44 = vrot.slane %v2766_v56, 4 }
 0xb41   : > { %v2716_v45 = vrot.slane %v2715_v49, 2 }
 0xb42   : > { %v2768_v9 = vadd.f32 %v2767_v44, %v2766_v56 }
 0xb43   : > { %v2717_v2 = vadd.f32 %v2716_v45, %v2715_v49 }
 0xb44   : > { %v2769_v28 = vrot.slane %v2768_v9, 2 }
 0xb45   : > { %v2718_v47 = vrot.slane %v2717_v2, 1 }
 0xb46   : > { %v2770_v3 = vadd.f32 %v2769_v28, %v2768_v9 }
 0xb47   : > { %v2719_v20 = vadd.f32 %v2718_v47, %v2717_v2 }
 0xb48   : > { %v2771_v16 = vrot.slane %v2770_v3, 1 }
 0xb4a   : > { %v2772_v57 = vadd.f32 %v2771_v16, %v2770_v3 }
 0xb4c   : > { %v2775_v46 = vsel %vm2774_vm3, %v2719_v20, %v2772_v57 }
 0xb4d   : > { %v2776_v1 = vadd.f32 %v2775_v46, %v2773_v21 }
 0xb4f   : > { %2778 = vst.msk [vmem:[#allocation5] sm:$0x3] %vm2777_vm4, %v2776_v1 }
 0xb50 PF: > { %p3228_p0 = scmp.ne.s32.totalorder %s3715_s14, 3 }
 0xb51   : > { %v3686_v40 = vld [vmem:[%s5404_s8] sm:$0xff] (!%p3228_p0)   ;;  %v5471_v7 = vld [vmem:[#allocation22_spill] sm:$0xff] (!%p3228_p0)  ;;  %vm3031_vm5 = vcmask (!%p3228_p0), 31744  }
 0xb52   : > { %2782 = sbr.rel (%p3228_p0) target bundleno = 3165 (0xc5d), region = 100  ;;  %3474 = vmatprep.subr.bf16.mxu0 (!%p3228_p0), %v3686_v40  ;;  %3496 = vmatprep.subr.bf16.mxu1 (!%p3228_p0), %v3686_v40 }
 0xb53   : > { %3475 = vmatpush3.bf16.msra.mxu0 (!%p3228_p0), %v3686_v40  ;;  %3497 = vmatpush3.bf16.msra.mxu1 (!%p3228_p0), %v3686_v40 }
 0xb56   : > { %v2783_v10 = vld [vmem:[#allocation5] sm:$0x1] (!%p3228_p0)  ;;  %v2785_v60 = vld [vmem:[#allocation5 + $0x1] sm:$0x1] (!%p3228_p0) }
 0xb57   : > { %v2784_v17 = vmul.f32 (!%p3228_p0), 0.001953125, %v2783_v10  ;;  %v2786_v0 = vmul.f32 (!%p3228_p0), 0.001953125, %v2785_v60 }
 0xb59   : > { %v2787_v53 = vmul.f32 %v2784_v17, %v2784_v17  ;;  %v5243_v59 = vrot.slane %v2784_v17, %v5471_v7 }
 0xb5b   : > { %v2788_v25 = vsub.f32 %v2786_v0, %v2787_v53  ;;  %v2795_v33 = vsub.f32 %v5115_v31, %v5243_v59  ;;  %v2796_v41 = vsub.f32 %v5127_v36, %v5243_v59  ;;  %v2803_v34 = vsub.f32 %v5118_v30, %v5243_v59 }
 0xb5c   : > { %v2804_v54 = vsub.f32 %v5130_v24, %v5243_v59  ;;  %v2797_v8 = vsub.f32 %v5109_v37, %v5243_v59  ;;  %v2798_v62 = vsub.f32 %v5121_v42, %v5243_v59  ;;  %v2805_v29 = vsub.f32 %v5112_v14, %v5243_v59  ;;  %v5275_v14 = vld [vmem:[%s5405_s9 + $0xe] ss:$0 sm:$0xff] }
 0xb5d   : > { %v2789_v6 = vadd.f32 1e-05, %v2788_v25  ;;  %v2806_v31 = vsub.f32 %v5124_v12, %v5243_v59  ;;  %v2799_v36 = vsub.f32 %v5142_v23, %v5243_v59  ;;  %v2800_v24 = vsub.f32 %v5154_v35, %v5243_v59 }
 0xb5e   : > { %v2807_v37 = vsub.f32 %v5139_v48, %v5243_v59  ;;  %v2808_v42 = vsub.f32 %v5151_v26, %v5243_v59  ;;  %v2801_v12 = vsub.f32 %v5136_v43, %v5243_v59  ;;  %v2802_v23 = vsub.f32 %v5148_v5, %v5243_v59  ;;  %v5292_v43 = vld [vmem:[%s5405_s9 + $0xf] ss:$0 sm:$0xff] }
 0xb5f   : > { %3687 = vrsqrt.f32 %v2789_v6  ;;  %v2809_v35 = vsub.f32 %v5133_v13, %v5243_v59  ;;  %v2810_v48 = vsub.f32 %v5145_v19, %v5243_v59 }
 0xb69   : > { %v3688_v55 = vpop.eup %3687 }
 0xb6a   : > { %v5264_v30 = vrot.slane %v3688_v55, %v5471_v7 }
 0xb6c   : > { %v2815_v11 = vmul.f32 %v5264_v30, %v2795_v33  ;;  %v2816_v26 = vmul.f32 %v5264_v30, %v2796_v41  ;;  %v2823_v4 = vmul.f32 %v5264_v30, %v2803_v34  ;;  %v2824_v52 = vmul.f32 %v5264_v30, %v2804_v54 }
 0xb6d   : > { %v2817_v5 = vmul.f32 %v5264_v30, %v2797_v8  ;;  %v2818_v13 = vmul.f32 %v5264_v30, %v2798_v62  ;;  %v2825_v61 = vmul.f32 %v5264_v30, %v2805_v29  ;;  %v2826_v19 = vmul.f32 %v5264_v30, %v2806_v31 }
 0xb6e   : > { %v2836_v27 = vmul.f32 %v5275_v14, %v2815_v11  ;;  %v2837_v39 = vmul.f32 %v5275_v14, %v2816_v26  ;;  %v2844_v22 = vmul.f32 %v5275_v14, %v2823_v4  ;;  %v2845_v50 = vmul.f32 %v5275_v14, %v2824_v52 }
 0xb6f   : > { %v2838_v63 = vmul.f32 %v5275_v14, %v2817_v5  ;;  %v2839_v51 = vmul.f32 %v5275_v14, %v2818_v13  ;;  %v2846_v15 = vmul.f32 %v5275_v14, %v2825_v61  ;;  %v2847_v49 = vmul.f32 %v5275_v14, %v2826_v19 }
 0xb70   : > { %v2857_v58 = vadd.f32 %v5292_v43, %v2836_v27  ;;  %v2858_v18 = vadd.f32 %v5292_v43, %v2837_v39  ;;  %v2865_v32 = vadd.f32 %v5292_v43, %v2844_v22  ;;  %v2866_v45 = vadd.f32 %v5292_v43, %v2845_v50  ;;  %v3231_v39 = vld [vmem:[%s5405_s9 + $0x7] ss:$0 sm:$0xff] }
 0xb71   : > { %v2859_v38 = vadd.f32 %v5292_v43, %v2838_v63  ;;  %v2860_v56 = vadd.f32 %v5292_v43, %v2839_v51  ;;  %v2867_v2 = vadd.f32 %v5292_v43, %v2846_v15  ;;  %v2868_v44 = vadd.f32 %v5292_v43, %v2847_v49 }
 0xb72   : > { %v2873_v9 = vmax.f32 %v2857_v58, 0.0  ;;  %v2874_v47 = vmax.f32 %v2858_v18, 0.0  ;;  %v2881_v28 = vmax.f32 %v2865_v32, 0.0  ;;  %v2882_v3 = vmax.f32 %v2866_v45, 0.0 }
 0xb73   : > { %v2875_v20 = vmax.f32 %v2859_v38, 0.0  ;;  %v2876_v16 = vmax.f32 %v2860_v56, 0.0  ;;  %v2883_v57 = vmax.f32 %v2867_v2, 0.0  ;;  %v2884_v21 = vmax.f32 %v2868_v44, 0.0 }
 0xb74   : > { %v2889_v46 = vpack.c.bf16 %v2874_v47, %v2873_v9  ;;  %v2893_v1 = vpack.c.bf16 %v2882_v3, %v2881_v28  ;;  %v2819_v40 = vmul.f32 %v5264_v30, %v2799_v36  ;;  %v2820_v10 = vmul.f32 %v5264_v30, %v2800_v24 }
 0xb75   : > { %v2890_v60 = vpack.c.bf16 %v2876_v16, %v2875_v20  ;;  %v2894_v17 = vpack.c.bf16 %v2884_v21, %v2883_v57  ;;  %v2827_v0 = vmul.f32 %v5264_v30, %v2807_v37  ;;  %v2828_v53 = vmul.f32 %v5264_v30, %v2808_v42 }
 0xb76   : > { %3476 = vmatprep.mubr.msk.bf16.mxu0 %vm1447_vm10, %v2889_v46  ;;  %3484 = vmatprep.mubr.msk.bf16.mxu1 %vm1447_vm10, %v2893_v1  ;;  %v2840_v25 = vmul.f32 %v5275_v14, %v2819_v40  ;;  %v2841_v6 = vmul.f32 %v5275_v14, %v2820_v10  ;;  %v2821_v7 = vmul.f32 %v5264_v30, %v2801_v12 }
 0xb77   : > { %3477 = vmatmul.mubr.msk.bf16.vlgmr.msra.gmra.mrb[0].mxu0 %vm1447_vm10, %v2890_v60  ;;  %3485 = vmatmul.mubr.msk.bf16.vlgmr.msra.gmra.mrb[0].mxu1 %vm1447_vm10, %v2894_v17  ;;  %v2848_v59 = vmul.f32 %v5275_v14, %v2827_v0  ;;  %v2849_v33 = vmul.f32 %v5275_v14, %v2828_v53  ;;  %v2822_v41 = vmul.f32 %v5264_v30, %v2802_v23 }
 0xb78   : > { %v2861_v34 = vadd.f32 %v5292_v43, %v2840_v25  ;;  %v2862_v54 = vadd.f32 %v5292_v43, %v2841_v6  ;;  %v2842_v8 = vmul.f32 %v5275_v14, %v2821_v7  ;;  %v2829_v55 = vmul.f32 %v5264_v30, %v2809_v35 }
 0xb79   : > { %v2869_v62 = vadd.f32 %v5292_v43, %v2848_v59  ;;  %v2870_v29 = vadd.f32 %v5292_v43, %v2849_v33  ;;  %v2843_v31 = vmul.f32 %v5275_v14, %v2822_v41  ;;  %v2830_v36 = vmul.f32 %v5264_v30, %v2810_v48 }
 0xb7a   : > { %v2877_v24 = vmax.f32 %v2861_v34, 0.0  ;;  %v2878_v37 = vmax.f32 %v2862_v54, 0.0  ;;  %v2863_v42 = vadd.f32 %v5292_v43, %v2842_v8  ;;  %v2850_v12 = vmul.f32 %v5275_v14, %v2829_v55 }
 0xb7b   : > { %v2885_v23 = vmax.f32 %v2869_v62, 0.0  ;;  %v2886_v11 = vmax.f32 %v2870_v29, 0.0  ;;  %v2864_v26 = vadd.f32 %v5292_v43, %v2843_v31  ;;  %v2851_v35 = vmul.f32 %v5275_v14, %v2830_v36 }
 0xb7c   : > { %v2891_v4 = vpack.c.bf16 %v2878_v37, %v2877_v24  ;;  %v2879_v52 = vmax.f32 %v2863_v42, 0.0  ;;  %v2871_v5 = vadd.f32 %v5292_v43, %v2850_v12 }
 0xb7d   : > { %v2895_v13 = vpack.c.bf16 %v2886_v11, %v2885_v23  ;;  %v2880_v61 = vmax.f32 %v2864_v26, 0.0  ;;  %v2872_v30 = vadd.f32 %v5292_v43, %v2851_v35 }
 0xb7e   : > { %3480 = vmatprep.mubr.msk.bf16.mxu0 %vm1447_vm10, %v2891_v4  ;;  %v2887_v48 = vmax.f32 %v2871_v5, 0.0 }
 0xb7f   : > { %3488 = vmatprep.mubr.msk.bf16.mxu1 %vm1447_vm10, %v2895_v13  ;;  %v2892_v19 = vpack.c.bf16 %v2880_v61, %v2879_v52  ;;  %v2888_v27 = vmax.f32 %v2872_v30, 0.0 }
 0xb81   : > { %3481 = vmatmul.mubr.msk.bf16.gmra.mrb[4].mxu0 %vm1447_vm10, %v2892_v19  ;;  %v2896_v14 = vpack.c.bf16 %v2888_v27, %v2887_v48 }
 0xb83   : > { %3489 = vmatmul.mubr.msk.bf16.gmra.mrb[4].mxu1 %vm1447_vm10, %v2896_v14 }
 0xc4a   : > { %v3478_v22 = vpop.f32.mrb[0].mxu0  ;;  %v3486_v43 = vpop.f32.mrb[0].mxu1 }
 0xc4b   : > { %v2977_v50 = vadd.f32 %v3478_v22, %v3231_v39  ;;  %v3009_v63 = vadd.f32 %v3486_v43, %v3231_v39  ;;  %v2968_v51 = vpop.f32.mrb[1].mxu0  ;;  %v3000_v15 = vpop.f32.mrb[1].mxu1 }
 0xc4c   : > { %v2969_v49 = vadd.f32 %v3231_v39, %v2968_v51  ;;  %v3001_v58 = vadd.f32 %v3231_v39, %v3000_v15  ;;  %v3479_v18 = vpop.f32.mrb[2].mxu0  ;;  %v3487_v32 = vpop.f32.mrb[2].mxu1 }
 0xc4d   : > { %3034 = vst.msk [vmem:[%s3850_s24 + $0x10] sm:$0xff] %vm3031_vm5, %v2977_v50  ;;  %3042 = vst.msk [vmem:[%s3850_s24 + $0x50] sm:$0xff] %vm3031_vm5, %v3009_v63  ;;  %v2980_v45 = vadd.f32 %v3479_v18, %v3231_v39  ;;  %v3012_v38 = vadd.f32 %v3487_v32, %v3231_v39  ;;  %v2971_v56 = vpop.f32.mrb[3].mxu0  ;;  %v3003_v2 = vpop.f32.mrb[3].mxu1 }
 0xc4e   : > { %3032 = vst.msk [vmem:[%s3850_s24] sm:$0xff] %vm3031_vm5, %v2969_v49  ;;  %3040 = vst.msk [vmem:[%s3850_s24 + $0x40] sm:$0xff] %vm3031_vm5, %v3001_v58  ;;  %v2972_v44 = vadd.f32 %v3231_v39, %v2971_v56  ;;  %v3004_v9 = vadd.f32 %v3231_v39, %v3003_v2 }
 0xc4f   : > { %3035 = vst.msk [vmem:[%s3850_s24 + $0x18] sm:$0xff] %vm3031_vm5, %v2980_v45  ;;  %3043 = vst.msk [vmem:[%s3850_s24 + $0x58] sm:$0xff] %vm3031_vm5, %v3012_v38 }
 0xc50   : > { %3033 = vst.msk [vmem:[%s3850_s24 + $0x8] sm:$0xff] %vm3031_vm5, %v2972_v44  ;;  %3041 = vst.msk [vmem:[%s3850_s24 + $0x48] sm:$0xff] %vm3031_vm5, %v3004_v9 }
 0xc54   : > { %v3482_v47 = vpop.f32.mrb[4].mxu0 }
 0xc55   : > { %v2993_v28 = vadd.f32 %v3482_v47, %v3231_v39  ;;  %v2984_v3 = vpop.f32.mrb[5].mxu0 }
 0xc56   : > { %v3490_v20 = vpop.f32.mrb[4].mxu1  ;;  %v2985_v16 = vadd.f32 %v3231_v39, %v2984_v3  ;;  %v3483_v57 = vpop.f32.mrb[6].mxu0 }
 0xc57   : > { %3038 = vst.msk [vmem:[%s3850_s24 + $0x30] sm:$0xff] %vm3031_vm5, %v2993_v28  ;;  %v3025_v21 = vadd.f32 %v3490_v20, %v3231_v39  ;;  %v3016_v46 = vpop.f32.mrb[5].mxu1  ;;  %v2996_v1 = vadd.f32 %v3483_v57, %v3231_v39  ;;  %v2987_v40 = vpop.f32.mrb[7].mxu0 }
 0xc58   : > { %3036 = vst.msk [vmem:[%s3850_s24 + $0x20] sm:$0xff] %vm3031_vm5, %v2985_v16  ;;  %v3017_v10 = vadd.f32 %v3231_v39, %v3016_v46  ;;  %v3491_v60 = vpop.f32.mrb[6].mxu1  ;;  %v2988_v17 = vadd.f32 %v3231_v39, %v2987_v40 }
 0xc59   : > { %3046 = vst.msk [vmem:[%s3850_s24 + $0x70] sm:$0xff] %vm3031_vm5, %v3025_v21  ;;  %3039 = vst.msk [vmem:[%s3850_s24 + $0x38] sm:$0xff] %vm3031_vm5, %v2996_v1  ;;  %v3028_v0 = vadd.f32 %v3491_v60, %v3231_v39  ;;  %v3019_v53 = vpop.f32.mrb[7].mxu1 }
 0xc5a   : > { %3044 = vst.msk [vmem:[%s3850_s24 + $0x60] sm:$0xff] %vm3031_vm5, %v3017_v10  ;;  %3037 = vst.msk [vmem:[%s3850_s24 + $0x28] sm:$0xff] %vm3031_vm5, %v2988_v17  ;;  %v3020_v25 = vadd.f32 %v3231_v39, %v3019_v53 }
 0xc5b   : > { %3047 = vst.msk [vmem:[%s3850_s24 + $0x78] sm:$0xff] %vm3031_vm5, %v3028_v0 }
 0xc5c   : > { %3045 = vst.msk [vmem:[%s3850_s24 + $0x68] sm:$0xff] %vm3031_vm5, %v3020_v25 }
 0xc5d PF: > { %s20_s17 = sadd.s32 1, %s3727_s17   ;;  %s5472_s13 = smov %s3719_s15 }
 0xc5e   : > { %p17_p1 = scmp.ge.s32.totalorder %s20_s17, 18   ;;  %s5473_s14 = smov %s3723_s16 }
 0xc5f   : > { %s5474_s15 = smov %s5477_s18  ;;  %s5475_s16 = smov %s5481_s19 }
 0xc60   :  { %19 = sbr.rel (!%p17_p1) target bundleno = 3 (0x3), region = 130 }

</bundles_post_ra>
